<compile_context>
chip_gen: v5e
topology: v5e:2x2
jax: 0.10.0
libtpu: 0.0.40
codegen_flags: <defaults>
</compile_context>

<pallas_src>
import functools
import math

import jax
import jax.numpy as jnp
from jax.experimental import pallas as pl
from jax.experimental.pallas import tpu as pltpu

EPS = 1e-6
_NEG_BIG = -1e30

# Target tile sizes (largest end for v5e/v6e; v7x's 64 MiB VMEM is handled by
# the per-chip vmem limit + E-blocking + single-buffered weights).
_SEQ_TILE = 256       # pre / post sequence tile
_ATTN_Q_TILE = 512    # flash-attention q tile
_ATTN_KV_TILE = 512   # flash-attention in-kernel kv chunk
_MLP_E_TILE = 1024    # post-attention MLP hidden-dim chunk


# ----------------------------- math helpers -----------------------------
def _ln(x, eps=EPS):
    """LayerNorm (no affine), single-pass variance (one lane reduction)."""
    x = x.astype(jnp.float32)
    mu = jnp.mean(x, axis=-1, keepdims=True)
    var = jnp.maximum(jnp.mean(x * x, axis=-1, keepdims=True) - mu * mu, 0.0)
    return (x - mu) * jax.lax.rsqrt(var + eps)


def _gelu_tanh(x):
    c = math.sqrt(2.0 / math.pi)
    return 0.5 * x * (1.0 + jnp.tanh(c * (x + 0.044715 * x * x * x)))


def _pick_tile(n, target):
    """Largest divisor of n that is <= target, preferring multiples of 8."""
    if n <= target:
        return n
    div8 = [d for d in range(8, target + 1, 8) if n % d == 0]
    if div8:
        return max(div8)
    return max(d for d in range(1, target + 1) if n % d == 0)


def _pick_head_group(H, Dh):
    """Smallest head group whose channel width is a multiple of 128, else all heads."""
    for hg in range(1, H + 1):
        if H % hg == 0 and (hg * Dh) % 128 == 0:
            return hg
    return H


# ----------------------------- hardware probes -----------------------------
@functools.lru_cache(maxsize=1)
def _vmem_limit_bytes():
    cap = None
    try:
        cap = int(pltpu.get_tpu_info().vmem_capacity_bytes)
    except Exception:
        cap = None
    if not cap or cap <= 0:
        try:
            kind = jax.devices()[0].device_kind.lower()
        except Exception:
            kind = ""
        cap = (64 if "v7" in kind else 128) * 1024 * 1024
    return int(cap * 0.8)            # leave headroom for Mosaic-internal scratch


@functools.lru_cache(maxsize=1)
def _bf16_exp_ok():
    """bf16 EUP path exists on v6e/v7x only; keep f32 exp elsewhere."""
    try:
        kind = jax.devices()[0].device_kind.lower()
    except Exception:
        return False
    return ("v6" in kind) or ("v7" in kind)


def _probe_copy_kernel(x_ref, o_ref):
    o_ref[...] = x_ref[...]


@functools.lru_cache(maxsize=1)
def _single_buffer_supported():
    """Probe whether pipeline_mode=pl.Buffered(1) is accepted on this install."""
    try:
        spec = pl.BlockSpec((8, 128), lambda i: (0, 0), pipeline_mode=pl.Buffered(1))
        x = jnp.zeros((8, 128), jnp.float32)
        out = pl.pallas_call(
            _probe_copy_kernel,
            grid=(1,),
            in_specs=[spec],
            out_specs=pl.BlockSpec((8, 128), lambda i: (0, 0)),
            out_shape=jax.ShapeDtypeStruct((8, 128), jnp.float32),
        )(x)
        jax.block_until_ready(out)
        return True
    except Exception:
        return False


def _weight_spec(shape, index_map):
    """BlockSpec for blocks whose index is constant across the inner grid axes.

    Single-buffered when supported: they gain nothing from double-buffering
    (never re-fetched between index changes) and it halves their VMEM cost."""
    if _single_buffer_supported():
        return pl.BlockSpec(shape, index_map, pipeline_mode=pl.Buffered(1))
    return pl.BlockSpec(shape, index_map)


# ----------------------------- Pallas kernels -----------------------------
def _pre_attn_kernel(x_ref, shift_ref, scale_ref, wqkv_ref, bqkv_ref,
                     gq_ref, betaq_ref, gk_ref, betak_ref,
                     q_ref, k_ref, v_ref, *, C, sm_scale):
    x = x_ref[0]                                   # (tT, C) f32
    shift = shift_ref[0, 0]                        # (1, C)
    scale = scale_ref[0, 0]                        # (1, C)

    # AdaptiveLayerNorm (NOTE: the torch module applies NO SiLU on t here).
    xa = _ln(x) * (1.0 + scale) + shift

    # Fused q/k/v projection (bf16 MXU, f32 accumulation).
    qkv = jnp.dot(xa.astype(jnp.bfloat16), wqkv_ref[0],
                  preferred_element_type=jnp.float32) + bqkv_ref[0]
    q = qkv[:, :C]
    k = qkv[:, C:2 * C]
    v = qkv[:, 2 * C:]

    # q/k LayerNorms (affine, eps=1e-6); fold 1/sqrt(Dh) into q.
    q = (_ln(q) * gq_ref[0] + betaq_ref[0]) * sm_scale
    k = _ln(k) * gk_ref[0] + betak_ref[0]

    q_ref[0] = q.astype(q_ref.dtype)
    k_ref[0] = k.astype(k_ref.dtype)
    v_ref[0] = v.astype(v_ref.dtype)


def _flash_attn_kernel(q_ref, k_ref, v_ref, o_ref, m_sc, l_sc, acc_sc,
                       *, hg, dh, tk, use_bf16_exp):
    kv_idx = pl.program_id(3)

    @pl.when(kv_idx == 0)
    def _():
        m_sc[...] = jnp.full_like(m_sc, _NEG_BIG)
        l_sc[...] = jnp.zeros_like(l_sc)
        acc_sc[...] = jnp.zeros_like(acc_sc)

    # K/V are resident over the whole sequence per (batch, head-group); slice
    # the current kv chunk in-kernel (no HBM re-reads per q tile).
    start = pl.multiple_of(kv_idx * tk, tk)
    q = q_ref[0]                              # (tq, hg*dh) bf16, pre-scaled
    k = k_ref[0, pl.ds(start, tk), :]         # (tk, hg*dh) bf16
    v = v_ref[0, pl.ds(start, tk), :]         # (tk, hg*dh) bf16

    for h in range(hg):                       # static unroll over heads in group
        sl = slice(h * dh, (h + 1) * dh)
        s = jax.lax.dot_general(q[:, sl], k[:, sl],
                                (((1,), (1,)), ((), ())),
                                preferred_element_type=jnp.float32)   # (tq, tk)
        m_prev = m_sc[h]                                              # (tq, 1)
        m_new = jnp.maximum(m_prev, jnp.max(s, axis=-1, keepdims=True))
        alpha = jnp.exp(m_prev - m_new)
        if use_bf16_exp:
            p = jnp.exp((s - m_new).astype(jnp.bfloat16))             # bf16 EUP
        else:
            p = jnp.exp(s - m_new).astype(jnp.bfloat16)
        l_sc[h] = alpha * l_sc[h] + jnp.sum(p.astype(jnp.float32),
                                            axis=-1, keepdims=True)
        pv = jnp.dot(p, v[:, sl], preferred_element_type=jnp.float32)
        acc_sc[:, sl] = alpha * acc_sc[:, sl] + pv
        m_sc[h] = m_new

    @pl.when(kv_idx == pl.num_programs(3) - 1)
    def _():
        # Scale the accumulator per head in place, then one lane-dense store.
        for h in range(hg):
            sl = slice(h * dh, (h + 1) * dh)
            acc_sc[:, sl] = acc_sc[:, sl] * pl.reciprocal(l_sc[h], approx=True)
        o_ref[0] = acc_sc[...].astype(o_ref.dtype)


def _post_attn_kernel(a_ref, x_ref, modv_ref, shift_ref, scale_ref, modo_ref,
                      wlv_ref, blv_ref, w1_ref, b1_ref, w2_ref, b2_ref, o_ref,
                      yn_sc, acc_sc):
    e = pl.program_id(2)

    @pl.when(e == 0)
    def _():
        a = a_ref[0]                                    # (tT, C) bf16 attn out
        x = x_ref[0]                                    # (tT, C) f32 residual
        # y = modulate_v(linear_v(a), t); residual with x; output_norm (adaLN).
        y = jnp.dot(a, wlv_ref[0], preferred_element_type=jnp.float32) + blv_ref[0]
        y = x + y * modv_ref[0, 0]
        yn = _ln(y) * (1.0 + scale_ref[0, 0]) + shift_ref[0, 0]
        yn_sc[...] = yn.astype(jnp.bfloat16)
        acc_sc[...] = jnp.zeros_like(acc_sc)

    # output_mlp, blocked over the hidden dim E: accumulate partial products.
    hidden = _gelu_tanh(jnp.dot(yn_sc[...], w1_ref[0],
                                preferred_element_type=jnp.float32) + b1_ref[0])
    acc_sc[...] += jnp.dot(hidden.astype(jnp.bfloat16), w2_ref[0],
                           preferred_element_type=jnp.float32)

    @pl.when(e == pl.num_programs(2) - 1)
    def _():
        # modulate_output (SiLU path, precomputed) + residual with original x.
        y = acc_sc[...] + b2_ref[0]
        o_ref[0] = (x_ref[0] + y * modo_ref[0, 0]).astype(o_ref.dtype)


# ----------------------------- pallas_call wrappers -----------------------------
def pre_attention(x, shift, scale, pre_p, *, T1, t_tile, sm_scale):
    B, T, C = x.shape
    nT1 = T1 // t_tile
    nT = T // t_tile

    def br(i):
        return jnp.where(i < nT1, 0, 1)

    # Grid: (seq-tile, batch) -> branch-dependent weight index flips only once.
    x_spec = pl.BlockSpec((1, t_tile, C), lambda i, b: (b, i, 0))
    out_spec = pl.BlockSpec((1, t_tile, C), lambda i, b: (b, i, 0))
    tvec_spec = pl.BlockSpec((1, 1, 1, C), lambda i, b: (br(i), b, 0, 0))
    wqkv_spec = _weight_spec((1, C, 3 * C), lambda i, b: (br(i), 0, 0))
    bqkv_spec = _weight_spec((1, 1, 3 * C), lambda i, b: (br(i), 0, 0))
    cvec_spec = _weight_spec((1, 1, C), lambda i, b: (br(i), 0, 0))

    kernel = functools.partial(_pre_attn_kernel, C=C, sm_scale=sm_scale)
    q, k, v = pl.pallas_call(
        kernel,
        grid=(nT, B),
        in_specs=[x_spec, tvec_spec, tvec_spec, wqkv_spec, bqkv_spec,
                  cvec_spec, cvec_spec, cvec_spec, cvec_spec],
        out_specs=[out_spec, out_spec, out_spec],
        out_shape=[jax.ShapeDtypeStruct((B, T, C), jnp.bfloat16)] * 3,
        compiler_params=pltpu.CompilerParams(
            dimension_semantics=("parallel", "parallel"),
            vmem_limit_bytes=_vmem_limit_bytes()),
    )(x, shift, scale, pre_p['wqkv'], pre_p['bqkv'],
      pre_p['gq'], pre_p['betaq'], pre_p['gk'], pre_p['betak'])
    return q, k, v


def flash_attention(q, k, v, *, num_heads):
    B, T, C = q.shape
    Dh = C // num_heads
    hg = _pick_head_group(num_heads, Dh)
    cb = hg * Dh
    tq = _pick_tile(T, _ATTN_Q_TILE)
    tk = _pick_tile(T, _ATTN_KV_TILE)

    q_spec = pl.BlockSpec((1, tq, cb), lambda b, g, i, j: (b, i, g))
    # K/V resident per (batch, head-group): full-T block, index ignores i and j.
    kv_spec = pl.BlockSpec((1, T, cb), lambda b, g, i, j: (b, 0, g))
    o_spec = pl.BlockSpec((1, tq, cb), lambda b, g, i, j: (b, i, g))

    kernel = functools.partial(_flash_attn_kernel, hg=hg, dh=Dh, tk=tk,
                               use_bf16_exp=_bf16_exp_ok())
    return pl.pallas_call(
        kernel,
        grid=(B, num_heads // hg, T // tq, T // tk),
        in_specs=[q_spec, kv_spec, kv_spec],
        out_specs=o_spec,
        out_shape=jax.ShapeDtypeStruct((B, T, C), jnp.bfloat16),
        scratch_shapes=[pltpu.VMEM((hg, tq, 1), jnp.float32),
                        pltpu.VMEM((hg, tq, 1), jnp.float32),
                        pltpu.VMEM((tq, cb), jnp.float32)],
        compiler_params=pltpu.CompilerParams(
            dimension_semantics=("parallel", "parallel", "parallel", "arbitrary"),
            vmem_limit_bytes=_vmem_limit_bytes()),
    )(q, k, v)


def post_attention(attn, x, mod_v, shift, scale, mod_o, post_p, *, T1, t_tile, rows):
    B, T, C = x.shape
    E = post_p['w1'].shape[-1]
    tE = _pick_tile(E, _MLP_E_TILE)
    nE = E // tE
    nT1 = T1 // t_tile
    n_rows = rows // t_tile

    def br(i):
        return jnp.where(i < nT1, 0, 1)

    # Grid: (seq-tile, batch, E-chunk); E-chunk innermost "arbitrary".
    seq_spec = pl.BlockSpec((1, t_tile, C), lambda i, b, e: (b, i, 0))
    tvec_spec = pl.BlockSpec((1, 1, 1, C), lambda i, b, e: (br(i), b, 0, 0))
    wlv_spec = _weight_spec((1, C, C), lambda i, b, e: (br(i), 0, 0))
    bvec_spec = _weight_spec((1, 1, C), lambda i, b, e: (br(i), 0, 0))
    w1_spec = pl.BlockSpec((1, C, tE), lambda i, b, e: (br(i), 0, e))
    b1_spec = pl.BlockSpec((1, 1, tE), lambda i, b, e: (br(i), 0, e))
    w2_spec = pl.BlockSpec((1, tE, C), lambda i, b, e: (br(i), e, 0))

    return pl.pallas_call(
        _post_attn_kernel,
        grid=(n_rows, B, nE),
        in_specs=[seq_spec, seq_spec, tvec_spec, tvec_spec, tvec_spec, tvec_spec,
                  wlv_spec, bvec_spec, w1_spec, b1_spec, w2_spec, bvec_spec],
        out_specs=seq_spec,
        out_shape=jax.ShapeDtypeStruct((B, T, C), jnp.float32),
        scratch_shapes=[pltpu.VMEM((t_tile, C), jnp.bfloat16),   # normalized y
                        pltpu.VMEM((t_tile, C), jnp.float32)],   # MLP accumulator
        input_output_aliases={1: 0},     # residual x buffer reused in-place
        compiler_params=pltpu.CompilerParams(
            dimension_semantics=("parallel", "parallel", "arbitrary"),
            vmem_limit_bytes=_vmem_limit_bytes()),
    )(attn, x, mod_v, shift, scale, mod_o,
      post_p['wlv'], post_p['blv'], post_p['w1'], post_p['b1'],
      post_p['w2'], post_p['b2'])


# ----------------------------- conditioning (plain JAX, hoisted) -----------------------------
def _conditioning(t, cond):
    """All (1,C)@(C,C) matmuls on t, done once per block outside the kernels."""
    tt = t[:, 0, :].astype(jnp.float32)              # (B, C)
    st = jax.nn.silu(tt)                             # SiLU path (ModulationLayer)

    def lin(inp, w, b):
        out = jnp.einsum('bc,kcd->kbd', inp, w.astype(jnp.float32)) + b[:, None, :]
        return out[:, :, None, :]                    # (2, B, 1, C)

    return dict(
        shift_msa=lin(tt, cond['ws'], cond['bs']),
        scale_msa=lin(tt, cond['wsc'], cond['bsc']),
        shift_out=lin(tt, cond['wos'], cond['bos']),
        scale_out=lin(tt, cond['wosc'], cond['bosc']),
        mod_v=lin(st, cond['wmv'], cond['bmv']),
        mod_o=lin(st, cond['wmo'], cond['bmo']),
    )


# ----------------------------- block / group forward -----------------------------
def mmdit_block_forward(x, t, params, *, T1, num_heads, is_last):
    B, T, C = x.shape
    Dh = C // num_heads
    T2 = T - T1
    t_tile = _pick_tile(math.gcd(T1, T2), _SEQ_TILE)
    assert T1 % t_tile == 0 and T2 % t_tile == 0

    cond = _conditioning(t, params['cond'])
    q, k, v = pre_attention(x, cond['shift_msa'], cond['scale_msa'], params['pre'],
                            T1=T1, t_tile=t_tile, sm_scale=1.0 / math.sqrt(Dh))
    attn = flash_attention(q, k, v, num_heads=num_heads)
    rows = T1 if is_last else T
    x_new = post_attention(attn, x, cond['mod_v'], cond['shift_out'],
                           cond['scale_out'], cond['mod_o'], params['post'],
                           T1=T1, t_tile=t_tile, rows=rows)
    return x_new, attn


def mmdit_group_forward(x1, x2, t, block_params_list, *, num_heads, is_last=False):
    T1 = x1.shape[1]
    x = jnp.concatenate([x1, x2], axis=1).astype(jnp.float32)
    t = t.astype(jnp.float32)
    n = len(block_params_list)
    attn = None
    for i, p in enumerate(block_params_list):
        last = is_last and (i == n - 1)
        x, attn = mmdit_block_forward(x, t, p, T1=T1, num_heads=num_heads,
                                      is_last=last)
    y1 = x[:, :T1]
    y2 = attn[:, T1:].astype(jnp.float32) if is_last else x[:, T1:]
    return y1, y2


# ----------------------------- deterministic params -----------------------------
def init_block_params(key, C, expansion):
    # NOTE: the torch module zero-inits adaLN / modulation linears (making the
    # block nearly a no-op); we use deterministic small random weights so the
    # kernels are actually exercised.  Branch axis 0 = stream 1, 1 = stream 2.
    E = expansion * C
    keys = iter(jax.random.split(key, 24))

    def nrm(shape, std=0.02):
        return (std * jax.random.normal(next(keys), shape)).astype(jnp.float32)

    cond = dict(
        ws=nrm((2, C, C)), bs=nrm((2, C)),
        wsc=nrm((2, C, C)), bsc=nrm((2, C)),
        wos=nrm((2, C, C)), bos=nrm((2, C)),
        wosc=nrm((2, C, C)), bosc=nrm((2, C)),
        wmv=nrm((2, C, C)), bmv=nrm((2, C)),
        wmo=nrm((2, C, C)), bmo=nrm((2, C)),
    )
    pre = dict(
        wqkv=nrm((2, C, 3 * C)).astype(jnp.bfloat16),
        bqkv=jnp.zeros((2, 1, 3 * C), jnp.float32),
        gq=jnp.ones((2, 1, C), jnp.float32), betaq=jnp.zeros((2, 1, C), jnp.float32),
        gk=jnp.ones((2, 1, C), jnp.float32), betak=jnp.zeros((2, 1, C), jnp.float32),
    )
    post = dict(
        wlv=nrm((2, C, C)).astype(jnp.bfloat16), blv=nrm((2, 1, C)),
        w1=nrm((2, C, E)).astype(jnp.bfloat16), b1=jnp.zeros((2, 1, E), jnp.float32),
        w2=nrm((2, E, C)).astype(jnp.bfloat16), b2=jnp.zeros((2, 1, C), jnp.float32),
    )
    return dict(cond=cond, pre=pre, post=post)


# ----------------------------- pure-JAX reference -----------------------------
def _ref_attn(q, k, v, H):
    B, T, C = q.shape
    Dh = C // H

    def heads(a):
        return a.reshape(B, T, H, Dh).transpose(0, 2, 1, 3)

    qh, kh, vh = heads(q), heads(k), heads(v)
    s = jnp.einsum('bhtd,bhsd->bhts', qh, kh) / math.sqrt(Dh)
    p = jax.nn.softmax(s, axis=-1)
    o = jnp.einsum('bhts,bhsd->bhtd', p, vh)
    return o.transpose(0, 2, 1, 3).reshape(B, T, C)


def _ref_block(x1, x2, t, p, H, last):
    C = x1.shape[-1]
    cond, pre, post = p['cond'], p['pre'], p['post']
    f32 = lambda a: a.astype(jnp.float32)

    def pre_branch(x, br):
        shift = t @ f32(cond['ws'][br]) + cond['bs'][br]
        scale = t @ f32(cond['wsc'][br]) + cond['bsc'][br]
        xa = _ln(x) * (1.0 + scale) + shift
        qkv = xa @ f32(pre['wqkv'][br]) + pre['bqkv'][br]
        q, k, v = qkv[..., :C], qkv[..., C:2 * C], qkv[..., 2 * C:]
        q = _ln(q) * pre['gq'][br] + pre['betaq'][br]
        k = _ln(k) * pre['gk'][br] + pre['betak'][br]
        return q, k, v

    def post_branch(a, x, br):
        st = jax.nn.silu(t)
        mod_v = st @ f32(cond['wmv'][br]) + cond['bmv'][br]
        y = a @ f32(post['wlv'][br]) + post['blv'][br]
        y = x + y * mod_v
        shift = t @ f32(cond['wos'][br]) + cond['bos'][br]
        scale = t @ f32(cond['wosc'][br]) + cond['bosc'][br]
        y = _ln(y) * (1.0 + scale) + shift
        h = _gelu_tanh(y @ f32(post['w1'][br]) + post['b1'][br])
        y = h @ f32(post['w2'][br]) + post['b2'][br]
        mod_o = st @ f32(cond['wmo'][br]) + cond['bmo'][br]
        return x + y * mod_o

    q1, k1, v1 = pre_branch(x1, 0)
    q2, k2, v2 = pre_branch(x2, 1)
    q = jnp.concatenate([q1, q2], axis=1)
    k = jnp.concatenate([k1, k2], axis=1)
    v = jnp.concatenate([v1, v2], axis=1)
    attn = _ref_attn(q, k, v, H)
    T1 = x1.shape[1]
    a1, a2 = attn[:, :T1], attn[:, T1:]
    y1 = post_branch(a1, x1, 0)
    y2 = a2 if last else post_branch(a2, x2, 1)
    return y1, y2


def ref_group(x1, x2, t, block_params_list, H, is_last=False):
    n = len(block_params_list)
    for i, p in enumerate(block_params_list):
        last = is_last and i == n - 1
        x1, x2 = _ref_block(x1, x2, t, p, H, last)
    return x1, x2


# ----------------------------- main -----------------------------
if __name__ == "__main__":
    B, C, H = 2, 32, 4
    T1, T2 = 8, 8
    num_blocks, expansion = 2, 4

    key = jax.random.PRNGKey(0)
    kx1, kx2, kt, kp = jax.random.split(key, 4)
    x1 = jax.random.normal(kx1, (B, T1, C), jnp.float32)
    x2 = jax.random.normal(kx2, (B, T2, C), jnp.float32)
    t = jax.random.normal(kt, (B, 1, C), jnp.float32)

    block_params = [init_block_params(pk, C, expansion)
                    for pk in jax.random.split(kp, num_blocks)]

    fwd = jax.jit(functools.partial(mmdit_group_forward,
                                    num_heads=H, is_last=False))
    y1, y2 = fwd(x1, x2, t, block_params)
    y1, y2 = jax.block_until_ready((y1, y2))

    r1, r2 = ref_group(x1, x2, t, block_params, H, is_last=False)

    assert y1.shape == (B, T1, C) and y2.shape == (B, T2, C)
    err1 = float(jnp.max(jnp.abs(y1 - r1)))
    err2 = float(jnp.max(jnp.abs(y2 - r2)))
    assert err1 < 2e-2, f"x1 branch mismatch (max abs err {err1})"
    assert err2 < 2e-2, f"x2 branch mismatch (max abs err {err2})"

    print("KERNEL_OK")
</pallas_src>

<mosaic_0001>
module attributes {stable_mosaic.version = 11 : i64} {
  func.func @_pre_attn_kernel(%arg0: i32, %arg1: i32, %arg2: memref<1x8x32xf32, #tpu.memory_space<vmem>>, %arg3: memref<1x1x1x32xf32, #tpu.memory_space<vmem>>, %arg4: memref<1x1x1x32xf32, #tpu.memory_space<vmem>>, %arg5: memref<1x32x96xbf16, #tpu.memory_space<vmem>>, %arg6: memref<1x1x96xf32, #tpu.memory_space<vmem>>, %arg7: memref<1x1x32xf32, #tpu.memory_space<vmem>>, %arg8: memref<1x1x32xf32, #tpu.memory_space<vmem>>, %arg9: memref<1x1x32xf32, #tpu.memory_space<vmem>>, %arg10: memref<1x1x32xf32, #tpu.memory_space<vmem>>, %arg11: memref<1x8x32xbf16, #tpu.memory_space<vmem>>, %arg12: memref<1x8x32xbf16, #tpu.memory_space<vmem>>, %arg13: memref<1x8x32xbf16, #tpu.memory_space<vmem>>) attributes {dimension_semantics = [#tpu.dimension_semantics<parallel>, #tpu.dimension_semantics<parallel>], iteration_bounds = array<i64: 2, 2>, scalar_prefetch = 0 : i64, scratch_operands = 0 : i64, tpu.core_type = #tpu.core_type<tc>, window_params = [{transform_indices = @transform_0, window_bounds = array<i64: 1, 8, 32>}, {transform_indices = @transform_1, window_bounds = array<i64: 1, 1, 1, 32>}, {transform_indices = @transform_2, window_bounds = array<i64: 1, 1, 1, 32>}, {pipeline_mode = #tpu.pipeline_mode<synchronous>, transform_indices = @transform_3, window_bounds = array<i64: 1, 32, 96>}, {pipeline_mode = #tpu.pipeline_mode<synchronous>, transform_indices = @transform_4, window_bounds = array<i64: 1, 1, 96>}, {pipeline_mode = #tpu.pipeline_mode<synchronous>, transform_indices = @transform_5, window_bounds = array<i64: 1, 1, 32>}, {pipeline_mode = #tpu.pipeline_mode<synchronous>, transform_indices = @transform_6, window_bounds = array<i64: 1, 1, 32>}, {pipeline_mode = #tpu.pipeline_mode<synchronous>, transform_indices = @transform_7, window_bounds = array<i64: 1, 1, 32>}, {pipeline_mode = #tpu.pipeline_mode<synchronous>, transform_indices = @transform_8, window_bounds = array<i64: 1, 1, 32>}, {transform_indices = @transform_9, window_bounds = array<i64: 1, 8, 32>}, {transform_indices = @transform_10, window_bounds = array<i64: 1, 8, 32>}, {transform_indices = @transform_11, window_bounds = array<i64: 1, 8, 32>}]} {
    %c0 = arith.constant 0 : index
    %c0_0 = arith.constant 0 : index
    %c0_1 = arith.constant 0 : index
    %0 = vector.load %arg2[%c0, %c0_0, %c0_1] : memref<1x8x32xf32, #tpu.memory_space<vmem>>, vector<1x8x32xf32>
    %1 = vector.shape_cast %0 : vector<1x8x32xf32> to vector<8x32xf32>
    %c0_2 = arith.constant 0 : index
    %c0_3 = arith.constant 0 : index
    %c0_4 = arith.constant 0 : index
    %c0_5 = arith.constant 0 : index
    %2 = vector.load %arg3[%c0_2, %c0_3, %c0_4, %c0_5] : memref<1x1x1x32xf32, #tpu.memory_space<vmem>>, vector<1x1x1x32xf32>
    %3 = vector.shape_cast %2 : vector<1x1x1x32xf32> to vector<1x32xf32>
    %c0_6 = arith.constant 0 : index
    %c0_7 = arith.constant 0 : index
    %c0_8 = arith.constant 0 : index
    %c0_9 = arith.constant 0 : index
    %4 = vector.load %arg4[%c0_6, %c0_7, %c0_8, %c0_9] : memref<1x1x1x32xf32, #tpu.memory_space<vmem>>, vector<1x1x1x32xf32>
    %5 = vector.shape_cast %4 : vector<1x1x1x32xf32> to vector<1x32xf32>
    %cst = arith.constant dense<0.000000e+00> : vector<8xf32>
    %6 = vector.multi_reduction <add>, %1, %cst [1] : vector<8x32xf32> to vector<8xf32>
    %7 = vector.shape_cast %6 : vector<8xf32> to vector<8x1xf32>
    %cst_10 = arith.constant 3.200000e+01 : f32
    %8 = vector.broadcast %cst_10 : f32 to vector<8x1xf32>
    %9 = arith.divf %7, %8 : vector<8x1xf32>
    %10 = arith.mulf %1, %1 : vector<8x32xf32>
    %cst_11 = arith.constant dense<0.000000e+00> : vector<8xf32>
    %11 = vector.multi_reduction <add>, %10, %cst_11 [1] : vector<8x32xf32> to vector<8xf32>
    %12 = vector.shape_cast %11 : vector<8xf32> to vector<8x1xf32>
    %cst_12 = arith.constant 3.200000e+01 : f32
    %13 = vector.broadcast %cst_12 : f32 to vector<8x1xf32>
    %14 = arith.divf %12, %13 : vector<8x1xf32>
    %15 = arith.mulf %9, %9 : vector<8x1xf32>
    %16 = arith.subf %14, %15 : vector<8x1xf32>
    %cst_13 = arith.constant 0.000000e+00 : f32
    %17 = vector.broadcast %cst_13 : f32 to vector<8x1xf32>
    %18 = arith.maximumf %16, %17 : vector<8x1xf32>
    %19 = vector.broadcast %9 : vector<8x1xf32> to vector<8x32xf32>
    %20 = arith.subf %1, %19 : vector<8x32xf32>
    %cst_14 = arith.constant 9.99999997E-7 : f32
    %21 = vector.broadcast %cst_14 : f32 to vector<8x1xf32>
    %22 = arith.addf %18, %21 : vector<8x1xf32>
    %23 = math.rsqrt %22 : vector<8x1xf32>
    %24 = vector.broadcast %23 : vector<8x1xf32> to vector<8x32xf32>
    %25 = arith.mulf %20, %24 : vector<8x32xf32>
    %cst_15 = arith.constant 1.000000e+00 : f32
    %26 = vector.broadcast %cst_15 : f32 to vector<1x32xf32>
    %27 = arith.addf %26, %5 : vector<1x32xf32>
    %28 = vector.broadcast %27 : vector<1x32xf32> to vector<8x32xf32>
    %29 = arith.mulf %25, %28 : vector<8x32xf32>
    %30 = vector.broadcast %3 : vector<1x32xf32> to vector<8x32xf32>
    %31 = arith.addf %29, %30 : vector<8x32xf32>
    %32 = arith.truncf %31 : vector<8x32xf32> to vector<8x32xbf16>
    %c0_16 = arith.constant 0 : index
    %c0_17 = arith.constant 0 : index
    %c0_18 = arith.constant 0 : index
    %33 = vector.load %arg5[%c0_16, %c0_17, %c0_18] : memref<1x32x96xbf16, #tpu.memory_space<vmem>>, vector<1x32x96xbf16>
    %34 = vector.shape_cast %33 : vector<1x32x96xbf16> to vector<32x96xbf16>
    %cst_19 = arith.constant dense<0.000000e+00> : vector<8x96xf32>
    %35 = tpu.matmul %32, %34, %cst_19 {dimension_numbers = #tpu.dot_dimension_numbers<[1], [0], [0], [1], [0, 0, 1, 1], [], []>} : vector<8x32xbf16>, vector<32x96xbf16>, vector<8x96xf32> -> vector<8x96xf32>
    %c0_20 = arith.constant 0 : index
    %c0_21 = arith.constant 0 : index
    %c0_22 = arith.constant 0 : index
    %36 = vector.load %arg6[%c0_20, %c0_21, %c0_22] : memref<1x1x96xf32, #tpu.memory_space<vmem>>, vector<1x1x96xf32>
    %37 = vector.shape_cast %36 : vector<1x1x96xf32> to vector<1x96xf32>
    %38 = vector.broadcast %37 : vector<1x96xf32> to vector<8x96xf32>
    %39 = arith.addf %35, %38 : vector<8x96xf32>
    %40 = vector.extract_strided_slice %39 {offsets = [0, 0], sizes = [8, 32], strides = [1, 1]} : vector<8x96xf32> to vector<8x32xf32>
    %41 = vector.extract_strided_slice %39 {offsets = [0, 32], sizes = [8, 32], strides = [1, 1]} : vector<8x96xf32> to vector<8x32xf32>
    %42 = vector.extract_strided_slice %39 {offsets = [0, 64], sizes = [8, 32], strides = [1, 1]} : vector<8x96xf32> to vector<8x32xf32>
    %cst_23 = arith.constant dense<0.000000e+00> : vector<8xf32>
    %43 = vector.multi_reduction <add>, %40, %cst_23 [1] : vector<8x32xf32> to vector<8xf32>
    %44 = vector.shape_cast %43 : vector<8xf32> to vector<8x1xf32>
    %cst_24 = arith.constant 3.200000e+01 : f32
    %45 = vector.broadcast %cst_24 : f32 to vector<8x1xf32>
    %46 = arith.divf %44, %45 : vector<8x1xf32>
    %47 = arith.mulf %40, %40 : vector<8x32xf32>
    %cst_25 = arith.constant dense<0.000000e+00> : vector<8xf32>
    %48 = vector.multi_reduction <add>, %47, %cst_25 [1] : vector<8x32xf32> to vector<8xf32>
    %49 = vector.shape_cast %48 : vector<8xf32> to vector<8x1xf32>
    %cst_26 = arith.constant 3.200000e+01 : f32
    %50 = vector.broadcast %cst_26 : f32 to vector<8x1xf32>
    %51 = arith.divf %49, %50 : vector<8x1xf32>
    %52 = arith.mulf %46, %46 : vector<8x1xf32>
    %53 = arith.subf %51, %52 : vector<8x1xf32>
    %cst_27 = arith.constant 0.000000e+00 : f32
    %54 = vector.broadcast %cst_27 : f32 to vector<8x1xf32>
    %55 = arith.maximumf %53, %54 : vector<8x1xf32>
    %56 = vector.broadcast %46 : vector<8x1xf32> to vector<8x32xf32>
    %57 = arith.subf %40, %56 : vector<8x32xf32>
    %cst_28 = arith.constant 9.99999997E-7 : f32
    %58 = vector.broadcast %cst_28 : f32 to vector<8x1xf32>
    %59 = arith.addf %55, %58 : vector<8x1xf32>
    %60 = math.rsqrt %59 : vector<8x1xf32>
    %61 = vector.broadcast %60 : vector<8x1xf32> to vector<8x32xf32>
    %62 = arith.mulf %57, %61 : vector<8x32xf32>
    %c0_29 = arith.constant 0 : index
    %c0_30 = arith.constant 0 : index
    %c0_31 = arith.constant 0 : index
    %63 = vector.load %arg7[%c0_29, %c0_30, %c0_31] : memref<1x1x32xf32, #tpu.memory_space<vmem>>, vector<1x1x32xf32>
    %64 = vector.shape_cast %63 : vector<1x1x32xf32> to vector<1x32xf32>
    %65 = vector.broadcast %64 : vector<1x32xf32> to vector<8x32xf32>
    %66 = arith.mulf %62, %65 : vector<8x32xf32>
    %c0_32 = arith.constant 0 : index
    %c0_33 = arith.constant 0 : index
    %c0_34 = arith.constant 0 : index
    %67 = vector.load %arg8[%c0_32, %c0_33, %c0_34] : memref<1x1x32xf32, #tpu.memory_space<vmem>>, vector<1x1x32xf32>
    %68 = vector.shape_cast %67 : vector<1x1x32xf32> to vector<1x32xf32>
    %69 = vector.broadcast %68 : vector<1x32xf32> to vector<8x32xf32>
    %70 = arith.addf %66, %69 : vector<8x32xf32>
    %cst_35 = arith.constant 0.353553385 : f32
    %71 = vector.broadcast %cst_35 : f32 to vector<8x32xf32>
    %72 = arith.mulf %70, %71 : vector<8x32xf32>
    %cst_36 = arith.constant dense<0.000000e+00> : vector<8xf32>
    %73 = vector.multi_reduction <add>, %41, %cst_36 [1] : vector<8x32xf32> to vector<8xf32>
    %74 = vector.shape_cast %73 : vector<8xf32> to vector<8x1xf32>
    %cst_37 = arith.constant 3.200000e+01 : f32
    %75 = vector.broadcast %cst_37 : f32 to vector<8x1xf32>
    %76 = arith.divf %74, %75 : vector<8x1xf32>
    %77 = arith.mulf %41, %41 : vector<8x32xf32>
    %cst_38 = arith.constant dense<0.000000e+00> : vector<8xf32>
    %78 = vector.multi_reduction <add>, %77, %cst_38 [1] : vector<8x32xf32> to vector<8xf32>
    %79 = vector.shape_cast %78 : vector<8xf32> to vector<8x1xf32>
    %cst_39 = arith.constant 3.200000e+01 : f32
    %80 = vector.broadcast %cst_39 : f32 to vector<8x1xf32>
    %81 = arith.divf %79, %80 : vector<8x1xf32>
    %82 = arith.mulf %76, %76 : vector<8x1xf32>
    %83 = arith.subf %81, %82 : vector<8x1xf32>
    %cst_40 = arith.constant 0.000000e+00 : f32
    %84 = vector.broadcast %cst_40 : f32 to vector<8x1xf32>
    %85 = arith.maximumf %83, %84 : vector<8x1xf32>
    %86 = vector.broadcast %76 : vector<8x1xf32> to vector<8x32xf32>
    %87 = arith.subf %41, %86 : vector<8x32xf32>
    %cst_41 = arith.constant 9.99999997E-7 : f32
    %88 = vector.broadcast %cst_41 : f32 to vector<8x1xf32>
    %89 = arith.addf %85, %88 : vector<8x1xf32>
    %90 = math.rsqrt %89 : vector<8x1xf32>
    %91 = vector.broadcast %90 : vector<8x1xf32> to vector<8x32xf32>
    %92 = arith.mulf %87, %91 : vector<8x32xf32>
    %c0_42 = arith.constant 0 : index
    %c0_43 = arith.constant 0 : index
    %c0_44 = arith.constant 0 : index
    %93 = vector.load %arg9[%c0_42, %c0_43, %c0_44] : memref<1x1x32xf32, #tpu.memory_space<vmem>>, vector<1x1x32xf32>
    %94 = vector.shape_cast %93 : vector<1x1x32xf32> to vector<1x32xf32>
    %95 = vector.broadcast %94 : vector<1x32xf32> to vector<8x32xf32>
    %96 = arith.mulf %92, %95 : vector<8x32xf32>
    %c0_45 = arith.constant 0 : index
    %c0_46 = arith.constant 0 : index
    %c0_47 = arith.constant 0 : index
    %97 = vector.load %arg10[%c0_45, %c0_46, %c0_47] : memref<1x1x32xf32, #tpu.memory_space<vmem>>, vector<1x1x32xf32>
    %98 = vector.shape_cast %97 : vector<1x1x32xf32> to vector<1x32xf32>
    %99 = vector.broadcast %98 : vector<1x32xf32> to vector<8x32xf32>
    %100 = arith.addf %96, %99 : vector<8x32xf32>
    %101 = arith.truncf %72 : vector<8x32xf32> to vector<8x32xbf16>
    %c0_48 = arith.constant 0 : index
    %c0_49 = arith.constant 0 : index
    %c0_50 = arith.constant 0 : index
    %102 = vector.load %arg11[%c0_48, %c0_49, %c0_50] : memref<1x8x32xbf16, #tpu.memory_space<vmem>>, vector<1x8x32xbf16>
    %103 = vector.shape_cast %102 : vector<1x8x32xbf16> to vector<8x32xbf16>
    %104 = vector.shape_cast %101 : vector<8x32xbf16> to vector<1x8x32xbf16>
    tpu.vector_store %arg11[%c0_48, %c0_49, %c0_50], %104 {strides = array<i32>} : memref<1x8x32xbf16, #tpu.memory_space<vmem>>, vector<1x8x32xbf16>,
    %105 = arith.truncf %100 : vector<8x32xf32> to vector<8x32xbf16>
    %c0_51 = arith.constant 0 : index
    %c0_52 = arith.constant 0 : index
    %c0_53 = arith.constant 0 : index
    %106 = vector.load %arg12[%c0_51, %c0_52, %c0_53] : memref<1x8x32xbf16, #tpu.memory_space<vmem>>, vector<1x8x32xbf16>
    %107 = vector.shape_cast %106 : vector<1x8x32xbf16> to vector<8x32xbf16>
    %108 = vector.shape_cast %105 : vector<8x32xbf16> to vector<1x8x32xbf16>
    tpu.vector_store %arg12[%c0_51, %c0_52, %c0_53], %108 {strides = array<i32>} : memref<1x8x32xbf16, #tpu.memory_space<vmem>>, vector<1x8x32xbf16>,
    %109 = arith.truncf %42 : vector<8x32xf32> to vector<8x32xbf16>
    %c0_54 = arith.constant 0 : index
    %c0_55 = arith.constant 0 : index
    %c0_56 = arith.constant 0 : index
    %110 = vector.load %arg13[%c0_54, %c0_55, %c0_56] : memref<1x8x32xbf16, #tpu.memory_space<vmem>>, vector<1x8x32xbf16>
    %111 = vector.shape_cast %110 : vector<1x8x32xbf16> to vector<8x32xbf16>
    %112 = vector.shape_cast %109 : vector<8x32xbf16> to vector<1x8x32xbf16>
    tpu.vector_store %arg13[%c0_54, %c0_55, %c0_56], %112 {strides = array<i32>} : memref<1x8x32xbf16, #tpu.memory_space<vmem>>, vector<1x8x32xbf16>,
    return
  }
  func.func @transform_0(%arg0: i32, %arg1: i32) -> (i32, i32, i32) {
    %c0_i32 = arith.constant 0 : i32
    %c0_i32_0 = arith.constant 0 : i32
    return %arg1, %arg0, %c0_i32 : i32, i32, i32
  }
  func.func @transform_1(%arg0: i32, %arg1: i32) -> (i32, i32, i32, i32) {
    %c1_i32 = arith.constant 1 : i32
    %0 = arith.cmpi slt, %arg0, %c1_i32 : i32
    %c0_i32 = arith.constant 0 : i32
    %c1_i32_0 = arith.constant 1 : i32
    %1 = arith.select %0, %c0_i32, %c1_i32_0 : i32
    %c0_i32_1 = arith.constant 0 : i32
    %c0_i32_2 = arith.constant 0 : i32
    %c0_i32_3 = arith.constant 0 : i32
    return %1, %arg1, %c0_i32_1, %c0_i32_2 : i32, i32, i32, i32
  }
  func.func @transform_2(%arg0: i32, %arg1: i32) -> (i32, i32, i32, i32) {
    %c1_i32 = arith.constant 1 : i32
    %0 = arith.cmpi slt, %arg0, %c1_i32 : i32
    %c0_i32 = arith.constant 0 : i32
    %c1_i32_0 = arith.constant 1 : i32
    %1 = arith.select %0, %c0_i32, %c1_i32_0 : i32
    %c0_i32_1 = arith.constant 0 : i32
    %c0_i32_2 = arith.constant 0 : i32
    %c0_i32_3 = arith.constant 0 : i32
    return %1, %arg1, %c0_i32_1, %c0_i32_2 : i32, i32, i32, i32
  }
  func.func @transform_3(%arg0: i32, %arg1: i32) -> (i32, i32, i32) {
    %c1_i32 = arith.constant 1 : i32
    %0 = arith.cmpi slt, %arg0, %c1_i32 : i32
    %c0_i32 = arith.constant 0 : i32
    %c1_i32_0 = arith.constant 1 : i32
    %1 = arith.select %0, %c0_i32, %c1_i32_0 : i32
    %c0_i32_1 = arith.constant 0 : i32
    %c0_i32_2 = arith.constant 0 : i32
    %c0_i32_3 = arith.constant 0 : i32
    return %1, %c0_i32_1, %c0_i32_2 : i32, i32, i32
  }
  func.func @transform_4(%arg0: i32, %arg1: i32) -> (i32, i32, i32) {
    %c1_i32 = arith.constant 1 : i32
    %0 = arith.cmpi slt, %arg0, %c1_i32 : i32
    %c0_i32 = arith.constant 0 : i32
    %c1_i32_0 = arith.constant 1 : i32
    %1 = arith.select %0, %c0_i32, %c1_i32_0 : i32
    %c0_i32_1 = arith.constant 0 : i32
    %c0_i32_2 = arith.constant 0 : i32
    %c0_i32_3 = arith.constant 0 : i32
    return %1, %c0_i32_1, %c0_i32_2 : i32, i32, i32
  }
  func.func @transform_5(%arg0: i32, %arg1: i32) -> (i32, i32, i32) {
    %c1_i32 = arith.constant 1 : i32
    %0 = arith.cmpi slt, %arg0, %c1_i32 : i32
    %c0_i32 = arith.constant 0 : i32
    %c1_i32_0 = arith.constant 1 : i32
    %1 = arith.select %0, %c0_i32, %c1_i32_0 : i32
    %c0_i32_1 = arith.constant 0 : i32
    %c0_i32_2 = arith.constant 0 : i32
    %c0_i32_3 = arith.constant 0 : i32
    return %1, %c0_i32_1, %c0_i32_2 : i32, i32, i32
  }
  func.func @transform_6(%arg0: i32, %arg1: i32) -> (i32, i32, i32) {
    %c1_i32 = arith.constant 1 : i32
    %0 = arith.cmpi slt, %arg0, %c1_i32 : i32
    %c0_i32 = arith.constant 0 : i32
    %c1_i32_0 = arith.constant 1 : i32
    %1 = arith.select %0, %c0_i32, %c1_i32_0 : i32
    %c0_i32_1 = arith.constant 0 : i32
    %c0_i32_2 = arith.constant 0 : i32
    %c0_i32_3 = arith.constant 0 : i32
    return %1, %c0_i32_1, %c0_i32_2 : i32, i32, i32
  }
  func.func @transform_7(%arg0: i32, %arg1: i32) -> (i32, i32, i32) {
    %c1_i32 = arith.constant 1 : i32
    %0 = arith.cmpi slt, %arg0, %c1_i32 : i32
    %c0_i32 = arith.constant 0 : i32
    %c1_i32_0 = arith.constant 1 : i32
    %1 = arith.select %0, %c0_i32, %c1_i32_0 : i32
    %c0_i32_1 = arith.constant 0 : i32
    %c0_i32_2 = arith.constant 0 : i32
    %c0_i32_3 = arith.constant 0 : i32
    return %1, %c0_i32_1, %c0_i32_2 : i32, i32, i32
  }
  func.func @transform_8(%arg0: i32, %arg1: i32) -> (i32, i32, i32) {
    %c1_i32 = arith.constant 1 : i32
    %0 = arith.cmpi slt, %arg0, %c1_i32 : i32
    %c0_i32 = arith.constant 0 : i32
    %c1_i32_0 = arith.constant 1 : i32
    %1 = arith.select %0, %c0_i32, %c1_i32_0 : i32
    %c0_i32_1 = arith.constant 0 : i32
    %c0_i32_2 = arith.constant 0 : i32
    %c0_i32_3 = arith.constant 0 : i32
    return %1, %c0_i32_1, %c0_i32_2 : i32, i32, i32
  }
  func.func @transform_9(%arg0: i32, %arg1: i32) -> (i32, i32, i32) {
    %c0_i32 = arith.constant 0 : i32
    %c0_i32_0 = arith.constant 0 : i32
    return %arg1, %arg0, %c0_i32 : i32, i32, i32
  }
  func.func @transform_10(%arg0: i32, %arg1: i32) -> (i32, i32, i32) {
    %c0_i32 = arith.constant 0 : i32
    %c0_i32_0 = arith.constant 0 : i32
    return %arg1, %arg0, %c0_i32 : i32, i32, i32
  }
  func.func @transform_11(%arg0: i32, %arg1: i32) -> (i32, i32, i32) {
    %c0_i32 = arith.constant 0 : i32
    %c0_i32_0 = arith.constant 0 : i32
    return %arg1, %arg0, %c0_i32 : i32, i32, i32
  }
}

module attributes {stable_mosaic.version = 11 : i64} {
  func.func @_flash_attn_kernel(%arg0: i32, %arg1: i32, %arg2: i32, %arg3: i32, %arg4: memref<1x16x32xbf16, #tpu.memory_space<vmem>>, %arg5: memref<1x16x32xbf16, #tpu.memory_space<vmem>>, %arg6: memref<1x16x32xbf16, #tpu.memory_space<vmem>>, %arg7: memref<1x16x32xbf16, #tpu.memory_space<vmem>>, %arg8: memref<4x16x1xf32, #tpu.memory_space<vmem>>, %arg9: memref<4x16x1xf32, #tpu.memory_space<vmem>>, %arg10: memref<16x32xf32, #tpu.memory_space<vmem>>) attributes {dimension_semantics = [#tpu.dimension_semantics<parallel>, #tpu.dimension_semantics<parallel>, #tpu.dimension_semantics<parallel>, #tpu.dimension_semantics<arbitrary>], iteration_bounds = array<i64: 2, 1, 1, 1>, scalar_prefetch = 0 : i64, scratch_operands = 3 : i64, tpu.core_type = #tpu.core_type<tc>, window_params = [{transform_indices = @transform_0, window_bounds = array<i64: 1, 16, 32>}, {transform_indices = @transform_1, window_bounds = array<i64: 1, 16, 32>}, {transform_indices = @transform_2, window_bounds = array<i64: 1, 16, 32>}, {transform_indices = @transform_3, window_bounds = array<i64: 1, 16, 32>}]} {
    %c0_i32 = arith.constant 0 : i32
    %0 = arith.cmpi eq, %arg3, %c0_i32 : i32
    %1 = arith.extui %0 : i1 to i32
    %c0_i32_0 = arith.constant 0 : i32
    %2 = arith.cmpi ne, %1, %c0_i32_0 : i32
    scf.if %2 {
      %cst_82 = arith.constant -1.000000e+30 : f32
      %152 = vector.broadcast %cst_82 : f32 to vector<4x16x1xf32>
      %c0_83 = arith.constant 0 : index
      %c0_84 = arith.constant 0 : index
      %c0_85 = arith.constant 0 : index
      %153 = vector.load %arg8[%c0_83, %c0_84, %c0_85] : memref<4x16x1xf32, #tpu.memory_space<vmem>>, vector<4x16x1xf32>
      tpu.vector_store %arg8[%c0_83, %c0_84, %c0_85], %152 {strides = array<i32>} : memref<4x16x1xf32, #tpu.memory_space<vmem>>, vector<4x16x1xf32>,
      %cst_86 = arith.constant 0.000000e+00 : f32
      %154 = vector.broadcast %cst_86 : f32 to vector<4x16x1xf32>
      %c0_87 = arith.constant 0 : index
      %c0_88 = arith.constant 0 : index
      %c0_89 = arith.constant 0 : index
      %155 = vector.load %arg9[%c0_87, %c0_88, %c0_89] : memref<4x16x1xf32, #tpu.memory_space<vmem>>, vector<4x16x1xf32>
      tpu.vector_store %arg9[%c0_87, %c0_88, %c0_89], %154 {strides = array<i32>} : memref<4x16x1xf32, #tpu.memory_space<vmem>>, vector<4x16x1xf32>,
      %cst_90 = arith.constant 0.000000e+00 : f32
      %156 = vector.broadcast %cst_90 : f32 to vector<16x32xf32>
      %c0_91 = arith.constant 0 : index
      %c0_92 = arith.constant 0 : index
      %157 = vector.load %arg10[%c0_91, %c0_92] : memref<16x32xf32, #tpu.memory_space<vmem>>, vector<16x32xf32>
      tpu.vector_store %arg10[%c0_91, %c0_92], %156 {strides = array<i32>} : memref<16x32xf32, #tpu.memory_space<vmem>>, vector<16x32xf32>,
    } else {
    }
    %c16_i32 = arith.constant 16 : i32
    %3 = arith.muli %arg3, %c16_i32 : i32
    %4 = tpu.assume_multiple %3, 16 : i32
    %c0 = arith.constant 0 : index
    %c0_1 = arith.constant 0 : index
    %c0_2 = arith.constant 0 : index
    %5 = vector.load %arg4[%c0, %c0_1, %c0_2] : memref<1x16x32xbf16, #tpu.memory_space<vmem>>, vector<1x16x32xbf16>
    %6 = vector.shape_cast %5 : vector<1x16x32xbf16> to vector<16x32xbf16>
    %c0_3 = arith.constant 0 : index
    %7 = arith.index_cast %4 : i32 to index
    %c0_4 = arith.constant 0 : index
    %8 = vector.load %arg5[%c0_3, %7, %c0_4] : memref<1x16x32xbf16, #tpu.memory_space<vmem>>, vector<1x16x32xbf16>
    %9 = vector.shape_cast %8 : vector<1x16x32xbf16> to vector<16x32xbf16>
    %c0_5 = arith.constant 0 : index
    %10 = arith.index_cast %4 : i32 to index
    %c0_6 = arith.constant 0 : index
    %11 = vector.load %arg6[%c0_5, %10, %c0_6] : memref<1x16x32xbf16, #tpu.memory_space<vmem>>, vector<1x16x32xbf16>
    %12 = vector.shape_cast %11 : vector<1x16x32xbf16> to vector<16x32xbf16>
    %13 = vector.extract_strided_slice %6 {offsets = [0, 0], sizes = [16, 8], strides = [1, 1]} : vector<16x32xbf16> to vector<16x8xbf16>
    %14 = vector.extract_strided_slice %9 {offsets = [0, 0], sizes = [16, 8], strides = [1, 1]} : vector<16x32xbf16> to vector<16x8xbf16>
    %cst = arith.constant dense<0.000000e+00> : vector<16x16xf32>
    %15 = tpu.matmul %13, %14, %cst {dimension_numbers = #tpu.dot_dimension_numbers<[1], [1], [0], [0], [0, 0, 1, 0], [], []>} : vector<16x8xbf16>, vector<16x8xbf16>, vector<16x16xf32> -> vector<16x16xf32>
    %c0_7 = arith.constant 0 : index
    %c0_8 = arith.constant 0 : index
    %c0_9 = arith.constant 0 : index
    %16 = vector.load %arg8[%c0_7, %c0_8, %c0_9] : memref<4x16x1xf32, #tpu.memory_space<vmem>>, vector<1x16x1xf32>
    %17 = vector.shape_cast %16 : vector<1x16x1xf32> to vector<16x1xf32>
    %cst_10 = arith.constant dense<0xFF800000> : vector<16xf32>
    %18 = vector.multi_reduction <maximumf>, %15, %cst_10 [1] : vector<16x16xf32> to vector<16xf32>
    %19 = vector.shape_cast %18 : vector<16xf32> to vector<16x1xf32>
    %20 = arith.maximumf %17, %19 : vector<16x1xf32>
    %21 = arith.subf %17, %20 : vector<16x1xf32>
    %22 = math.exp %21 : vector<16x1xf32>
    %23 = vector.broadcast %20 : vector<16x1xf32> to vector<16x16xf32>
    %24 = arith.subf %15, %23 : vector<16x16xf32>
    %25 = math.exp %24 : vector<16x16xf32>
    %26 = arith.truncf %25 : vector<16x16xf32> to vector<16x16xbf16>
    %c0_11 = arith.constant 0 : index
    %c0_12 = arith.constant 0 : index
    %c0_13 = arith.constant 0 : index
    %27 = vector.load %arg9[%c0_11, %c0_12, %c0_13] : memref<4x16x1xf32, #tpu.memory_space<vmem>>, vector<1x16x1xf32>
    %28 = vector.shape_cast %27 : vector<1x16x1xf32> to vector<16x1xf32>
    %29 = arith.mulf %22, %28 : vector<16x1xf32>
    %30 = arith.extf %26 : vector<16x16xbf16> to vector<16x16xf32>
    %cst_14 = arith.constant dense<0.000000e+00> : vector<16xf32>
    %31 = vector.multi_reduction <add>, %30, %cst_14 [1] : vector<16x16xf32> to vector<16xf32>
    %32 = vector.shape_cast %31 : vector<16xf32> to vector<16x1xf32>
    %33 = arith.addf %29, %32 : vector<16x1xf32>
    %c0_15 = arith.constant 0 : index
    %c0_16 = arith.constant 0 : index
    %c0_17 = arith.constant 0 : index
    %34 = vector.load %arg9[%c0_15, %c0_16, %c0_17] : memref<4x16x1xf32, #tpu.memory_space<vmem>>, vector<1x16x1xf32>
    %35 = vector.shape_cast %34 : vector<1x16x1xf32> to vector<16x1xf32>
    %36 = vector.shape_cast %33 : vector<16x1xf32> to vector<1x16x1xf32>
    tpu.vector_store %arg9[%c0_15, %c0_16, %c0_17], %36 {strides = array<i32>} : memref<4x16x1xf32, #tpu.memory_space<vmem>>, vector<1x16x1xf32>,
    %37 = vector.extract_strided_slice %12 {offsets = [0, 0], sizes = [16, 8], strides = [1, 1]} : vector<16x32xbf16> to vector<16x8xbf16>
    %cst_18 = arith.constant dense<0.000000e+00> : vector<16x8xf32>
    %38 = tpu.matmul %26, %37, %cst_18 {dimension_numbers = #tpu.dot_dimension_numbers<[1], [0], [0], [1], [0, 0, 1, 1], [], []>} : vector<16x16xbf16>, vector<16x8xbf16>, vector<16x8xf32> -> vector<16x8xf32>
    %c0_19 = arith.constant 0 : index
    %c0_20 = arith.constant 0 : index
    %39 = vector.load %arg10[%c0_19, %c0_20] : memref<16x32xf32, #tpu.memory_space<vmem>>, vector<16x8xf32>
    %40 = vector.broadcast %22 : vector<16x1xf32> to vector<16x8xf32>
    %41 = arith.mulf %40, %39 : vector<16x8xf32>
    %42 = arith.addf %41, %38 : vector<16x8xf32>
    %c0_21 = arith.constant 0 : index
    %c0_22 = arith.constant 0 : index
    %43 = vector.load %arg10[%c0_21, %c0_22] : memref<16x32xf32, #tpu.memory_space<vmem>>, vector<16x8xf32>
    tpu.vector_store %arg10[%c0_21, %c0_22], %42 {strides = array<i32>} : memref<16x32xf32, #tpu.memory_space<vmem>>, vector<16x8xf32>,
    %c0_23 = arith.constant 0 : index
    %c0_24 = arith.constant 0 : index
    %c0_25 = arith.constant 0 : index
    %44 = vector.load %arg8[%c0_23, %c0_24, %c0_25] : memref<4x16x1xf32, #tpu.memory_space<vmem>>, vector<1x16x1xf32>
    %45 = vector.shape_cast %44 : vector<1x16x1xf32> to vector<16x1xf32>
    %46 = vector.shape_cast %20 : vector<16x1xf32> to vector<1x16x1xf32>
    tpu.vector_store %arg8[%c0_23, %c0_24, %c0_25], %46 {strides = array<i32>} : memref<4x16x1xf32, #tpu.memory_space<vmem>>, vector<1x16x1xf32>,
    %47 = vector.extract_strided_slice %6 {offsets = [0, 8], sizes = [16, 8], strides = [1, 1]} : vector<16x32xbf16> to vector<16x8xbf16>
    %48 = vector.extract_strided_slice %9 {offsets = [0, 8], sizes = [16, 8], strides = [1, 1]} : vector<16x32xbf16> to vector<16x8xbf16>
    %cst_26 = arith.constant dense<0.000000e+00> : vector<16x16xf32>
    %49 = tpu.matmul %47, %48, %cst_26 {dimension_numbers = #tpu.dot_dimension_numbers<[1], [1], [0], [0], [0, 0, 1, 0], [], []>} : vector<16x8xbf16>, vector<16x8xbf16>, vector<16x16xf32> -> vector<16x16xf32>
    %c1 = arith.constant 1 : index
    %c0_27 = arith.constant 0 : index
    %c0_28 = arith.constant 0 : index
    %50 = vector.load %arg8[%c1, %c0_27, %c0_28] : memref<4x16x1xf32, #tpu.memory_space<vmem>>, vector<1x16x1xf32>
    %51 = vector.shape_cast %50 : vector<1x16x1xf32> to vector<16x1xf32>
    %cst_29 = arith.constant dense<0xFF800000> : vector<16xf32>
    %52 = vector.multi_reduction <maximumf>, %49, %cst_29 [1] : vector<16x16xf32> to vector<16xf32>
    %53 = vector.shape_cast %52 : vector<16xf32> to vector<16x1xf32>
    %54 = arith.maximumf %51, %53 : vector<16x1xf32>
    %55 = arith.subf %51, %54 : vector<16x1xf32>
    %56 = math.exp %55 : vector<16x1xf32>
    %57 = vector.broadcast %54 : vector<16x1xf32> to vector<16x16xf32>
    %58 = arith.subf %49, %57 : vector<16x16xf32>
    %59 = math.exp %58 : vector<16x16xf32>
    %60 = arith.truncf %59 : vector<16x16xf32> to vector<16x16xbf16>
    %c1_30 = arith.constant 1 : index
    %c0_31 = arith.constant 0 : index
    %c0_32 = arith.constant 0 : index
    %61 = vector.load %arg9[%c1_30, %c0_31, %c0_32] : memref<4x16x1xf32, #tpu.memory_space<vmem>>, vector<1x16x1xf32>
    %62 = vector.shape_cast %61 : vector<1x16x1xf32> to vector<16x1xf32>
    %63 = arith.mulf %56, %62 : vector<16x1xf32>
    %64 = arith.extf %60 : vector<16x16xbf16> to vector<16x16xf32>
    %cst_33 = arith.constant dense<0.000000e+00> : vector<16xf32>
    %65 = vector.multi_reduction <add>, %64, %cst_33 [1] : vector<16x16xf32> to vector<16xf32>
    %66 = vector.shape_cast %65 : vector<16xf32> to vector<16x1xf32>
    %67 = arith.addf %63, %66 : vector<16x1xf32>
    %c1_34 = arith.constant 1 : index
    %c0_35 = arith.constant 0 : index
    %c0_36 = arith.constant 0 : index
    %68 = vector.load %arg9[%c1_34, %c0_35, %c0_36] : memref<4x16x1xf32, #tpu.memory_space<vmem>>, vector<1x16x1xf32>
    %69 = vector.shape_cast %68 : vector<1x16x1xf32> to vector<16x1xf32>
    %70 = vector.shape_cast %67 : vector<16x1xf32> to vector<1x16x1xf32>
    tpu.vector_store %arg9[%c1_34, %c0_35, %c0_36], %70 {strides = array<i32>} : memref<4x16x1xf32, #tpu.memory_space<vmem>>, vector<1x16x1xf32>,
    %71 = vector.extract_strided_slice %12 {offsets = [0, 8], sizes = [16, 8], strides = [1, 1]} : vector<16x32xbf16> to vector<16x8xbf16>
    %cst_37 = arith.constant dense<0.000000e+00> : vector<16x8xf32>
    %72 = tpu.matmul %60, %71, %cst_37 {dimension_numbers = #tpu.dot_dimension_numbers<[1], [0], [0], [1], [0, 0, 1, 1], [], []>} : vector<16x16xbf16>, vector<16x8xbf16>, vector<16x8xf32> -> vector<16x8xf32>
    %c0_38 = arith.constant 0 : index
    %c8 = arith.constant 8 : index
    %73 = vector.load %arg10[%c0_38, %c8] : memref<16x32xf32, #tpu.memory_space<vmem>>, vector<16x8xf32>
    %74 = vector.broadcast %56 : vector<16x1xf32> to vector<16x8xf32>
    %75 = arith.mulf %74, %73 : vector<16x8xf32>
    %76 = arith.addf %75, %72 : vector<16x8xf32>
    %c0_39 = arith.constant 0 : index
    %c8_40 = arith.constant 8 : index
    %77 = vector.load %arg10[%c0_39, %c8_40] : memref<16x32xf32, #tpu.memory_space<vmem>>, vector<16x8xf32>
    tpu.vector_store %arg10[%c0_39, %c8_40], %76 {strides = array<i32>} : memref<16x32xf32, #tpu.memory_space<vmem>>, vector<16x8xf32>,
    %c1_41 = arith.constant 1 : index
    %c0_42 = arith.constant 0 : index
    %c0_43 = arith.constant 0 : index
    %78 = vector.load %arg8[%c1_41, %c0_42, %c0_43] : memref<4x16x1xf32, #tpu.memory_space<vmem>>, vector<1x16x1xf32>
    %79 = vector.shape_cast %78 : vector<1x16x1xf32> to vector<16x1xf32>
    %80 = vector.shape_cast %54 : vector<16x1xf32> to vector<1x16x1xf32>
    tpu.vector_store %arg8[%c1_41, %c0_42, %c0_43], %80 {strides = array<i32>} : memref<4x16x1xf32, #tpu.memory_space<vmem>>, vector<1x16x1xf32>,
    %81 = vector.extract_strided_slice %6 {offsets = [0, 16], sizes = [16, 8], strides = [1, 1]} : vector<16x32xbf16> to vector<16x8xbf16>
    %82 = vector.extract_strided_slice %9 {offsets = [0, 16], sizes = [16, 8], strides = [1, 1]} : vector<16x32xbf16> to vector<16x8xbf16>
    %cst_44 = arith.constant dense<0.000000e+00> : vector<16x16xf32>
    %83 = tpu.matmul %81, %82, %cst_44 {dimension_numbers = #tpu.dot_dimension_numbers<[1], [1], [0], [0], [0, 0, 1, 0], [], []>} : vector<16x8xbf16>, vector<16x8xbf16>, vector<16x16xf32> -> vector<16x16xf32>
    %c2 = arith.constant 2 : index
    %c0_45 = arith.constant 0 : index
    %c0_46 = arith.constant 0 : index
    %84 = vector.load %arg8[%c2, %c0_45, %c0_46] : memref<4x16x1xf32, #tpu.memory_space<vmem>>, vector<1x16x1xf32>
    %85 = vector.shape_cast %84 : vector<1x16x1xf32> to vector<16x1xf32>
    %cst_47 = arith.constant dense<0xFF800000> : vector<16xf32>
    %86 = vector.multi_reduction <maximumf>, %83, %cst_47 [1] : vector<16x16xf32> to vector<16xf32>
    %87 = vector.shape_cast %86 : vector<16xf32> to vector<16x1xf32>
    %88 = arith.maximumf %85, %87 : vector<16x1xf32>
    %89 = arith.subf %85, %88 : vector<16x1xf32>
    %90 = math.exp %89 : vector<16x1xf32>
    %91 = vector.broadcast %88 : vector<16x1xf32> to vector<16x16xf32>
    %92 = arith.subf %83, %91 : vector<16x16xf32>
    %93 = math.exp %92 : vector<16x16xf32>
    %94 = arith.truncf %93 : vector<16x16xf32> to vector<16x16xbf16>
    %c2_48 = arith.constant 2 : index
    %c0_49 = arith.constant 0 : index
    %c0_50 = arith.constant 0 : index
    %95 = vector.load %arg9[%c2_48, %c0_49, %c0_50] : memref<4x16x1xf32, #tpu.memory_space<vmem>>, vector<1x16x1xf32>
    %96 = vector.shape_cast %95 : vector<1x16x1xf32> to vector<16x1xf32>
    %97 = arith.mulf %90, %96 : vector<16x1xf32>
    %98 = arith.extf %94 : vector<16x16xbf16> to vector<16x16xf32>
    %cst_51 = arith.constant dense<0.000000e+00> : vector<16xf32>
    %99 = vector.multi_reduction <add>, %98, %cst_51 [1] : vector<16x16xf32> to vector<16xf32>
    %100 = vector.shape_cast %99 : vector<16xf32> to vector<16x1xf32>
    %101 = arith.addf %97, %100 : vector<16x1xf32>
    %c2_52 = arith.constant 2 : index
    %c0_53 = arith.constant 0 : index
    %c0_54 = arith.constant 0 : index
    %102 = vector.load %arg9[%c2_52, %c0_53, %c0_54] : memref<4x16x1xf32, #tpu.memory_space<vmem>>, vector<1x16x1xf32>
    %103 = vector.shape_cast %102 : vector<1x16x1xf32> to vector<16x1xf32>
    %104 = vector.shape_cast %101 : vector<16x1xf32> to vector<1x16x1xf32>
    tpu.vector_store %arg9[%c2_52, %c0_53, %c0_54], %104 {strides = array<i32>} : memref<4x16x1xf32, #tpu.memory_space<vmem>>, vector<1x16x1xf32>,
    %105 = vector.extract_strided_slice %12 {offsets = [0, 16], sizes = [16, 8], strides = [1, 1]} : vector<16x32xbf16> to vector<16x8xbf16>
    %cst_55 = arith.constant dense<0.000000e+00> : vector<16x8xf32>
    %106 = tpu.matmul %94, %105, %cst_55 {dimension_numbers = #tpu.dot_dimension_numbers<[1], [0], [0], [1], [0, 0, 1, 1], [], []>} : vector<16x16xbf16>, vector<16x8xbf16>, vector<16x8xf32> -> vector<16x8xf32>
    %c0_56 = arith.constant 0 : index
    %c16 = arith.constant 16 : index
    %107 = vector.load %arg10[%c0_56, %c16] : memref<16x32xf32, #tpu.memory_space<vmem>>, vector<16x8xf32>
    %108 = vector.broadcast %90 : vector<16x1xf32> to vector<16x8xf32>
    %109 = arith.mulf %108, %107 : vector<16x8xf32>
    %110 = arith.addf %109, %106 : vector<16x8xf32>
    %c0_57 = arith.constant 0 : index
    %c16_58 = arith.constant 16 : index
    %111 = vector.load %arg10[%c0_57, %c16_58] : memref<16x32xf32, #tpu.memory_space<vmem>>, vector<16x8xf32>
    tpu.vector_store %arg10[%c0_57, %c16_58], %110 {strides = array<i32>} : memref<16x32xf32, #tpu.memory_space<vmem>>, vector<16x8xf32>,
    %c2_59 = arith.constant 2 : index
    %c0_60 = arith.constant 0 : index
    %c0_61 = arith.constant 0 : index
    %112 = vector.load %arg8[%c2_59, %c0_60, %c0_61] : memref<4x16x1xf32, #tpu.memory_space<vmem>>, vector<1x16x1xf32>
    %113 = vector.shape_cast %112 : vector<1x16x1xf32> to vector<16x1xf32>
    %114 = vector.shape_cast %88 : vector<16x1xf32> to vector<1x16x1xf32>
    tpu.vector_store %arg8[%c2_59, %c0_60, %c0_61], %114 {strides = array<i32>} : memref<4x16x1xf32, #tpu.memory_space<vmem>>, vector<1x16x1xf32>,
    %115 = vector.extract_strided_slice %6 {offsets = [0, 24], sizes = [16, 8], strides = [1, 1]} : vector<16x32xbf16> to vector<16x8xbf16>
    %116 = vector.extract_strided_slice %9 {offsets = [0, 24], sizes = [16, 8], strides = [1, 1]} : vector<16x32xbf16> to vector<16x8xbf16>
    %cst_62 = arith.constant dense<0.000000e+00> : vector<16x16xf32>
    %117 = tpu.matmul %115, %116, %cst_62 {dimension_numbers = #tpu.dot_dimension_numbers<[1], [1], [0], [0], [0, 0, 1, 0], [], []>} : vector<16x8xbf16>, vector<16x8xbf16>, vector<16x16xf32> -> vector<16x16xf32>
    %c3 = arith.constant 3 : index
    %c0_63 = arith.constant 0 : index
    %c0_64 = arith.constant 0 : index
    %118 = vector.load %arg8[%c3, %c0_63, %c0_64] : memref<4x16x1xf32, #tpu.memory_space<vmem>>, vector<1x16x1xf32>
    %119 = vector.shape_cast %118 : vector<1x16x1xf32> to vector<16x1xf32>
    %cst_65 = arith.constant dense<0xFF800000> : vector<16xf32>
    %120 = vector.multi_reduction <maximumf>, %117, %cst_65 [1] : vector<16x16xf32> to vector<16xf32>
    %121 = vector.shape_cast %120 : vector<16xf32> to vector<16x1xf32>
    %122 = arith.maximumf %119, %121 : vector<16x1xf32>
    %123 = arith.subf %119, %122 : vector<16x1xf32>
    %124 = math.exp %123 : vector<16x1xf32>
    %125 = vector.broadcast %122 : vector<16x1xf32> to vector<16x16xf32>
    %126 = arith.subf %117, %125 : vector<16x16xf32>
    %127 = math.exp %126 : vector<16x16xf32>
    %128 = arith.truncf %127 : vector<16x16xf32> to vector<16x16xbf16>
    %c3_66 = arith.constant 3 : index
    %c0_67 = arith.constant 0 : index
    %c0_68 = arith.constant 0 : index
    %129 = vector.load %arg9[%c3_66, %c0_67, %c0_68] : memref<4x16x1xf32, #tpu.memory_space<vmem>>, vector<1x16x1xf32>
    %130 = vector.shape_cast %129 : vector<1x16x1xf32> to vector<16x1xf32>
    %131 = arith.mulf %124, %130 : vector<16x1xf32>
    %132 = arith.extf %128 : vector<16x16xbf16> to vector<16x16xf32>
    %cst_69 = arith.constant dense<0.000000e+00> : vector<16xf32>
    %133 = vector.multi_reduction <add>, %132, %cst_69 [1] : vector<16x16xf32> to vector<16xf32>
    %134 = vector.shape_cast %133 : vector<16xf32> to vector<16x1xf32>
    %135 = arith.addf %131, %134 : vector<16x1xf32>
    %c3_70 = arith.constant 3 : index
    %c0_71 = arith.constant 0 : index
    %c0_72 = arith.constant 0 : index
    %136 = vector.load %arg9[%c3_70, %c0_71, %c0_72] : memref<4x16x1xf32, #tpu.memory_space<vmem>>, vector<1x16x1xf32>
    %137 = vector.shape_cast %136 : vector<1x16x1xf32> to vector<16x1xf32>
    %138 = vector.shape_cast %135 : vector<16x1xf32> to vector<1x16x1xf32>
    tpu.vector_store %arg9[%c3_70, %c0_71, %c0_72], %138 {strides = array<i32>} : memref<4x16x1xf32, #tpu.memory_space<vmem>>, vector<1x16x1xf32>,
    %139 = vector.extract_strided_slice %12 {offsets = [0, 24], sizes = [16, 8], strides = [1, 1]} : vector<16x32xbf16> to vector<16x8xbf16>
    %cst_73 = arith.constant dense<0.000000e+00> : vector<16x8xf32>
    %140 = tpu.matmul %128, %139, %cst_73 {dimension_numbers = #tpu.dot_dimension_numbers<[1], [0], [0], [1], [0, 0, 1, 1], [], []>} : vector<16x16xbf16>, vector<16x8xbf16>, vector<16x8xf32> -> vector<16x8xf32>
    %c0_74 = arith.constant 0 : index
    %c24 = arith.constant 24 : index
    %141 = vector.load %arg10[%c0_74, %c24] : memref<16x32xf32, #tpu.memory_space<vmem>>, vector<16x8xf32>
    %142 = vector.broadcast %124 : vector<16x1xf32> to vector<16x8xf32>
    %143 = arith.mulf %142, %141 : vector<16x8xf32>
    %144 = arith.addf %143, %140 : vector<16x8xf32>
    %c0_75 = arith.constant 0 : index
    %c24_76 = arith.constant 24 : index
    %145 = vector.load %arg10[%c0_75, %c24_76] : memref<16x32xf32, #tpu.memory_space<vmem>>, vector<16x8xf32>
    tpu.vector_store %arg10[%c0_75, %c24_76], %144 {strides = array<i32>} : memref<16x32xf32, #tpu.memory_space<vmem>>, vector<16x8xf32>,
    %c3_77 = arith.constant 3 : index
    %c0_78 = arith.constant 0 : index
    %c0_79 = arith.constant 0 : index
    %146 = vector.load %arg8[%c3_77, %c0_78, %c0_79] : memref<4x16x1xf32, #tpu.memory_space<vmem>>, vector<1x16x1xf32>
    %147 = vector.shape_cast %146 : vector<1x16x1xf32> to vector<16x1xf32>
    %148 = vector.shape_cast %122 : vector<16x1xf32> to vector<1x16x1xf32>
    tpu.vector_store %arg8[%c3_77, %c0_78, %c0_79], %148 {strides = array<i32>} : memref<4x16x1xf32, #tpu.memory_space<vmem>>, vector<1x16x1xf32>,
    %c0_i32_80 = arith.constant 0 : i32
    %149 = arith.cmpi eq, %arg3, %c0_i32_80 : i32
    %150 = arith.extui %149 : i1 to i32
    %c0_i32_81 = arith.constant 0 : i32
    %151 = arith.cmpi ne, %150, %c0_i32_81 : i32
    scf.if %151 {
      %c0_82 = arith.constant 0 : index
      %c0_83 = arith.constant 0 : index
      %152 = vector.load %arg10[%c0_82, %c0_83] : memref<16x32xf32, #tpu.memory_space<vmem>>, vector<16x8xf32>
      %c0_84 = arith.constant 0 : index
      %c0_85 = arith.constant 0 : index
      %c0_86 = arith.constant 0 : index
      %153 = vector.load %arg9[%c0_84, %c0_85, %c0_86] : memref<4x16x1xf32, #tpu.memory_space<vmem>>, vector<1x16x1xf32>
      %154 = vector.shape_cast %153 : vector<1x16x1xf32> to vector<16x1xf32>
      %155 = tpu.reciprocal %154 {approx = true} : vector<16x1xf32> -> vector<16x1xf32>
      %156 = vector.broadcast %155 : vector<16x1xf32> to vector<16x8xf32>
      %157 = arith.mulf %152, %156 : vector<16x8xf32>
      %c0_87 = arith.constant 0 : index
      %c0_88 = arith.constant 0 : index
      %158 = vector.load %arg10[%c0_87, %c0_88] : memref<16x32xf32, #tpu.memory_space<vmem>>, vector<16x8xf32>
      tpu.vector_store %arg10[%c0_87, %c0_88], %157 {strides = array<i32>} : memref<16x32xf32, #tpu.memory_space<vmem>>, vector<16x8xf32>,
      %c0_89 = arith.constant 0 : index
      %c8_90 = arith.constant 8 : index
      %159 = vector.load %arg10[%c0_89, %c8_90] : memref<16x32xf32, #tpu.memory_space<vmem>>, vector<16x8xf32>
      %c1_91 = arith.constant 1 : index
      %c0_92 = arith.constant 0 : index
      %c0_93 = arith.constant 0 : index
      %160 = vector.load %arg9[%c1_91, %c0_92, %c0_93] : memref<4x16x1xf32, #tpu.memory_space<vmem>>, vector<1x16x1xf32>
      %161 = vector.shape_cast %160 : vector<1x16x1xf32> to vector<16x1xf32>
      %162 = tpu.reciprocal %161 {approx = true} : vector<16x1xf32> -> vector<16x1xf32>
      %163 = vector.broadcast %162 : vector<16x1xf32> to vector<16x8xf32>
      %164 = arith.mulf %159, %163 : vector<16x8xf32>
      %c0_94 = arith.constant 0 : index
      %c8_95 = arith.constant 8 : index
      %165 = vector.load %arg10[%c0_94, %c8_95] : memref<16x32xf32, #tpu.memory_space<vmem>>, vector<16x8xf32>
      tpu.vector_store %arg10[%c0_94, %c8_95], %164 {strides = array<i32>} : memref<16x32xf32, #tpu.memory_space<vmem>>, vector<16x8xf32>,
      %c0_96 = arith.constant 0 : index
      %c16_97 = arith.constant 16 : index
      %166 = vector.load %arg10[%c0_96, %c16_97] : memref<16x32xf32, #tpu.memory_space<vmem>>, vector<16x8xf32>
      %c2_98 = arith.constant 2 : index
      %c0_99 = arith.constant 0 : index
      %c0_100 = arith.constant 0 : index
      %167 = vector.load %arg9[%c2_98, %c0_99, %c0_100] : memref<4x16x1xf32, #tpu.memory_space<vmem>>, vector<1x16x1xf32>
      %168 = vector.shape_cast %167 : vector<1x16x1xf32> to vector<16x1xf32>
      %169 = tpu.reciprocal %168 {approx = true} : vector<16x1xf32> -> vector<16x1xf32>
      %170 = vector.broadcast %169 : vector<16x1xf32> to vector<16x8xf32>
      %171 = arith.mulf %166, %170 : vector<16x8xf32>
      %c0_101 = arith.constant 0 : index
      %c16_102 = arith.constant 16 : index
      %172 = vector.load %arg10[%c0_101, %c16_102] : memref<16x32xf32, #tpu.memory_space<vmem>>, vector<16x8xf32>
      tpu.vector_store %arg10[%c0_101, %c16_102], %171 {strides = array<i32>} : memref<16x32xf32, #tpu.memory_space<vmem>>, vector<16x8xf32>,
      %c0_103 = arith.constant 0 : index
      %c24_104 = arith.constant 24 : index
      %173 = vector.load %arg10[%c0_103, %c24_104] : memref<16x32xf32, #tpu.memory_space<vmem>>, vector<16x8xf32>
      %c3_105 = arith.constant 3 : index
      %c0_106 = arith.constant 0 : index
      %c0_107 = arith.constant 0 : index
      %174 = vector.load %arg9[%c3_105, %c0_106, %c0_107] : memref<4x16x1xf32, #tpu.memory_space<vmem>>, vector<1x16x1xf32>
      %175 = vector.shape_cast %174 : vector<1x16x1xf32> to vector<16x1xf32>
      %176 = tpu.reciprocal %175 {approx = true} : vector<16x1xf32> -> vector<16x1xf32>
      %177 = vector.broadcast %176 : vector<16x1xf32> to vector<16x8xf32>
      %178 = arith.mulf %173, %177 : vector<16x8xf32>
      %c0_108 = arith.constant 0 : index
      %c24_109 = arith.constant 24 : index
      %179 = vector.load %arg10[%c0_108, %c24_109] : memref<16x32xf32, #tpu.memory_space<vmem>>, vector<16x8xf32>
      tpu.vector_store %arg10[%c0_108, %c24_109], %178 {strides = array<i32>} : memref<16x32xf32, #tpu.memory_space<vmem>>, vector<16x8xf32>,
      %c0_110 = arith.constant 0 : index
      %c0_111 = arith.constant 0 : index
      %180 = vector.load %arg10[%c0_110, %c0_111] : memref<16x32xf32, #tpu.memory_space<vmem>>, vector<16x32xf32>
      %181 = arith.truncf %180 : vector<16x32xf32> to vector<16x32xbf16>
      %c0_112 = arith.constant 0 : index
      %c0_113 = arith.constant 0 : index
      %c0_114 = arith.constant 0 : index
      %182 = vector.load %arg7[%c0_112, %c0_113, %c0_114] : memref<1x16x32xbf16, #tpu.memory_space<vmem>>, vector<1x16x32xbf16>
      %183 = vector.shape_cast %182 : vector<1x16x32xbf16> to vector<16x32xbf16>
      %184 = vector.shape_cast %181 : vector<16x32xbf16> to vector<1x16x32xbf16>
      tpu.vector_store %arg7[%c0_112, %c0_113, %c0_114], %184 {strides = array<i32>} : memref<1x16x32xbf16, #tpu.memory_space<vmem>>, vector<1x16x32xbf16>,
    } else {
    }
    return
  }
  func.func @transform_0(%arg0: i32, %arg1: i32, %arg2: i32, %arg3: i32) -> (i32, i32, i32) {
    %c0_i32 = arith.constant 0 : i32
    return %arg0, %arg2, %arg1 : i32, i32, i32
  }
  func.func @transform_1(%arg0: i32, %arg1: i32, %arg2: i32, %arg3: i32) -> (i32, i32, i32) {
    %c0_i32 = arith.constant 0 : i32
    %c0_i32_0 = arith.constant 0 : i32
    return %arg0, %c0_i32, %arg1 : i32, i32, i32
  }
  func.func @transform_2(%arg0: i32, %arg1: i32, %arg2: i32, %arg3: i32) -> (i32, i32, i32) {
    %c0_i32 = arith.constant 0 : i32
    %c0_i32_0 = arith.constant 0 : i32
    return %arg0, %c0_i32, %arg1 : i32, i32, i32
  }
  func.func @transform_3(%arg0: i32, %arg1: i32, %arg2: i32, %arg3: i32) -> (i32, i32, i32) {
    %c0_i32 = arith.constant 0 : i32
    return %arg0, %arg2, %arg1 : i32, i32, i32
  }
}

module attributes {stable_mosaic.version = 11 : i64} {
  func.func @_pre_attn_kernel(%arg0: i32, %arg1: i32, %arg2: memref<1x8x32xf32, #tpu.memory_space<vmem>>, %arg3: memref<1x1x1x32xf32, #tpu.memory_space<vmem>>, %arg4: memref<1x1x1x32xf32, #tpu.memory_space<vmem>>, %arg5: memref<1x32x96xbf16, #tpu.memory_space<vmem>>, %arg6: memref<1x1x96xf32, #tpu.memory_space<vmem>>, %arg7: memref<1x1x32xf32, #tpu.memory_space<vmem>>, %arg8: memref<1x1x32xf32, #tpu.memory_space<vmem>>, %arg9: memref<1x1x32xf32, #tpu.memory_space<vmem>>, %arg10: memref<1x1x32xf32, #tpu.memory_space<vmem>>, %arg11: memref<1x8x32xbf16, #tpu.memory_space<vmem>>, %arg12: memref<1x8x32xbf16, #tpu.memory_space<vmem>>, %arg13: memref<1x8x32xbf16, #tpu.memory_space<vmem>>) attributes {dimension_semantics = [#tpu.dimension_semantics<parallel>, #tpu.dimension_semantics<parallel>], iteration_bounds = array<i64: 2, 2>, scalar_prefetch = 0 : i64, scratch_operands = 0 : i64, tpu.core_type = #tpu.core_type<tc>, window_params = [{transform_indices = @transform_0, window_bounds = array<i64: 1, 8, 32>}, {transform_indices = @transform_1, window_bounds = array<i64: 1, 1, 1, 32>}, {transform_indices = @transform_2, window_bounds = array<i64: 1, 1, 1, 32>}, {pipeline_mode = #tpu.pipeline_mode<synchronous>, transform_indices = @transform_3, window_bounds = array<i64: 1, 32, 96>}, {pipeline_mode = #tpu.pipeline_mode<synchronous>, transform_indices = @transform_4, window_bounds = array<i64: 1, 1, 96>}, {pipeline_mode = #tpu.pipeline_mode<synchronous>, transform_indices = @transform_5, window_bounds = array<i64: 1, 1, 32>}, {pipeline_mode = #tpu.pipeline_mode<synchronous>, transform_indices = @transform_6, window_bounds = array<i64: 1, 1, 32>}, {pipeline_mode = #tpu.pipeline_mode<synchronous>, transform_indices = @transform_7, window_bounds = array<i64: 1, 1, 32>}, {pipeline_mode = #tpu.pipeline_mode<synchronous>, transform_indices = @transform_8, window_bounds = array<i64: 1, 1, 32>}, {transform_indices = @transform_9, window_bounds = array<i64: 1, 8, 32>}, {transform_indices = @transform_10, window_bounds = array<i64: 1, 8, 32>}, {transform_indices = @transform_11, window_bounds = array<i64: 1, 8, 32>}]} {
    %c0 = arith.constant 0 : index
    %c0_0 = arith.constant 0 : index
    %c0_1 = arith.constant 0 : index
    %0 = vector.load %arg2[%c0, %c0_0, %c0_1] : memref<1x8x32xf32, #tpu.memory_space<vmem>>, vector<1x8x32xf32>
    %1 = vector.shape_cast %0 : vector<1x8x32xf32> to vector<8x32xf32>
    %c0_2 = arith.constant 0 : index
    %c0_3 = arith.constant 0 : index
    %c0_4 = arith.constant 0 : index
    %c0_5 = arith.constant 0 : index
    %2 = vector.load %arg3[%c0_2, %c0_3, %c0_4, %c0_5] : memref<1x1x1x32xf32, #tpu.memory_space<vmem>>, vector<1x1x1x32xf32>
    %3 = vector.shape_cast %2 : vector<1x1x1x32xf32> to vector<1x32xf32>
    %c0_6 = arith.constant 0 : index
    %c0_7 = arith.constant 0 : index
    %c0_8 = arith.constant 0 : index
    %c0_9 = arith.constant 0 : index
    %4 = vector.load %arg4[%c0_6, %c0_7, %c0_8, %c0_9] : memref<1x1x1x32xf32, #tpu.memory_space<vmem>>, vector<1x1x1x32xf32>
    %5 = vector.shape_cast %4 : vector<1x1x1x32xf32> to vector<1x32xf32>
    %cst = arith.constant dense<0.000000e+00> : vector<8xf32>
    %6 = vector.multi_reduction <add>, %1, %cst [1] : vector<8x32xf32> to vector<8xf32>
    %7 = vector.shape_cast %6 : vector<8xf32> to vector<8x1xf32>
    %cst_10 = arith.constant 3.200000e+01 : f32
    %8 = vector.broadcast %cst_10 : f32 to vector<8x1xf32>
    %9 = arith.divf %7, %8 : vector<8x1xf32>
    %10 = arith.mulf %1, %1 : vector<8x32xf32>
    %cst_11 = arith.constant dense<0.000000e+00> : vector<8xf32>
    %11 = vector.multi_reduction <add>, %10, %cst_11 [1] : vector<8x32xf32> to vector<8xf32>
    %12 = vector.shape_cast %11 : vector<8xf32> to vector<8x1xf32>
    %cst_12 = arith.constant 3.200000e+01 : f32
    %13 = vector.broadcast %cst_12 : f32 to vector<8x1xf32>
    %14 = arith.divf %12, %13 : vector<8x1xf32>
    %15 = arith.mulf %9, %9 : vector<8x1xf32>
    %16 = arith.subf %14, %15 : vector<8x1xf32>
    %cst_13 = arith.constant 0.000000e+00 : f32
    %17 = vector.broadcast %cst_13 : f32 to vector<8x1xf32>
    %18 = arith.maximumf %16, %17 : vector<8x1xf32>
    %19 = vector.broadcast %9 : vector<8x1xf32> to vector<8x32xf32>
    %20 = arith.subf %1, %19 : vector<8x32xf32>
    %cst_14 = arith.constant 9.99999997E-7 : f32
    %21 = vector.broadcast %cst_14 : f32 to vector<8x1xf32>
    %22 = arith.addf %18, %21 : vector<8x1xf32>
    %23 = math.rsqrt %22 : vector<8x1xf32>
    %24 = vector.broadcast %23 : vector<8x1xf32> to vector<8x32xf32>
    %25 = arith.mulf %20, %24 : vector<8x32xf32>
    %cst_15 = arith.constant 1.000000e+00 : f32
    %26 = vector.broadcast %cst_15 : f32 to vector<1x32xf32>
    %27 = arith.addf %26, %5 : vector<1x32xf32>
    %28 = vector.broadcast %27 : vector<1x32xf32> to vector<8x32xf32>
    %29 = arith.mulf %25, %28 : vector<8x32xf32>
    %30 = vector.broadcast %3 : vector<1x32xf32> to vector<8x32xf32>
    %31 = arith.addf %29, %30 : vector<8x32xf32>
    %32 = arith.truncf %31 : vector<8x32xf32> to vector<8x32xbf16>
    %c0_16 = arith.constant 0 : index
    %c0_17 = arith.constant 0 : index
    %c0_18 = arith.constant 0 : index
    %33 = vector.load %arg5[%c0_16, %c0_17, %c0_18] : memref<1x32x96xbf16, #tpu.memory_space<vmem>>, vector<1x32x96xbf16>
    %34 = vector.shape_cast %33 : vector<1x32x96xbf16> to vector<32x96xbf16>
    %cst_19 = arith.constant dense<0.000000e+00> : vector<8x96xf32>
    %35 = tpu.matmul %32, %34, %cst_19 {dimension_numbers = #tpu.dot_dimension_numbers<[1], [0], [0], [1], [0, 0, 1, 1], [], []>} : vector<8x32xbf16>, vector<32x96xbf16>, vector<8x96xf32> -> vector<8x96xf32>
    %c0_20 = arith.constant 0 : index
    %c0_21 = arith.constant 0 : index
    %c0_22 = arith.constant 0 : index
    %36 = vector.load %arg6[%c0_20, %c0_21, %c0_22] : memref<1x1x96xf32, #tpu.memory_space<vmem>>, vector<1x1x96xf32>
    %37 = vector.shape_cast %36 : vector<1x1x96xf32> to vector<1x96xf32>
    %38 = vector.broadcast %37 : vector<1x96xf32> to vector<8x96xf32>
    %39 = arith.addf %35, %38 : vector<8x96xf32>
    %40 = vector.extract_strided_slice %39 {offsets = [0, 0], sizes = [8, 32], strides = [1, 1]} : vector<8x96xf32> to vector<8x32xf32>
    %41 = vector.extract_strided_slice %39 {offsets = [0, 32], sizes = [8, 32], strides = [1, 1]} : vector<8x96xf32> to vector<8x32xf32>
    %42 = vector.extract_strided_slice %39 {offsets = [0, 64], sizes = [8, 32], strides = [1, 1]} : vector<8x96xf32> to vector<8x32xf32>
    %cst_23 = arith.constant dense<0.000000e+00> : vector<8xf32>
    %43 = vector.multi_reduction <add>, %40, %cst_23 [1] : vector<8x32xf32> to vector<8xf32>
    %44 = vector.shape_cast %43 : vector<8xf32> to vector<8x1xf32>
    %cst_24 = arith.constant 3.200000e+01 : f32
    %45 = vector.broadcast %cst_24 : f32 to vector<8x1xf32>
    %46 = arith.divf %44, %45 : vector<8x1xf32>
    %47 = arith.mulf %40, %40 : vector<8x32xf32>
    %cst_25 = arith.constant dense<0.000000e+00> : vector<8xf32>
    %48 = vector.multi_reduction <add>, %47, %cst_25 [1] : vector<8x32xf32> to vector<8xf32>
    %49 = vector.shape_cast %48 : vector<8xf32> to vector<8x1xf32>
    %cst_26 = arith.constant 3.200000e+01 : f32
    %50 = vector.broadcast %cst_26 : f32 to vector<8x1xf32>
    %51 = arith.divf %49, %50 : vector<8x1xf32>
    %52 = arith.mulf %46, %46 : vector<8x1xf32>
    %53 = arith.subf %51, %52 : vector<8x1xf32>
    %cst_27 = arith.constant 0.000000e+00 : f32
    %54 = vector.broadcast %cst_27 : f32 to vector<8x1xf32>
    %55 = arith.maximumf %53, %54 : vector<8x1xf32>
    %56 = vector.broadcast %46 : vector<8x1xf32> to vector<8x32xf32>
    %57 = arith.subf %40, %56 : vector<8x32xf32>
    %cst_28 = arith.constant 9.99999997E-7 : f32
    %58 = vector.broadcast %cst_28 : f32 to vector<8x1xf32>
    %59 = arith.addf %55, %58 : vector<8x1xf32>
    %60 = math.rsqrt %59 : vector<8x1xf32>
    %61 = vector.broadcast %60 : vector<8x1xf32> to vector<8x32xf32>
    %62 = arith.mulf %57, %61 : vector<8x32xf32>
    %c0_29 = arith.constant 0 : index
    %c0_30 = arith.constant 0 : index
    %c0_31 = arith.constant 0 : index
    %63 = vector.load %arg7[%c0_29, %c0_30, %c0_31] : memref<1x1x32xf32, #tpu.memory_space<vmem>>, vector<1x1x32xf32>
    %64 = vector.shape_cast %63 : vector<1x1x32xf32> to vector<1x32xf32>
    %65 = vector.broadcast %64 : vector<1x32xf32> to vector<8x32xf32>
    %66 = arith.mulf %62, %65 : vector<8x32xf32>
    %c0_32 = arith.constant 0 : index
    %c0_33 = arith.constant 0 : index
    %c0_34 = arith.constant 0 : index
    %67 = vector.load %arg8[%c0_32, %c0_33, %c0_34] : memref<1x1x32xf32, #tpu.memory_space<vmem>>, vector<1x1x32xf32>
    %68 = vector.shape_cast %67 : vector<1x1x32xf32> to vector<1x32xf32>
    %69 = vector.broadcast %68 : vector<1x32xf32> to vector<8x32xf32>
    %70 = arith.addf %66, %69 : vector<8x32xf32>
    %cst_35 = arith.constant 0.353553385 : f32
    %71 = vector.broadcast %cst_35 : f32 to vector<8x32xf32>
    %72 = arith.mulf %70, %71 : vector<8x32xf32>
    %cst_36 = arith.constant dense<0.000000e+00> : vector<8xf32>
    %73 = vector.multi_reduction <add>, %41, %cst_36 [1] : vector<8x32xf32> to vector<8xf32>
    %74 = vector.shape_cast %73 : vector<8xf32> to vector<8x1xf32>
    %cst_37 = arith.constant 3.200000e+01 : f32
    %75 = vector.broadcast %cst_37 : f32 to vector<8x1xf32>
    %76 = arith.divf %74, %75 : vector<8x1xf32>
    %77 = arith.mulf %41, %41 : vector<8x32xf32>
    %cst_38 = arith.constant dense<0.000000e+00> : vector<8xf32>
    %78 = vector.multi_reduction <add>, %77, %cst_38 [1] : vector<8x32xf32> to vector<8xf32>
    %79 = vector.shape_cast %78 : vector<8xf32> to vector<8x1xf32>
    %cst_39 = arith.constant 3.200000e+01 : f32
    %80 = vector.broadcast %cst_39 : f32 to vector<8x1xf32>
    %81 = arith.divf %79, %80 : vector<8x1xf32>
    %82 = arith.mulf %76, %76 : vector<8x1xf32>
    %83 = arith.subf %81, %82 : vector<8x1xf32>
    %cst_40 = arith.constant 0.000000e+00 : f32
    %84 = vector.broadcast %cst_40 : f32 to vector<8x1xf32>
    %85 = arith.maximumf %83, %84 : vector<8x1xf32>
    %86 = vector.broadcast %76 : vector<8x1xf32> to vector<8x32xf32>
    %87 = arith.subf %41, %86 : vector<8x32xf32>
    %cst_41 = arith.constant 9.99999997E-7 : f32
    %88 = vector.broadcast %cst_41 : f32 to vector<8x1xf32>
    %89 = arith.addf %85, %88 : vector<8x1xf32>
    %90 = math.rsqrt %89 : vector<8x1xf32>
    %91 = vector.broadcast %90 : vector<8x1xf32> to vector<8x32xf32>
    %92 = arith.mulf %87, %91 : vector<8x32xf32>
    %c0_42 = arith.constant 0 : index
    %c0_43 = arith.constant 0 : index
    %c0_44 = arith.constant 0 : index
    %93 = vector.load %arg9[%c0_42, %c0_43, %c0_44] : memref<1x1x32xf32, #tpu.memory_space<vmem>>, vector<1x1x32xf32>
    %94 = vector.shape_cast %93 : vector<1x1x32xf32> to vector<1x32xf32>
    %95 = vector.broadcast %94 : vector<1x32xf32> to vector<8x32xf32>
    %96 = arith.mulf %92, %95 : vector<8x32xf32>
    %c0_45 = arith.constant 0 : index
    %c0_46 = arith.constant 0 : index
    %c0_47 = arith.constant 0 : index
    %97 = vector.load %arg10[%c0_45, %c0_46, %c0_47] : memref<1x1x32xf32, #tpu.memory_space<vmem>>, vector<1x1x32xf32>
    %98 = vector.shape_cast %97 : vector<1x1x32xf32> to vector<1x32xf32>
    %99 = vector.broadcast %98 : vector<1x32xf32> to vector<8x32xf32>
    %100 = arith.addf %96, %99 : vector<8x32xf32>
    %101 = arith.truncf %72 : vector<8x32xf32> to vector<8x32xbf16>
    %c0_48 = arith.constant 0 : index
    %c0_49 = arith.constant 0 : index
    %c0_50 = arith.constant 0 : index
    %102 = vector.load %arg11[%c0_48, %c0_49, %c0_50] : memref<1x8x32xbf16, #tpu.memory_space<vmem>>, vector<1x8x32xbf16>
    %103 = vector.shape_cast %102 : vector<1x8x32xbf16> to vector<8x32xbf16>
    %104 = vector.shape_cast %101 : vector<8x32xbf16> to vector<1x8x32xbf16>
    tpu.vector_store %arg11[%c0_48, %c0_49, %c0_50], %104 {strides = array<i32>} : memref<1x8x32xbf16, #tpu.memory_space<vmem>>, vector<1x8x32xbf16>,
    %105 = arith.truncf %100 : vector<8x32xf32> to vector<8x32xbf16>
    %c0_51 = arith.constant 0 : index
    %c0_52 = arith.constant 0 : index
    %c0_53 = arith.constant 0 : index
    %106 = vector.load %arg12[%c0_51, %c0_52, %c0_53] : memref<1x8x32xbf16, #tpu.memory_space<vmem>>, vector<1x8x32xbf16>
    %107 = vector.shape_cast %106 : vector<1x8x32xbf16> to vector<8x32xbf16>
    %108 = vector.shape_cast %105 : vector<8x32xbf16> to vector<1x8x32xbf16>
    tpu.vector_store %arg12[%c0_51, %c0_52, %c0_53], %108 {strides = array<i32>} : memref<1x8x32xbf16, #tpu.memory_space<vmem>>, vector<1x8x32xbf16>,
    %109 = arith.truncf %42 : vector<8x32xf32> to vector<8x32xbf16>
    %c0_54 = arith.constant 0 : index
    %c0_55 = arith.constant 0 : index
    %c0_56 = arith.constant 0 : index
    %110 = vector.load %arg13[%c0_54, %c0_55, %c0_56] : memref<1x8x32xbf16, #tpu.memory_space<vmem>>, vector<1x8x32xbf16>
    %111 = vector.shape_cast %110 : vector<1x8x32xbf16> to vector<8x32xbf16>
    %112 = vector.shape_cast %109 : vector<8x32xbf16> to vector<1x8x32xbf16>
    tpu.vector_store %arg13[%c0_54, %c0_55, %c0_56], %112 {strides = array<i32>} : memref<1x8x32xbf16, #tpu.memory_space<vmem>>, vector<1x8x32xbf16>,
    return
  }
  func.func @transform_0(%arg0: i32, %arg1: i32) -> (i32, i32, i32) {
    %c0_i32 = arith.constant 0 : i32
    %c0_i32_0 = arith.constant 0 : i32
    return %arg1, %arg0, %c0_i32 : i32, i32, i32
  }
  func.func @transform_1(%arg0: i32, %arg1: i32) -> (i32, i32, i32, i32) {
    %c1_i32 = arith.constant 1 : i32
    %0 = arith.cmpi slt, %arg0, %c1_i32 : i32
    %c0_i32 = arith.constant 0 : i32
    %c1_i32_0 = arith.constant 1 : i32
    %1 = arith.select %0, %c0_i32, %c1_i32_0 : i32
    %c0_i32_1 = arith.constant 0 : i32
    %c0_i32_2 = arith.constant 0 : i32
    %c0_i32_3 = arith.constant 0 : i32
    return %1, %arg1, %c0_i32_1, %c0_i32_2 : i32, i32, i32, i32
  }
  func.func @transform_2(%arg0: i32, %arg1: i32) -> (i32, i32, i32, i32) {
    %c1_i32 = arith.constant 1 : i32
    %0 = arith.cmpi slt, %arg0, %c1_i32 : i32
    %c0_i32 = arith.constant 0 : i32
    %c1_i32_0 = arith.constant 1 : i32
    %1 = arith.select %0, %c0_i32, %c1_i32_0 : i32
    %c0_i32_1 = arith.constant 0 : i32
    %c0_i32_2 = arith.constant 0 : i32
    %c0_i32_3 = arith.constant 0 : i32
    return %1, %arg1, %c0_i32_1, %c0_i32_2 : i32, i32, i32, i32
  }
  func.func @transform_3(%arg0: i32, %arg1: i32) -> (i32, i32, i32) {
    %c1_i32 = arith.constant 1 : i32
    %0 = arith.cmpi slt, %arg0, %c1_i32 : i32
    %c0_i32 = arith.constant 0 : i32
    %c1_i32_0 = arith.constant 1 : i32
    %1 = arith.select %0, %c0_i32, %c1_i32_0 : i32
    %c0_i32_1 = arith.constant 0 : i32
    %c0_i32_2 = arith.constant 0 : i32
    %c0_i32_3 = arith.constant 0 : i32
    return %1, %c0_i32_1, %c0_i32_2 : i32, i32, i32
  }
  func.func @transform_4(%arg0: i32, %arg1: i32) -> (i32, i32, i32) {
    %c1_i32 = arith.constant 1 : i32
    %0 = arith.cmpi slt, %arg0, %c1_i32 : i32
    %c0_i32 = arith.constant 0 : i32
    %c1_i32_0 = arith.constant 1 : i32
    %1 = arith.select %0, %c0_i32, %c1_i32_0 : i32
    %c0_i32_1 = arith.constant 0 : i32
    %c0_i32_2 = arith.constant 0 : i32
    %c0_i32_3 = arith.constant 0 : i32
    return %1, %c0_i32_1, %c0_i32_2 : i32, i32, i32
  }
  func.func @transform_5(%arg0: i32, %arg1: i32) -> (i32, i32, i32) {
    %c1_i32 = arith.constant 1 : i32
    %0 = arith.cmpi slt, %arg0, %c1_i32 : i32
    %c0_i32 = arith.constant 0 : i32
    %c1_i32_0 = arith.constant 1 : i32
    %1 = arith.select %0, %c0_i32, %c1_i32_0 : i32
    %c0_i32_1 = arith.constant 0 : i32
    %c0_i32_2 = arith.constant 0 : i32
    %c0_i32_3 = arith.constant 0 : i32
    return %1, %c0_i32_1, %c0_i32_2 : i32, i32, i32
  }
  func.func @transform_6(%arg0: i32, %arg1: i32) -> (i32, i32, i32) {
    %c1_i32 = arith.constant 1 : i32
    %0 = arith.cmpi slt, %arg0, %c1_i32 : i32
    %c0_i32 = arith.constant 0 : i32
    %c1_i32_0 = arith.constant 1 : i32
    %1 = arith.select %0, %c0_i32, %c1_i32_0 : i32
    %c0_i32_1 = arith.constant 0 : i32
    %c0_i32_2 = arith.constant 0 : i32
    %c0_i32_3 = arith.constant 0 : i32
    return %1, %c0_i32_1, %c0_i32_2 : i32, i32, i32
  }
  func.func @transform_7(%arg0: i32, %arg1: i32) -> (i32, i32, i32) {
    %c1_i32 = arith.constant 1 : i32
    %0 = arith.cmpi slt, %arg0, %c1_i32 : i32
    %c0_i32 = arith.constant 0 : i32
    %c1_i32_0 = arith.constant 1 : i32
    %1 = arith.select %0, %c0_i32, %c1_i32_0 : i32
    %c0_i32_1 = arith.constant 0 : i32
    %c0_i32_2 = arith.constant 0 : i32
    %c0_i32_3 = arith.constant 0 : i32
    return %1, %c0_i32_1, %c0_i32_2 : i32, i32, i32
  }
  func.func @transform_8(%arg0: i32, %arg1: i32) -> (i32, i32, i32) {
    %c1_i32 = arith.constant 1 : i32
    %0 = arith.cmpi slt, %arg0, %c1_i32 : i32
    %c0_i32 = arith.constant 0 : i32
    %c1_i32_0 = arith.constant 1 : i32
    %1 = arith.select %0, %c0_i32, %c1_i32_0 : i32
    %c0_i32_1 = arith.constant 0 : i32
    %c0_i32_2 = arith.constant 0 : i32
    %c0_i32_3 = arith.constant 0 : i32
    return %1, %c0_i32_1, %c0_i32_2 : i32, i32, i32
  }
  func.func @transform_9(%arg0: i32, %arg1: i32) -> (i32, i32, i32) {
    %c0_i32 = arith.constant 0 : i32
    %c0_i32_0 = arith.constant 0 : i32
    return %arg1, %arg0, %c0_i32 : i32, i32, i32
  }
  func.func @transform_10(%arg0: i32, %arg1: i32) -> (i32, i32, i32) {
    %c0_i32 = arith.constant 0 : i32
    %c0_i32_0 = arith.constant 0 : i32
    return %arg1, %arg0, %c0_i32 : i32, i32, i32
  }
  func.func @transform_11(%arg0: i32, %arg1: i32) -> (i32, i32, i32) {
    %c0_i32 = arith.constant 0 : i32
    %c0_i32_0 = arith.constant 0 : i32
    return %arg1, %arg0, %c0_i32 : i32, i32, i32
  }
}

module attributes {stable_mosaic.version = 11 : i64} {
  func.func @_post_attn_kernel(%arg0: i32, %arg1: i32, %arg2: i32, %arg3: memref<1x8x32xbf16, #tpu.memory_space<vmem>>, %arg4: memref<1x8x32xf32, #tpu.memory_space<vmem>>, %arg5: memref<1x1x1x32xf32, #tpu.memory_space<vmem>>, %arg6: memref<1x1x1x32xf32, #tpu.memory_space<vmem>>, %arg7: memref<1x1x1x32xf32, #tpu.memory_space<vmem>>, %arg8: memref<1x1x1x32xf32, #tpu.memory_space<vmem>>, %arg9: memref<1x32x32xbf16, #tpu.memory_space<vmem>>, %arg10: memref<1x1x32xf32, #tpu.memory_space<vmem>>, %arg11: memref<1x32x128xbf16, #tpu.memory_space<vmem>>, %arg12: memref<1x1x128xf32, #tpu.memory_space<vmem>>, %arg13: memref<1x128x32xbf16, #tpu.memory_space<vmem>>, %arg14: memref<1x1x32xf32, #tpu.memory_space<vmem>>, %arg15: memref<1x8x32xf32, #tpu.memory_space<vmem>>, %arg16: memref<8x32xbf16, #tpu.memory_space<vmem>>, %arg17: memref<8x32xf32, #tpu.memory_space<vmem>>) attributes {dimension_semantics = [#tpu.dimension_semantics<parallel>, #tpu.dimension_semantics<parallel>, #tpu.dimension_semantics<arbitrary>], iteration_bounds = array<i64: 2, 2, 1>, scalar_prefetch = 0 : i64, scratch_operands = 2 : i64, tpu.core_type = #tpu.core_type<tc>, window_params = [{transform_indices = @transform_0, window_bounds = array<i64: 1, 8, 32>}, {transform_indices = @transform_1, window_bounds = array<i64: 1, 8, 32>}, {transform_indices = @transform_2, window_bounds = array<i64: 1, 1, 1, 32>}, {transform_indices = @transform_3, window_bounds = array<i64: 1, 1, 1, 32>}, {transform_indices = @transform_4, window_bounds = array<i64: 1, 1, 1, 32>}, {transform_indices = @transform_5, window_bounds = array<i64: 1, 1, 1, 32>}, {pipeline_mode = #tpu.pipeline_mode<synchronous>, transform_indices = @transform_6, window_bounds = array<i64: 1, 32, 32>}, {pipeline_mode = #tpu.pipeline_mode<synchronous>, transform_indices = @transform_7, window_bounds = array<i64: 1, 1, 32>}, {transform_indices = @transform_8, window_bounds = array<i64: 1, 32, 128>}, {transform_indices = @transform_9, window_bounds = array<i64: 1, 1, 128>}, {transform_indices = @transform_10, window_bounds = array<i64: 1, 128, 32>}, {pipeline_mode = #tpu.pipeline_mode<synchronous>, transform_indices = @transform_11, window_bounds = array<i64: 1, 1, 32>}, {transform_indices = @transform_12, window_bounds = array<i64: 1, 8, 32>}]} {
    %c0_i32 = arith.constant 0 : i32
    %0 = arith.cmpi eq, %arg2, %c0_i32 : i32
    %1 = arith.extui %0 : i1 to i32
    %c0_i32_0 = arith.constant 0 : i32
    %2 = arith.cmpi ne, %1, %c0_i32_0 : i32
    scf.if %2 {
      %c0_22 = arith.constant 0 : index
      %c0_23 = arith.constant 0 : index
      %c0_24 = arith.constant 0 : index
      %34 = vector.load %arg3[%c0_22, %c0_23, %c0_24] : memref<1x8x32xbf16, #tpu.memory_space<vmem>>, vector<1x8x32xbf16>
      %35 = vector.shape_cast %34 : vector<1x8x32xbf16> to vector<8x32xbf16>
      %c0_25 = arith.constant 0 : index
      %c0_26 = arith.constant 0 : index
      %c0_27 = arith.constant 0 : index
      %36 = vector.load %arg4[%c0_25, %c0_26, %c0_27] : memref<1x8x32xf32, #tpu.memory_space<vmem>>, vector<1x8x32xf32>
      %37 = vector.shape_cast %36 : vector<1x8x32xf32> to vector<8x32xf32>
      %c0_28 = arith.constant 0 : index
      %c0_29 = arith.constant 0 : index
      %c0_30 = arith.constant 0 : index
      %38 = vector.load %arg9[%c0_28, %c0_29, %c0_30] : memref<1x32x32xbf16, #tpu.memory_space<vmem>>, vector<1x32x32xbf16>
      %39 = vector.shape_cast %38 : vector<1x32x32xbf16> to vector<32x32xbf16>
      %cst_31 = arith.constant dense<0.000000e+00> : vector<8x32xf32>
      %40 = tpu.matmul %35, %39, %cst_31 {dimension_numbers = #tpu.dot_dimension_numbers<[1], [0], [0], [1], [0, 0, 1, 1], [], []>} : vector<8x32xbf16>, vector<32x32xbf16>, vector<8x32xf32> -> vector<8x32xf32>
      %c0_32 = arith.constant 0 : index
      %c0_33 = arith.constant 0 : index
      %c0_34 = arith.constant 0 : index
      %41 = vector.load %arg10[%c0_32, %c0_33, %c0_34] : memref<1x1x32xf32, #tpu.memory_space<vmem>>, vector<1x1x32xf32>
      %42 = vector.shape_cast %41 : vector<1x1x32xf32> to vector<1x32xf32>
      %43 = vector.broadcast %42 : vector<1x32xf32> to vector<8x32xf32>
      %44 = arith.addf %40, %43 : vector<8x32xf32>
      %c0_35 = arith.constant 0 : index
      %c0_36 = arith.constant 0 : index
      %c0_37 = arith.constant 0 : index
      %c0_38 = arith.constant 0 : index
      %45 = vector.load %arg5[%c0_35, %c0_36, %c0_37, %c0_38] : memref<1x1x1x32xf32, #tpu.memory_space<vmem>>, vector<1x1x1x32xf32>
      %46 = vector.shape_cast %45 : vector<1x1x1x32xf32> to vector<1x32xf32>
      %47 = vector.broadcast %46 : vector<1x32xf32> to vector<8x32xf32>
      %48 = arith.mulf %44, %47 : vector<8x32xf32>
      %49 = arith.addf %37, %48 : vector<8x32xf32>
      %cst_39 = arith.constant dense<0.000000e+00> : vector<8xf32>
      %50 = vector.multi_reduction <add>, %49, %cst_39 [1] : vector<8x32xf32> to vector<8xf32>
      %51 = vector.shape_cast %50 : vector<8xf32> to vector<8x1xf32>
      %cst_40 = arith.constant 3.200000e+01 : f32
      %52 = vector.broadcast %cst_40 : f32 to vector<8x1xf32>
      %53 = arith.divf %51, %52 : vector<8x1xf32>
      %54 = arith.mulf %49, %49 : vector<8x32xf32>
      %cst_41 = arith.constant dense<0.000000e+00> : vector<8xf32>
      %55 = vector.multi_reduction <add>, %54, %cst_41 [1] : vector<8x32xf32> to vector<8xf32>
      %56 = vector.shape_cast %55 : vector<8xf32> to vector<8x1xf32>
      %cst_42 = arith.constant 3.200000e+01 : f32
      %57 = vector.broadcast %cst_42 : f32 to vector<8x1xf32>
      %58 = arith.divf %56, %57 : vector<8x1xf32>
      %59 = arith.mulf %53, %53 : vector<8x1xf32>
      %60 = arith.subf %58, %59 : vector<8x1xf32>
      %cst_43 = arith.constant 0.000000e+00 : f32
      %61 = vector.broadcast %cst_43 : f32 to vector<8x1xf32>
      %62 = arith.maximumf %60, %61 : vector<8x1xf32>
      %63 = vector.broadcast %53 : vector<8x1xf32> to vector<8x32xf32>
      %64 = arith.subf %49, %63 : vector<8x32xf32>
      %cst_44 = arith.constant 9.99999997E-7 : f32
      %65 = vector.broadcast %cst_44 : f32 to vector<8x1xf32>
      %66 = arith.addf %62, %65 : vector<8x1xf32>
      %67 = math.rsqrt %66 : vector<8x1xf32>
      %68 = vector.broadcast %67 : vector<8x1xf32> to vector<8x32xf32>
      %69 = arith.mulf %64, %68 : vector<8x32xf32>
      %c0_45 = arith.constant 0 : index
      %c0_46 = arith.constant 0 : index
      %c0_47 = arith.constant 0 : index
      %c0_48 = arith.constant 0 : index
      %70 = vector.load %arg7[%c0_45, %c0_46, %c0_47, %c0_48] : memref<1x1x1x32xf32, #tpu.memory_space<vmem>>, vector<1x1x1x32xf32>
      %71 = vector.shape_cast %70 : vector<1x1x1x32xf32> to vector<1x32xf32>
      %cst_49 = arith.constant 1.000000e+00 : f32
      %72 = vector.broadcast %cst_49 : f32 to vector<1x32xf32>
      %73 = arith.addf %72, %71 : vector<1x32xf32>
      %74 = vector.broadcast %73 : vector<1x32xf32> to vector<8x32xf32>
      %75 = arith.mulf %69, %74 : vector<8x32xf32>
      %c0_50 = arith.constant 0 : index
      %c0_51 = arith.constant 0 : index
      %c0_52 = arith.constant 0 : index
      %c0_53 = arith.constant 0 : index
      %76 = vector.load %arg6[%c0_50, %c0_51, %c0_52, %c0_53] : memref<1x1x1x32xf32, #tpu.memory_space<vmem>>, vector<1x1x1x32xf32>
      %77 = vector.shape_cast %76 : vector<1x1x1x32xf32> to vector<1x32xf32>
      %78 = vector.broadcast %77 : vector<1x32xf32> to vector<8x32xf32>
      %79 = arith.addf %75, %78 : vector<8x32xf32>
      %80 = arith.truncf %79 : vector<8x32xf32> to vector<8x32xbf16>
      %c0_54 = arith.constant 0 : index
      %c0_55 = arith.constant 0 : index
      %81 = vector.load %arg16[%c0_54, %c0_55] : memref<8x32xbf16, #tpu.memory_space<vmem>>, vector<8x32xbf16>
      tpu.vector_store %arg16[%c0_54, %c0_55], %80 {strides = array<i32>} : memref<8x32xbf16, #tpu.memory_space<vmem>>, vector<8x32xbf16>,
      %cst_56 = arith.constant 0.000000e+00 : f32
      %82 = vector.broadcast %cst_56 : f32 to vector<8x32xf32>
      %c0_57 = arith.constant 0 : index
      %c0_58 = arith.constant 0 : index
      %83 = vector.load %arg17[%c0_57, %c0_58] : memref<8x32xf32, #tpu.memory_space<vmem>>, vector<8x32xf32>
      tpu.vector_store %arg17[%c0_57, %c0_58], %82 {strides = array<i32>} : memref<8x32xf32, #tpu.memory_space<vmem>>, vector<8x32xf32>,
    } else {
    }
    %c0 = arith.constant 0 : index
    %c0_1 = arith.constant 0 : index
    %3 = vector.load %arg16[%c0, %c0_1] : memref<8x32xbf16, #tpu.memory_space<vmem>>, vector<8x32xbf16>
    %c0_2 = arith.constant 0 : index
    %c0_3 = arith.constant 0 : index
    %c0_4 = arith.constant 0 : index
    %4 = vector.load %arg11[%c0_2, %c0_3, %c0_4] : memref<1x32x128xbf16, #tpu.memory_space<vmem>>, vector<1x32x128xbf16>
    %5 = vector.shape_cast %4 : vector<1x32x128xbf16> to vector<32x128xbf16>
    %cst = arith.constant dense<0.000000e+00> : vector<8x128xf32>
    %6 = tpu.matmul %3, %5, %cst {dimension_numbers = #tpu.dot_dimension_numbers<[1], [0], [0], [1], [0, 0, 1, 1], [], []>} : vector<8x32xbf16>, vector<32x128xbf16>, vector<8x128xf32> -> vector<8x128xf32>
    %c0_5 = arith.constant 0 : index
    %c0_6 = arith.constant 0 : index
    %c0_7 = arith.constant 0 : index
    %7 = vector.load %arg12[%c0_5, %c0_6, %c0_7] : memref<1x1x128xf32, #tpu.memory_space<vmem>>, vector<1x1x128xf32>
    %8 = vector.shape_cast %7 : vector<1x1x128xf32> to vector<1x128xf32>
    %9 = vector.broadcast %8 : vector<1x128xf32> to vector<8x128xf32>
    %10 = arith.addf %6, %9 : vector<8x128xf32>
    %cst_8 = arith.constant 5.000000e-01 : f32
    %11 = vector.broadcast %cst_8 : f32 to vector<8x128xf32>
    %12 = arith.mulf %11, %10 : vector<8x128xf32>
    %cst_9 = arith.constant 4.471500e-02 : f32
    %13 = vector.broadcast %cst_9 : f32 to vector<8x128xf32>
    %14 = arith.mulf %13, %10 : vector<8x128xf32>
    %15 = arith.mulf %14, %10 : vector<8x128xf32>
    %16 = arith.mulf %15, %10 : vector<8x128xf32>
    %17 = arith.addf %10, %16 : vector<8x128xf32>
    %cst_10 = arith.constant 0.797884583 : f32
    %18 = vector.broadcast %cst_10 : f32 to vector<8x128xf32>
    %19 = arith.mulf %18, %17 : vector<8x128xf32>
    %20 = math.tanh %19 : vector<8x128xf32>
    %cst_11 = arith.constant 1.000000e+00 : f32
    %21 = vector.broadcast %cst_11 : f32 to vector<8x128xf32>
    %22 = arith.addf %21, %20 : vector<8x128xf32>
    %23 = arith.mulf %12, %22 : vector<8x128xf32>
    %c0_12 = arith.constant 0 : index
    %c0_13 = arith.constant 0 : index
    %24 = vector.load %arg17[%c0_12, %c0_13] : memref<8x32xf32, #tpu.memory_space<vmem>>, vector<8x32xf32>
    %25 = arith.truncf %23 : vector<8x128xf32> to vector<8x128xbf16>
    %c0_14 = arith.constant 0 : index
    %c0_15 = arith.constant 0 : index
    %c0_16 = arith.constant 0 : index
    %26 = vector.load %arg13[%c0_14, %c0_15, %c0_16] : memref<1x128x32xbf16, #tpu.memory_space<vmem>>, vector<1x128x32xbf16>
    %27 = vector.shape_cast %26 : vector<1x128x32xbf16> to vector<128x32xbf16>
    %cst_17 = arith.constant dense<0.000000e+00> : vector<8x32xf32>
    %28 = tpu.matmul %25, %27, %cst_17 {dimension_numbers = #tpu.dot_dimension_numbers<[1], [0], [0], [1], [0, 0, 1, 1], [], []>} : vector<8x128xbf16>, vector<128x32xbf16>, vector<8x32xf32> -> vector<8x32xf32>
    %29 = arith.addf %24, %28 : vector<8x32xf32>
    %c0_18 = arith.constant 0 : index
    %c0_19 = arith.constant 0 : index
    %30 = vector.load %arg17[%c0_18, %c0_19] : memref<8x32xf32, #tpu.memory_space<vmem>>, vector<8x32xf32>
    tpu.vector_store %arg17[%c0_18, %c0_19], %29 {strides = array<i32>} : memref<8x32xf32, #tpu.memory_space<vmem>>, vector<8x32xf32>,
    %c0_i32_20 = arith.constant 0 : i32
    %31 = arith.cmpi eq, %arg2, %c0_i32_20 : i32
    %32 = arith.extui %31 : i1 to i32
    %c0_i32_21 = arith.constant 0 : i32
    %33 = arith.cmpi ne, %32, %c0_i32_21 : i32
    scf.if %33 {
      %c0_22 = arith.constant 0 : index
      %c0_23 = arith.constant 0 : index
      %34 = vector.load %arg17[%c0_22, %c0_23] : memref<8x32xf32, #tpu.memory_space<vmem>>, vector<8x32xf32>
      %c0_24 = arith.constant 0 : index
      %c0_25 = arith.constant 0 : index
      %c0_26 = arith.constant 0 : index
      %35 = vector.load %arg14[%c0_24, %c0_25, %c0_26] : memref<1x1x32xf32, #tpu.memory_space<vmem>>, vector<1x1x32xf32>
      %36 = vector.shape_cast %35 : vector<1x1x32xf32> to vector<1x32xf32>
      %37 = vector.broadcast %36 : vector<1x32xf32> to vector<8x32xf32>
      %38 = arith.addf %34, %37 : vector<8x32xf32>
      %c0_27 = arith.constant 0 : index
      %c0_28 = arith.constant 0 : index
      %c0_29 = arith.constant 0 : index
      %39 = vector.load %arg4[%c0_27, %c0_28, %c0_29] : memref<1x8x32xf32, #tpu.memory_space<vmem>>, vector<1x8x32xf32>
      %40 = vector.shape_cast %39 : vector<1x8x32xf32> to vector<8x32xf32>
      %c0_30 = arith.constant 0 : index
      %c0_31 = arith.constant 0 : index
      %c0_32 = arith.constant 0 : index
      %c0_33 = arith.constant 0 : index
      %41 = vector.load %arg8[%c0_30, %c0_31, %c0_32, %c0_33] : memref<1x1x1x32xf32, #tpu.memory_space<vmem>>, vector<1x1x1x32xf32>
      %42 = vector.shape_cast %41 : vector<1x1x1x32xf32> to vector<1x32xf32>
      %43 = vector.broadcast %42 : vector<1x32xf32> to vector<8x32xf32>
      %44 = arith.mulf %38, %43 : vector<8x32xf32>
      %45 = arith.addf %40, %44 : vector<8x32xf32>
      %c0_34 = arith.constant 0 : index
      %c0_35 = arith.constant 0 : index
      %c0_36 = arith.constant 0 : index
      %46 = vector.load %arg15[%c0_34, %c0_35, %c0_36] : memref<1x8x32xf32, #tpu.memory_space<vmem>>, vector<1x8x32xf32>
      %47 = vector.shape_cast %46 : vector<1x8x32xf32> to vector<8x32xf32>
      %48 = vector.shape_cast %45 : vector<8x32xf32> to vector<1x8x32xf32>
      tpu.vector_store %arg15[%c0_34, %c0_35, %c0_36], %48 {strides = array<i32>} : memref<1x8x32xf32, #tpu.memory_space<vmem>>, vector<1x8x32xf32>,
    } else {
    }
    return
  }
  func.func @transform_0(%arg0: i32, %arg1: i32, %arg2: i32) -> (i32, i32, i32) {
    %c0_i32 = arith.constant 0 : i32
    %c0_i32_0 = arith.constant 0 : i32
    return %arg1, %arg0, %c0_i32 : i32, i32, i32
  }
  func.func @transform_1(%arg0: i32, %arg1: i32, %arg2: i32) -> (i32, i32, i32) {
    %c0_i32 = arith.constant 0 : i32
    %c0_i32_0 = arith.constant 0 : i32
    return %arg1, %arg0, %c0_i32 : i32, i32, i32
  }
  func.func @transform_2(%arg0: i32, %arg1: i32, %arg2: i32) -> (i32, i32, i32, i32) {
    %c1_i32 = arith.constant 1 : i32
    %0 = arith.cmpi slt, %arg0, %c1_i32 : i32
    %c0_i32 = arith.constant 0 : i32
    %c1_i32_0 = arith.constant 1 : i32
    %1 = arith.select %0, %c0_i32, %c1_i32_0 : i32
    %c0_i32_1 = arith.constant 0 : i32
    %c0_i32_2 = arith.constant 0 : i32
    %c0_i32_3 = arith.constant 0 : i32
    return %1, %arg1, %c0_i32_1, %c0_i32_2 : i32, i32, i32, i32
  }
  func.func @transform_3(%arg0: i32, %arg1: i32, %arg2: i32) -> (i32, i32, i32, i32) {
    %c1_i32 = arith.constant 1 : i32
    %0 = arith.cmpi slt, %arg0, %c1_i32 : i32
    %c0_i32 = arith.constant 0 : i32
    %c1_i32_0 = arith.constant 1 : i32
    %1 = arith.select %0, %c0_i32, %c1_i32_0 : i32
    %c0_i32_1 = arith.constant 0 : i32
    %c0_i32_2 = arith.constant 0 : i32
    %c0_i32_3 = arith.constant 0 : i32
    return %1, %arg1, %c0_i32_1, %c0_i32_2 : i32, i32, i32, i32
  }
  func.func @transform_4(%arg0: i32, %arg1: i32, %arg2: i32) -> (i32, i32, i32, i32) {
    %c1_i32 = arith.constant 1 : i32
    %0 = arith.cmpi slt, %arg0, %c1_i32 : i32
    %c0_i32 = arith.constant 0 : i32
    %c1_i32_0 = arith.constant 1 : i32
    %1 = arith.select %0, %c0_i32, %c1_i32_0 : i32
    %c0_i32_1 = arith.constant 0 : i32
    %c0_i32_2 = arith.constant 0 : i32
    %c0_i32_3 = arith.constant 0 : i32
    return %1, %arg1, %c0_i32_1, %c0_i32_2 : i32, i32, i32, i32
  }
  func.func @transform_5(%arg0: i32, %arg1: i32, %arg2: i32) -> (i32, i32, i32, i32) {
    %c1_i32 = arith.constant 1 : i32
    %0 = arith.cmpi slt, %arg0, %c1_i32 : i32
    %c0_i32 = arith.constant 0 : i32
    %c1_i32_0 = arith.constant 1 : i32
    %1 = arith.select %0, %c0_i32, %c1_i32_0 : i32
    %c0_i32_1 = arith.constant 0 : i32
    %c0_i32_2 = arith.constant 0 : i32
    %c0_i32_3 = arith.constant 0 : i32
    return %1, %arg1, %c0_i32_1, %c0_i32_2 : i32, i32, i32, i32
  }
  func.func @transform_6(%arg0: i32, %arg1: i32, %arg2: i32) -> (i32, i32, i32) {
    %c1_i32 = arith.constant 1 : i32
    %0 = arith.cmpi slt, %arg0, %c1_i32 : i32
    %c0_i32 = arith.constant 0 : i32
    %c1_i32_0 = arith.constant 1 : i32
    %1 = arith.select %0, %c0_i32, %c1_i32_0 : i32
    %c0_i32_1 = arith.constant 0 : i32
    %c0_i32_2 = arith.constant 0 : i32
    %c0_i32_3 = arith.constant 0 : i32
    return %1, %c0_i32_1, %c0_i32_2 : i32, i32, i32
  }
  func.func @transform_7(%arg0: i32, %arg1: i32, %arg2: i32) -> (i32, i32, i32) {
    %c1_i32 = arith.constant 1 : i32
    %0 = arith.cmpi slt, %arg0, %c1_i32 : i32
    %c0_i32 = arith.constant 0 : i32
    %c1_i32_0 = arith.constant 1 : i32
    %1 = arith.select %0, %c0_i32, %c1_i32_0 : i32
    %c0_i32_1 = arith.constant 0 : i32
    %c0_i32_2 = arith.constant 0 : i32
    %c0_i32_3 = arith.constant 0 : i32
    return %1, %c0_i32_1, %c0_i32_2 : i32, i32, i32
  }
  func.func @transform_8(%arg0: i32, %arg1: i32, %arg2: i32) -> (i32, i32, i32) {
    %c1_i32 = arith.constant 1 : i32
    %0 = arith.cmpi slt, %arg0, %c1_i32 : i32
    %c0_i32 = arith.constant 0 : i32
    %c1_i32_0 = arith.constant 1 : i32
    %1 = arith.select %0, %c0_i32, %c1_i32_0 : i32
    %c0_i32_1 = arith.constant 0 : i32
    %c0_i32_2 = arith.constant 0 : i32
    return %1, %c0_i32_1, %arg2 : i32, i32, i32
  }
  func.func @transform_9(%arg0: i32, %arg1: i32, %arg2: i32) -> (i32, i32, i32) {
    %c1_i32 = arith.constant 1 : i32
    %0 = arith.cmpi slt, %arg0, %c1_i32 : i32
    %c0_i32 = arith.constant 0 : i32
    %c1_i32_0 = arith.constant 1 : i32
    %1 = arith.select %0, %c0_i32, %c1_i32_0 : i32
    %c0_i32_1 = arith.constant 0 : i32
    %c0_i32_2 = arith.constant 0 : i32
    return %1, %c0_i32_1, %arg2 : i32, i32, i32
  }
  func.func @transform_10(%arg0: i32, %arg1: i32, %arg2: i32) -> (i32, i32, i32) {
    %c1_i32 = arith.constant 1 : i32
    %0 = arith.cmpi slt, %arg0, %c1_i32 : i32
    %c0_i32 = arith.constant 0 : i32
    %c1_i32_0 = arith.constant 1 : i32
    %1 = arith.select %0, %c0_i32, %c1_i32_0 : i32
    %c0_i32_1 = arith.constant 0 : i32
    %c0_i32_2 = arith.constant 0 : i32
    return %1, %arg2, %c0_i32_1 : i32, i32, i32
  }
  func.func @transform_11(%arg0: i32, %arg1: i32, %arg2: i32) -> (i32, i32, i32) {
    %c1_i32 = arith.constant 1 : i32
    %0 = arith.cmpi slt, %arg0, %c1_i32 : i32
    %c0_i32 = arith.constant 0 : i32
    %c1_i32_0 = arith.constant 1 : i32
    %1 = arith.select %0, %c0_i32, %c1_i32_0 : i32
    %c0_i32_1 = arith.constant 0 : i32
    %c0_i32_2 = arith.constant 0 : i32
    %c0_i32_3 = arith.constant 0 : i32
    return %1, %c0_i32_1, %c0_i32_2 : i32, i32, i32
  }
  func.func @transform_12(%arg0: i32, %arg1: i32, %arg2: i32) -> (i32, i32, i32) {
    %c0_i32 = arith.constant 0 : i32
    %c0_i32_0 = arith.constant 0 : i32
    return %arg1, %arg0, %c0_i32 : i32, i32, i32
  }
}

</mosaic_0001>

<bundles_post_ra>
// kernel: mmdit_group_forward.6
= control target key start
LH: loop header
LB: loop body
LE: loop exit
PB: predicated region body
PF: predicated region fallthrough
CT: control target
= control target key end

     0   :  { %s1770_s0 = inlined_call_operand.vmem [shape: f32[2,16,32], index: 0, kind: input, shape index: {}]   ;;  %s1771_s1 = inlined_call_operand.vmem [shape: f32[2,2,1,32], index: 1, kind: input, shape index: {}]   ;;  %s1772_s2 = inlined_call_operand.vmem [shape: f32[2,2,1,32], index: 2, kind: input, shape index: {}]   ;;  %s1773_s3 = inlined_call_operand.vmem [shape: bf16[2,32,96], index: 3, kind: input, shape index: {}]   ;;  %s1774_s4 = inlined_call_operand.vmem [shape: f32[2,1,96], index: 4, kind: input, shape index: {}]   ;;  %s1775_s5 = inlined_call_operand.hbm [shape: f32[2,1,32], index: 5, kind: input, shape index: {}]   ;;  %s1776_s6 = inlined_call_operand.vmem [shape: f32[2,1,32], index: 6, kind: input, shape index: {}]   ;;  %s1777_s7 = inlined_call_operand.hbm [shape: f32[2,1,32], index: 7, kind: input, shape index: {}]   ;;  %s1778_s8 = inlined_call_operand.hbm [shape: f32[2,1,32], index: 8, kind: input, shape index: {}]   ;;  %s1779_s9 = inlined_call_operand.vmem [shape: bf16[2,16,32], index: 9, kind: output, shape index: {0}]   ;;  %s1780_s10 = inlined_call_operand.vmem [shape: bf16[2,16,32], index: 10, kind: output, shape index: {1}]   ;;  %s1781_s11 = inlined_call_operand.vmem [shape: bf16[2,16,32], index: 11, kind: output, shape index: {2}]  }
   0x1   :  { %1786 = sst [smem:[#allocation14_spill]] %s1775_s5 }
   0x2   :  { %1787 = sst [smem:[#allocation15_spill]] %s1777_s7 }
   0x3   :  { %1788 = sst [smem:[#allocation16_spill]] %s1780_s10 }
   0x4   :  { %17 = vsyncpa [#allocation3], 0 }
   0x5   :  { %18 = vsyncpa [#allocation5], 0  ;;  %s1544_s17 = smov 0   ;;  %s1546_s18 = smov 0  }
   0x6   :  { %s1548_s19 = smov 0   ;;  %s1550_s20 = smov 0  }
   0x7   :  { %s1552_s21 = smov 0   ;;  %s1554_s22 = smov 0  }
   0x8   :  { %s1556_s23 = smov 0   ;;  %s1558_s24 = smov 0  }
   0x9 LB: > { %1789 = sst [smem:[#allocation9_spill]] %s1451_s18  ;;  %s1183_s25 = sadd.s32 4294967295, %s1475_s24   ;;  %s1475_s24 = sphi %s1558_s24, %s24_s24   ;;  %s1471_s23 = sphi %s1556_s23, %s1807_s23   ;;  %s1467_s22 = sphi %s1554_s22, %s1804_s22   ;;  %s1463_s21 = sphi %s1552_s21, %s1803_s21   ;;  %s1459_s20 = sphi %s1550_s20, %s1802_s20   ;;  %s1455_s19 = sphi %s1548_s19, %s1806_s19   ;;  %s1451_s18 = sphi %s1546_s18, %s1805_s18   ;;  %s1447_s17 = sphi %s1544_s17, %s1801_s17  }
   0xa   : > { %1790 = sst [smem:[#allocation10_spill]] %s1467_s22  ;;  %p212_p0 = scmp.ne.s32.totalorder %s1451_s18, %s1447_s17 }
   0xb   : > { %1791 = sst [smem:[#allocation11_spill]] %s1471_s23  ;;  %p213_p1 = scmp.eq.s32.totalorder %s1183_s25, 0 }
   0xc   : > { %1792 = sst [smem:[#allocation12_spill]] %s1475_s24  ;;  %p1185_p2 = scmp.ge.s32.totalorder %s1475_s24, 1 }
   0xd   : > { %p397_p3 = scmp.lt.s32.totalorder %s1475_s24, 5  ;;  %p428_p4 = scmp.ge.s32.totalorder %s1463_s21, 1 }
   0xe   : > { %p1587_p5 = por %p213_p1, %p212_p0  ;;  %s1477_s28 = smov [#allocation4]  }
   0xf   : > { %p1591_p6 = pnand %p1185_p2, %p397_p3  ;;  %s461_s29 = sshll.u32 %s1477_s28, 4  ;;  %s462_s29 = int_to_ptr.vmem [resolvable:$true] %s461_s29 }
  0x10   : > { %s1595_s30 = scalar_select %p428_p4, 1, 0 }
  0x11   : > { %p1220_p7 = pneg %p1591_p6  ;;  %s1795_s7 = sld [smem:[#allocation15_spill]] }
  0x12   : > { %s33_s17 = sadd.s32 1, %s1467_s22  ;;  %s36_s25 = sadd.s32 1, %s1471_s23 }
  0x13   : > { %p1605_p8 = pnand %p1220_p7, %p1587_p5  ;;  %p34_p9 = scmp.ge.s32.totalorder %s33_s17, 2 }
  0x14   : > { %p192_p10 = scmp.ge.s32.totalorder %s1471_s23, 1  ;;  %s199_s28 = sadd.s32 1, %s1455_s19 }
  0x15   : > { %s1809_s17 = smov (%p34_p9, %s33_s17), 0  ;;  %s1811_s25 = smov (!%p34_p9, %s36_s25), %s1471_s23 }
  0x16   : > { %1797 = sst [smem:[#allocation13_spill]] %s1809_s17  ;;  %p38_p11 = scmp.ge.s32.totalorder %s1811_s25, 2 }
  0x17   : > { %s457_s14 = scalar_lea.hbm %s1795_s7, %s1595_s30  ;;  %s1798_s5 = sld [smem:[#allocation14_spill]] }
  0x18   : > { %s459_s16 = sshll.u32 %s457_s14, 4  ;;  %s1813_s25 = smov (%p38_p11, %s1811_s25), 0  ;;  %s460_s16 = int_to_ptr.hbm [resolvable:$true] %s459_s16 }
  0x19   : > { %1226 = dma.hbm_to_vmem [thread:$0]  (!%p1605_p8), %s460_s16, 16, %s462_s29, [#allocation5]  }
  0x1a   : > { %s193_s12 = scalar_select %p192_p10, 1, 0 }
  0x1b   : > { %s1478_s29 = smov [#allocation2]   ;;  %p194_p12 = scmp.ge.s32.totalorder %s1813_s25, 1 }
  0x1c   : > { %s436_s16 = sshll.u32 %s1478_s29, 4  ;;  %s472_s24 = scalar_lea.hbm %s1778_s8, %s1595_s30  ;;  %s437_s16 = int_to_ptr.vmem [resolvable:$true] %s436_s16 }
  0x1d   : > { %s432_s18 = scalar_lea.hbm %s1798_s5, %s1595_s30  ;;  %s474_s13 = sshll.u32 %s472_s24, 4  ;;  %s475_s13 = int_to_ptr.hbm [resolvable:$true] %s474_s13 }
  0x1e   : > { %s434_s14 = sshll.u32 %s432_s18, 4  ;;  %s1479_s18 = smov [#allocation6]   ;;  %s435_s14 = int_to_ptr.hbm [resolvable:$true] %s434_s14 }
  0x1f   : > { %1223 = dma.hbm_to_vmem [thread:$0]  (!%p1605_p8), %s435_s14, 16, %s437_s16, [#allocation3]  }
  0x20   : > { %s195_s17 = scalar_select %p194_p12, 1, 0 }
  0x21   : > { %s476_s5 = sshll.u32 %s1479_s18, 4  ;;  %528 = sbr.rel (%p1591_p6) target bundleno = 702 (0x2be), region = 56  ;;  %s477_s5 = int_to_ptr.vmem [resolvable:$true] %s476_s5 }
  0x22   : > { %s196_s7 = ssub.s32 %s193_s12, %s195_s17 }
  0x23   : > { %p197_p13 = scmp.eq.s32.totalorder %s196_s7, 0 }
  0x24   : > { %1229 = dma.hbm_to_vmem [thread:$0]  (!%p1605_p8), %s475_s13, 16, %s477_s5, [#allocation5]  }
  0x25   : > { %s1632_s10 = scalar_select %p197_p13, %s1455_s19, %s199_s28  }
  0x26   : > { %1438 = dma.done.wait (%p1587_p5), [#allocation3], 16  }
  0x27   : > { %1440 = vsyncadd (%p1587_p5), [#allocation3], 4294967280 }
  0x28   : > { %1442 = dma.done.wait (%p1587_p5), [#allocation5], 32  }
  0x29   : > { %1444 = vsyncadd (%p1587_p5), [#allocation5], 4294967264  ;;  %p636_p0 = scmp.lt.s32.totalorder %s1459_s20, 1  ;;  %p638_p1 = scmp.lt.s32.totalorder %s1463_s21, 1  ;;  %vm723_vm0 = vcmask 261120   ;;  %v1480_v4 = vmov 32.0  }
  0x2a   : > { %p646_p2 = scmp.lt.s32.totalorder %s1595_s30, 1  ;;  %1307 = vrcp.f32 %v1480_v4  ;;  %v1302_v19 = vld [vmem:[#allocation4] ss:$0 sm:$0xff]  ;;  %s1482_s14 = smov 96   ;;  %v1304_v44 = vld [vmem:[#allocation6] ss:$0 sm:$0xff] }
  0x2b   : > { %s1815_s20 = smov (!%p636_p0, %s1459_s20), 1  ;;  %s1817_s21 = smov (!%p638_p1, %s1463_s21), 1  ;;  %vm885_vm5 = vcmask 257024  }
  0x2c   : > { %s1188_s5 = sshll.u32 %s1815_s20, 1  ;;  %s1819_s30 = smov (!%p646_p2, %s1595_s30), 1 }
  0x2d   : > { %s1650_s22 = sadd.s32 %s1188_s5, %s1817_s21  ;;  %s1190_s21 = sshll.u32 %s1819_s30, 1 }
  0x2e   : > { %s1189_s23 = sshll.u32 %s1650_s22, 3  ;;  %s1663_s15 = sadd.s32 %s1190_s21, %s1815_s20 }
  0x2f   : > { %s643_s26 = scalar_lea.vmem %s1770_s0, %s1189_s23  ;;  %s652_s12 = scalar_lea.vmem %s1771_s1, %s1663_s15 }
  0x30   : > { %v720_v0 = vld [vmem:[%s643_s26] sm:$0xff]  ;;  %s679_s16 = scalar_lea.vmem %s1774_s4, %s1819_s30  ;;  %v1308_v5 = vpop.eup %1307  ;;  %s1211_s7 = sshll.u32 %s1819_s30, 4 }
  0x31   : > { %v724_v1 = vsel %vm723_vm0, %v720_v0, 0.0  ;;  %v735_v2 = vmul.f32 %v720_v0, %v720_v0  ;;  %v728_v6 = vmul.f32 32.0, %v1308_v5  ;;  %s672_s20 = scalar_lea.vmem %s1773_s3, %s1211_s7  ;;  %vm732_vm1 = vweird.f32 %v1308_v5  ;;  %s1481_s5 = smov 32   ;;  %v1301_v34 = vld [vmem:[%s652_s12] ss:$0 sm:$0xff] }
  0x32   : > { %725 = vadd.xlane.f32.xlu0 %v724_v1  ;;  %v1213_v11 = vld [vmem:[%s672_s20 + $0x8] sm:$0xff]  ;;  %v1212_v13 = vld [vmem:[%s672_s20] sm:$0xff]  ;;  %s663_s27 = scalar_lea.vmem %s1772_s2, %s1663_s15  ;;  %s1483_s15 = smov 64  }
  0x33   : > { %v736_v3 = vsel %vm723_vm0, %v735_v2, 0.0  ;;  %v729_v7 = vsub.f32 1.0, %v728_v6  ;;  %795 = vmatpush.bf16.msra.mxu0 %v1213_v11  ;;  %v722_v25 = vld [vmem:[%s663_s27] sm:$0x1]  ;;  %s1709_s12 = sshll.u32 %s1650_s22, 2  ;;  %s688_s18 = scalar_lea.vmem %s1776_s6, %s1819_s30 }
  0x34   : > { %v756_v27 = vadd.f32 1.0, %v722_v25  ;;  %v1303_v38 = vld [vmem:[%s679_s16] ss:$0 sm:$0xff]  ;;  %s718_s7 = scalar_lea.vmem %s1781_s11, %s1709_s12  ;;  %s702_s27 = scalar_lea.vmem %s1779_s9, %s1709_s12 }
  0x35   : > { %v730_v8 = vmul.f32 %v1308_v5, %v729_v7  ;;  %s1799_s17 = sld [smem:[#allocation16_spill]] }
  0x36   : > { %v758_v31 = vperm.slane %v756_v27, 0  ;;  %v1306_v27 = vld [vmem:[%s688_s18] ss:$0 sm:$0xff] }
  0x37   : > { %v731_v9 = vadd.f32 %v1308_v5, %v730_v8  ;;  %796 = vmatpush.bf16.msra.mxu0 %v1212_v13 }
  0x39   : > { %v1677_v12 = vsel %vm732_vm1, %v1308_v5, %v731_v9 }
  0x3a   : > { %737 = vadd.xlane.f32.xlu0 %v736_v3 }
  0x3b   : > { %s710_s28 = scalar_lea.vmem %s1799_s17, %s1709_s12 }
  0x4e   : > { %873 = vrot.lane.b32.xlu0 %v1302_v19, %s1481_s5 }
  0xa5   : > { %v726_v10 = vpop.xlane.xlu0 %725 }
  0xa6   : > { %v734_v14 = vmul.f32 %v1677_v12, %v726_v10 }
  0xa8   : > { %v740_v16 = vmul.f32 %v734_v14, %v734_v14  ;;  %v743_v30 = vsub.f32 %v720_v0, %v734_v14 }
  0xad   : > { %v738_v15 = vpop.xlane.xlu0 %737 }
  0xae   : > { %v739_v17 = vmul.f32 %v738_v15, %v1677_v12 }
  0xb0   : > { %v741_v18 = vsub.f32 %v739_v17, %v740_v16 }
  0xb2   : > { %v742_v20 = vmax.f32 %v741_v18, 0.0 }
  0xb4   : > { %v744_v21 = vadd.f32 1e-06, %v742_v20 }
  0xb6   : > { %1309 = vrsqrt.f32 %v744_v21  ;;  %vm751_vm3 = vweird.f32 %v744_v21 }
  0xbc   : > { %v1310_v22 = vpop.eup %1309 }
  0xbd   : > { %v746_v23 = vmul.f32 %v1310_v22, %v744_v21  ;;  %vm752_vm2 = vweird.f32 %v1310_v22 }
  0xbe   : > { %vm753_vm4 = vmor %vm751_vm3, %vm752_vm2 }
  0xbf   : > { %v747_v24 = vmul.f32 %v1310_v22, %v746_v23 }
  0xc0   : > { %v874_v46 = vpop.permute.xlu0 %873 }
  0xc1   : > { %v748_v26 = vmul.f32 0.5, %v747_v24  ;;  %v1305_v24 = vld [vmem:[#allocation2] ss:$0 sm:$0xff] }
  0xc3   : > { %v749_v28 = vsub.f32 1.5, %v748_v26 }
  0xc5   : > { %v750_v29 = vmul.f32 %v1310_v22, %v749_v28 }
  0xc7   : > { %v754_v32 = vsel %vm753_vm4, %v1310_v22, %v750_v29 }
  0xc8   : > { %v755_v33 = vmul.f32 %v754_v32, %v743_v30 }
  0xca   : > { %v760_v35 = vmul.f32 %v758_v31, %v755_v33 }
  0xcc   : > { %v764_v36 = vadd.f32 %v1301_v34, %v760_v35 }
  0xce   : > { %v765_v37 = vpack.c.bf16 %v764_v36, %v764_v36 }
  0xd0   : > { %1208 = vmatmul.msk.bf16.vlgmr.msra.gmra.mxu0 %vm723_vm0, %v765_v37 }
 0x14d   : > { %v798_v39 = vpop.f32.mrf.mxu0 }
 0x14e   : > { %v1697_v40 = vadd.f32 %v1303_v38, %v798_v39 }
 0x150   : > { %839 = vrot.lane.b32.xlu1 %v1697_v40, %s1482_s14  ;;  %v893_v41 = vpack.c.bf16 %v1697_v40, %v1697_v40  ;;  %v806_v43 = vmul.f32 %v1697_v40, %v1697_v40  ;;  %v802_v52 = vsel %vm723_vm0, %v1697_v40, 0.0 }
 0x152   : > { %895 = vrot.lane.b32.xlu0 %v893_v41, %s1483_s15  ;;  %v807_v45 = vsel %vm723_vm0, %v806_v43, 0.0 }
 0x155   : > { %v800_v42 = vpop.f32.mrf.mxu0 }
 0x158   : > { %847 = vrot.lane.b32.xlu1 %v806_v43, %s1482_s14 }
 0x160   : > { %880 = vrot.lane.b32.xlu1 %v1304_v44, %s1481_s5 }
 0x18a   : > { %808 = vadd.xlane.f32.xlu1 %v807_v45 }
 0x1c2   : > { %v840_v47 = vpop.permute.xlu1 %839 }
 0x1c3   : > { %v842_v48 = vsel %vm723_vm0, %v840_v47, 0.0 }
 0x1c4   : > { %843 = vadd.xlane.f32.xlu2 %v842_v48  ;;  %v896_v49 = vpop.permute.xlu0 %895 }
 0x1c5   : > { %898 = vst.msk [vmem:[%s718_s7] sm:$0xf] %vm885_vm5, %v896_v49 }
 0x1ca   : > { %v848_v50 = vpop.permute.xlu1 %847 }
 0x1cb   : > { %v850_v51 = vsel %vm723_vm0, %v848_v50, 0.0 }
 0x1cc   : > { %851 = vadd.xlane.f32.xlu2 %v850_v51 }
 0x1d2   : > { %v881_v55 = vpop.permute.xlu1 %880 }
 0x1d4   : > { %803 = vadd.xlane.f32.xlu2 %v802_v52 }
 0x1fd   : > { %v809_v62 = vpop.xlane.xlu1 %808 }
 0x1fe   : > { %v810_v1 = vmul.f32 %v809_v62, %v1677_v12 }
 0x237   : > { %v844_v53 = vpop.xlane.xlu2 %843 }
 0x238   : > { %v845_v54 = vmul.f32 %v844_v53, %v1677_v12 }
 0x23a   : > { %v854_v57 = vmul.f32 %v845_v54, %v845_v54  ;;  %v857_v14 = vsub.f32 %v1697_v40, %v845_v54 }
 0x23f   : > { %v852_v56 = vpop.xlane.xlu2 %851 }
 0x240   : > { %v853_v58 = vmul.f32 %v852_v56, %v1677_v12 }
 0x242   : > { %v855_v59 = vsub.f32 %v853_v58, %v854_v57 }
 0x244   : > { %v856_v60 = vmax.f32 %v855_v59, 0.0 }
 0x246   : > { %v858_v61 = vadd.f32 1e-06, %v856_v60 }
 0x247   : > { %v804_v63 = vpop.xlane.xlu2 %803 }
 0x248   : > { %1311 = vrsqrt.f32 %v858_v61  ;;  %v805_v0 = vmul.f32 %v804_v63, %v1677_v12  ;;  %vm865_vm7 = vweird.f32 %v858_v61 }
 0x24a   : > { %v811_v2 = vmul.f32 %v805_v0, %v805_v0  ;;  %v814_v25 = vsub.f32 %v1697_v40, %v805_v0 }
 0x24c   : > { %v812_v3 = vsub.f32 %v810_v1, %v811_v2 }
 0x24e   : > { %v1312_v4 = vpop.eup %1311  ;;  %v813_v5 = vmax.f32 %v812_v3, 0.0 }
 0x24f   : > { %v860_v6 = vmul.f32 %v1312_v4, %v858_v61  ;;  %vm866_vm6 = vweird.f32 %v1312_v4 }
 0x250   : > { %v815_v7 = vadd.f32 1e-06, %v813_v5  ;;  %vm867_vm8 = vmor %vm865_vm7, %vm866_vm6 }
 0x251   : > { %v861_v8 = vmul.f32 %v1312_v4, %v860_v6 }
 0x252   : > { %1313 = vrsqrt.f32 %v815_v7  ;;  %vm822_vm10 = vweird.f32 %v815_v7 }
 0x253   : > { %v862_v9 = vmul.f32 0.5, %v861_v8 }
 0x255   : > { %v863_v10 = vsub.f32 1.5, %v862_v9 }
 0x257   : > { %v864_v11 = vmul.f32 %v1312_v4, %v863_v10 }
 0x258   : > { %v1314_v13 = vpop.eup %1313 }
 0x259   : > { %v817_v15 = vmul.f32 %v1314_v13, %v815_v7  ;;  %v868_v16 = vsel %vm867_vm8, %v1312_v4, %v864_v11  ;;  %vm823_vm9 = vweird.f32 %v1314_v13 }
 0x25a   : > { %v869_v12 = vmul.f32 %v868_v16, %v857_v14  ;;  %vm824_vm11 = vmor %vm822_vm10, %vm823_vm9 }
 0x25b   : > { %v818_v17 = vmul.f32 %v1314_v13, %v817_v15 }
 0x25c   : > { %v876_v18 = vmul.f32 %v874_v46, %v869_v12 }
 0x25d   : > { %v819_v19 = vmul.f32 0.5, %v818_v17 }
 0x25e   : > { %v883_v20 = vadd.f32 %v881_v55, %v876_v18 }
 0x25f   : > { %v820_v21 = vsub.f32 1.5, %v819_v19 }
 0x260   : > { %v887_v22 = vpack.c.bf16 %v883_v20, %v883_v20 }
 0x261   : > { %v821_v23 = vmul.f32 %v1314_v13, %v820_v21 }
 0x262   : > { %889 = vrot.lane.b32.xlu2 %v887_v22, %s1482_s14 }
 0x263   : > { %v825_v26 = vsel %vm824_vm11, %v1314_v13, %v821_v23 }
 0x264   : > { %v826_v28 = vmul.f32 %v825_v26, %v814_v25 }
 0x266   : > { %v831_v29 = vmul.f32 %v1305_v24, %v826_v28 }
 0x268   : > { %v836_v30 = vadd.f32 %v1306_v27, %v831_v29 }
 0x26a   : > { %v837_v31 = vmul.f32 0.35355338, %v836_v30 }
 0x26c   : > { %v884_v32 = vpack.c.bf16 %v837_v31, %v837_v31 }
 0x26e   : > { %886 = vst.msk [vmem:[%s702_s27] sm:$0xf] %vm885_vm5, %v884_v32 }
 0x2bc   : > { %v890_v33 = vpop.permute.xlu2 %889 }
 0x2bd   : > { %892 = vst.msk [vmem:[%s710_s28] sm:$0xf] %vm885_vm5, %v890_v33 }
 0x2be PF: > { %s1800_s30 = sld [smem:[#allocation12_spill]]  ;;  %s1805_s18 = smov %s1455_s19 }
 0x2bf   : > { %s1801_s17 = sld [smem:[#allocation9_spill]]  ;;  %s1806_s19 = smov %s1632_s10 }
 0x2c0   : > { %s1802_s20 = sld [smem:[#allocation10_spill]]  ;;  %s1807_s23 = smov %s1813_s25 }
 0x2c1   : > { %s1803_s21 = sld [smem:[#allocation11_spill]] }
 0x2c2   : > { %s1804_s22 = sld [smem:[#allocation13_spill]] }
 0x2c4   : > { %s24_s24 = sadd.s32 1, %s1800_s30  }
 0x2c5   : > { %p21_p3 = scmp.ge.s32.totalorder %s24_s24, 6  }
 0x2c7   :  { %23 = sbr.rel (!%p21_p3) target bundleno = 9 (0x9), region = 141 }
 0x2cc   :  { %970 = vsyncpa [#allocation3], 1 }
 0x2cd   :  { %972 = vsyncpa [#allocation3 + $0x1], 1 }
 0x2ce   :  { %973 = vsyncpa [#allocation5], 1 }

// kernel: mmdit_group_forward.7
= control target key start
LH: loop header
LB: loop body
LE: loop exit
PB: predicated region body
PF: predicated region fallthrough
CT: control target
= control target key end

     0   :  { %s1255_s12 = smov 0   ;;  %s1257_s13 = smov 0   ;;  %s1542_s0 = inlined_call_operand.vmem [shape: bf16[2,16,32], index: 0, kind: input, shape index: {}]   ;;  %s1543_s1 = inlined_call_operand.vmem [shape: bf16[2,16,32], index: 1, kind: input, shape index: {}]   ;;  %s1544_s2 = inlined_call_operand.vmem [shape: bf16[2,16,32], index: 2, kind: input, shape index: {}]   ;;  %s1545_s3 = inlined_call_operand.vmem [shape: bf16[2,16,32], index: 3, kind: output, shape index: {}]  }
   0x1   :  { %s1259_s14 = smov 0  }
   0x2 LB: > { %s39_s15 = sadd.s32 1, %s1220_s13  ;;  %p1080_p0 = scmp.ge.s32.totalorder %s1224_s14, 1  ;;  %s1224_s14 = sphi %s1259_s14, %s13_s14   ;;  %s1220_s13 = sphi %s1257_s13, %s1547_s13   ;;  %s1216_s12 = sphi %s1255_s12, %s1546_s12  }
   0x3   : > { %p41_p1 = scmp.ge.s32.totalorder %s39_s15, 2  ;;  %p209_p2 = scmp.lt.s32.totalorder %s1224_s14, 3 }
   0x5   : > { %s1549_s15 = smov (%p41_p1, %s39_s15), 0  ;;  %p210_p3 = pnand %p1080_p0, %p209_p2 }
   0x6   : > { %p264_p4 = scmp.lt.s32.totalorder (!%p210_p3), %s1216_s12, 1  ;;  %s1226_s23 = smov (!%p210_p3), 120  }
   0x7   : > { %213 = sbr.rel (%p210_p3) target bundleno = 1216 (0x4c0), region = 32  ;;  %s1228_s24 = smov (!%p210_p3), 112  }
   0x8   : > { %s1231_s25 = smov (!%p210_p3), 104   ;;  %s1232_s29 = smov (!%p210_p3), 8  }
   0x9   : > { %s1233_s30 = smov (!%p210_p3), 16   ;;  %s1234_s4 = smov (!%p210_p3), 24  }
   0xc   : > { %s1551_s12 = smov (!%p264_p4, %s1216_s12), 1  ;;  %vm353_vm0 = vcmask 64512   ;;  %vm310_vm1 = vcmask 7168   ;;  %v1227_v3 = vmov -1e+30   ;;  %vm376_vm2 = vcmask 130048  }
   0xd   : > { %s1273_s16 = sshll.u32 %s1551_s12, 3  ;;  %311 = vst.msk [vmem:[#allocation2] sm:$0xff] %vm310_vm1, %v1227_v3  ;;  %v1229_v8 = vmov 0   ;;  %v1230_v9 = vmov 0.0   ;;  %vm327_vm3 = vcmask 261120   ;;  %vm587_vm4 = vcmask 130112  }
   0xe   : > { %s283_s19 = scalar_lea.vmem %s1543_s1, %s1273_s16  ;;  %s274_s22 = scalar_lea.vmem %s1542_s0, %s1273_s16  ;;  %312 = vst.msk [vmem:[#allocation2 + $0x8] sm:$0xff] %vm310_vm1, %v1227_v3  ;;  %1151 = vset.pattern.permute.xlu1 %v1229_v8  ;;  %1152 = vset.pattern.permute.xlu2 %v1229_v8  ;;  %vm711_vm5 = vcmask 195712   ;;  %vm835_vm6 = vcmask 261312   ;;  %vm927_vm7 = vcmask 257024  }
   0xf   : > { %v1116_v0 = vld [vmem:[%s283_s19] sm:$0xff]  ;;  %313 = vst.msk [vmem:[#allocation2 + $0x10] sm:$0xff] %vm310_vm1, %v1227_v3  ;;  %1153 = vset.pattern.permute.xlu0 %v1229_v8  ;;  %s291_s28 = scalar_lea.vmem %s1544_s2, %s1273_s16  ;;  %s303_s7 = scalar_lea.vmem %s1545_s3, %s1273_s16 }
  0x10   : > { %v358_v1 = vsel %vm353_vm0, %v1116_v0, 0  ;;  %v1115_v2 = vld [vmem:[%s274_s22] sm:$0xff]  ;;  %470 = vrot.lane.b32.xlu1 %v1116_v0, %s1226_s23  ;;  %314 = vst.msk [vmem:[#allocation2 + $0x18] sm:$0xff] %vm310_vm1, %v1227_v3 }
  0x11   : > { %367 = vmatpush.bf16.xpose.msra.mxu0 %v358_v1  ;;  %315 = vst.msk [vmem:[#allocation2 + $0x20] sm:$0xff] %vm310_vm1, %v1227_v3  ;;  %v1342_v20 = vld [vmem:[%s291_s28] sm:$0xff] }
  0x12   : > { %316 = vst.msk [vmem:[#allocation2 + $0x28] sm:$0xff] %vm310_vm1, %v1227_v3  ;;  %441 = vmatpush.bf16.msra.mxu1 %v1342_v20 }
  0x13   : > { %317 = vst.msk [vmem:[#allocation2 + $0x30] sm:$0xff] %vm310_vm1, %v1227_v3 }
  0x14   : > { %318 = vst.msk [vmem:[#allocation2 + $0x38] sm:$0xff] %vm310_vm1, %v1227_v3  ;;  %v1313_v10 = vld [vmem:[#allocation2] sm:$0xff] }
  0x15   : > { %320 = vst.msk [vmem:[#allocation3 + $0x8] sm:$0xff] %vm310_vm1, %v1230_v9  ;;  %v1323_v14 = vld [vmem:[#allocation2 + $0x8] sm:$0xff] }
  0x16   : > { %319 = vst.msk [vmem:[#allocation3] sm:$0xff] %vm310_vm1, %v1230_v9  ;;  %v493_v51 = vld [vmem:[#allocation2 + $0x10] sm:$0xff] }
  0x17   : > { %321 = vst.msk [vmem:[#allocation3 + $0x10] sm:$0xff] %vm310_vm1, %v1230_v9  ;;  %v1385_v55 = vld [vmem:[#allocation2 + $0x18] sm:$0xff] }
  0x18   : > { %1097 = vmatmul.msk.bf16.vlgmr.msra.gmra.mxu0 %vm353_vm0, %v1115_v2  ;;  %322 = vst.msk [vmem:[#allocation3 + $0x18] sm:$0xff] %vm310_vm1, %v1230_v9  ;;  %v1414_v3 = vld [vmem:[#allocation2 + $0x20] sm:$0xff] }
  0x19   : > { %323 = vst.msk [vmem:[#allocation3 + $0x20] sm:$0xff] %vm310_vm1, %v1230_v9 }
  0x1a   : > { %324 = vst.msk [vmem:[#allocation3 + $0x28] sm:$0xff] %vm310_vm1, %v1230_v9  ;;  %v1395_v59 = vld [vmem:[#allocation2 + $0x30] sm:$0xff] }
  0x1b   : > { %325 = vst.msk [vmem:[#allocation3 + $0x30] sm:$0xff] %vm310_vm1, %v1230_v9  ;;  %v1404_v63 = vld [vmem:[#allocation2 + $0x38] sm:$0xff] }
  0x1c   : > { %326 = vst.msk [vmem:[#allocation3 + $0x38] sm:$0xff] %vm310_vm1, %v1230_v9 }
  0x1d   : > { %328 = vst.msk [vmem:[#allocation4] sm:$0xff] %vm327_vm3, %v1230_v9 }
  0x1e   : > { %329 = vst.msk [vmem:[#allocation4 + $0x8] sm:$0xff] %vm327_vm3, %v1230_v9 }
  0x82   : > { %v471_v18 = vpop.permute.xlu1 %470 }
  0x83   : > { %v476_v19 = vsel %vm353_vm0, %v471_v18, 0 }
  0x84   : > { %485 = vmatpush.bf16.xpose.msra.mxu2 %v476_v19 }
  0x95   : > { %v369_v4 = vpop.f32.mrf.mxu0 }
  0x96   : > { %v377_v5 = vsel %vm376_vm2, %v369_v4, -inf }
  0x97   : > { %378 = vmax.xlane.f32.xlu0 %v377_v5 }
  0x9d   : > { %v371_v6 = vpop.f32.mrf.mxu0 }
  0x9e   : > { %v380_v7 = vsel %vm376_vm2, %v371_v6, -inf }
  0x9f   : > { %381 = vmax.xlane.f32.xlu0 %v380_v7  ;;  %v1424_v7 = vld [vmem:[#allocation2 + $0x28] sm:$0xff] }
  0xb3   : > { %594 = vrot.lane.b32.xlu0 %v1116_v0, %s1228_s24 }
 0x10a   : > { %v379_v11 = vpop.xlane.xlu0 %378 }
 0x10b   : > { %v1316_v12 = vmax.f32 %v1313_v10, %v379_v11 }
 0x10d   : > { %v385_v13 = vsub.f32 %v1313_v10, %v1316_v12  ;;  %466 = vst.msk [vmem:[#allocation2] sm:$0xff] %vm310_vm1, %v1316_v12  ;;  %393 = vperm.xlu1 %1151, %v1316_v12  }
 0x112   : > { %v382_v15 = vpop.xlane.xlu0 %381 }
 0x113   : > { %v1326_v16 = vmax.f32 %v1323_v14, %v382_v15 }
 0x115   : > { %v386_v17 = vsub.f32 %v1323_v14, %v1326_v16  ;;  %467 = vst.msk [vmem:[#allocation2 + $0x8] sm:$0xff] %vm310_vm1, %v1326_v16  ;;  %592 = vrot.lane.b32.xlu1 %v1115_v2, %s1228_s24  ;;  %398 = vperm.xlu2 %1152, %v1326_v16  }
 0x11d   : > { %716 = vrot.lane.b32.xlu1 %v1115_v2, %s1231_s25  ;;  %468 = vrot.lane.b32.xlu2 %v1115_v2, %s1226_s23 }
 0x125   : > { %718 = vrot.lane.b32.xlu2 %v1116_v0, %s1231_s25  ;;  %v595_v22 = vpop.permute.xlu0 %594 }
 0x126   : > { %v600_v23 = vsel %vm353_vm0, %v595_v22, 0 }
 0x127   : > { %609 = vmatpush.bf16.xpose.msrb.mxu1 %v600_v23 }
 0x16f   : > { %v399_v21 = vpop.permute.xlu2 %398 }
 0x170   : > { %v402_v25 = vsub.f32 %v371_v6, %v399_v21 }
 0x172   : > { %v405_v26 = vmul.f32 1.442695, %v402_v25 }
 0x174   : > { %1154 = vpow2.f32 %v405_v26 }
 0x177   : > { %v469_v24 = vpop.permute.xlu2 %468 }
 0x178   : > { %1103 = vmatmul.msk.bf16.vlgmr.msra.gmra.mxu2 %vm353_vm0, %v469_v24 }
 0x17a   : > { %v1155_v33 = vpop.eup %1154 }
 0x17f   : > { %v394_v27 = vpop.permute.xlu1 %393  ;;  %v719_v28 = vpop.permute.xlu2 %718 }
 0x180   : > { %v401_v29 = vsub.f32 %v369_v4, %v394_v27  ;;  %v724_v30 = vsel %vm353_vm0, %v719_v28, 0 }
 0x181   : > { %733 = vmatpush.bf16.xpose.msrb.mxu0 %v724_v30 }
 0x182   : > { %v403_v31 = vmul.f32 1.442695, %v401_v29 }
 0x184   : > { %1156 = vpow2.f32 %v403_v31 }
 0x187   : > { %v593_v32 = vpop.permute.xlu1 %592 }
 0x18a   : > { %v1157_v34 = vpop.eup %1156 }
 0x18b   : > { %v1348_v35 = vpack.c.bf16 %v1155_v33, %v1157_v34 }
 0x18d   : > { %1102 = vmatmul.msk.bf16.vlgmr.msra.gmra.mxu1 %vm376_vm2, %v1348_v35  ;;  %v413_v18 = vunpack.c.h.bf16 %v1348_v35  ;;  %v412_v22 = vunpack.c.l.bf16 %v1348_v35 }
 0x18f   : > { %v717_v36 = vpop.permute.xlu1 %716  ;;  %v417_v19 = vsel %vm376_vm2, %v413_v18, 0.0  ;;  %v414_v24 = vsel %vm376_vm2, %v412_v22, 0.0  ;;  %v408_v22 = vld [vmem:[#allocation3] sm:$0xff] }
 0x190   : > { %1107 = vmatmul.msk.bf16.vlgmr.msrb.gmra.mxu0 %vm353_vm0, %v717_v36 }
 0x19d   : > { %1105 = vmatmul.msk.bf16.vlgmr.msrb.gmra.mxu1 %vm353_vm0, %v593_v32 }
 0x1fb   : > { %v1354_v37 = vpop.f32.mrf.mxu2 }
 0x1fc   : > { %v495_v38 = vsel %vm376_vm2, %v1354_v37, -inf }
 0x1fd   : > { %496 = vmax.xlane.f32.xlu2 %v495_v38 }
 0x203   : > { %v1358_v39 = vpop.f32.mrf.mxu2 }
 0x204   : > { %v498_v40 = vsel %vm376_vm2, %v1358_v39, -inf }
 0x205   : > { %499 = vmax.xlane.f32.xlu1 %v498_v40 }
 0x20a   : > { %v1362_v41 = vpop.f32.mrf.mxu1 }
 0x20d   : > { %v1364_v42 = vpop.f32.mrf.mxu0 }
 0x20e   : > { %v743_v43 = vsel %vm376_vm2, %v1364_v42, -inf }
 0x20f   : > { %744 = vmax.xlane.f32.xlu2 %v743_v43  ;;  %v387_v43 = vmul.f32 1.442695, %v385_v13 }
 0x212   : > { %v1368_v44 = vpop.f32.mrf.mxu1 }
 0x215   : > { %v1370_v45 = vpop.f32.mrf.mxu0 }
 0x216   : > { %v746_v46 = vsel %vm376_vm2, %v1370_v45, -inf }
 0x217   : > { %747 = vmax.xlane.f32.xlu1 %v746_v46 }
 0x21a   : > { %v1374_v47 = vpop.f32.mrf.mxu1 }
 0x21b   : > { %v619_v48 = vsel %vm376_vm2, %v1374_v47, -inf }
 0x21c   : > { %620 = vmax.xlane.f32.xlu0 %v619_v48 }
 0x222   : > { %v1378_v49 = vpop.f32.mrf.mxu1 }
 0x223   : > { %v622_v50 = vsel %vm376_vm2, %v1378_v49, -inf }
 0x224   : > { %623 = vmax.xlane.f32.xlu2 %v622_v50  ;;  %v389_v50 = vmul.f32 1.442695, %v386_v17 }
 0x230   : > { %543 = vrot.lane.b32.xlu1 %v1342_v20, %s1226_s23 }
 0x270   : > { %v497_v52 = vpop.xlane.xlu2 %496 }
 0x271   : > { %v501_v53 = vmax.f32 %v493_v51, %v497_v52 }
 0x273   : > { %v503_v54 = vsub.f32 %v493_v51, %v501_v53  ;;  %590 = vst.msk [vmem:[#allocation2 + $0x10] sm:$0xff] %vm310_vm1, %v501_v53  ;;  %511 = vperm.xlu0 %1153, %v501_v53  }
 0x275   : > { %v505_v21 = vmul.f32 1.442695, %v503_v54 }
 0x277   : > { %1158 = vpow2.f32 %v505_v21 }
 0x278   : > { %v500_v56 = vpop.xlane.xlu1 %499 }
 0x279   : > { %v1388_v57 = vmax.f32 %v1385_v55, %v500_v56 }
 0x27b   : > { %v504_v58 = vsub.f32 %v1385_v55, %v1388_v57  ;;  %591 = vst.msk [vmem:[#allocation2 + $0x18] sm:$0xff] %vm310_vm1, %v1388_v57  ;;  %516 = vperm.xlu2 %1152, %v1388_v57  }
 0x27d   : > { %v1442_v23 = vpop.eup %1158  ;;  %v507_v46 = vmul.f32 1.442695, %v504_v58 }
 0x282   : > { %v745_v60 = vpop.xlane.xlu2 %744 }
 0x283   : > { %v1398_v61 = vmax.f32 %v1395_v59, %v745_v60 }
 0x285   : > { %v751_v62 = vsub.f32 %v1395_v59, %v1398_v61  ;;  %838 = vst.msk [vmem:[#allocation2 + $0x30] sm:$0xff] %vm310_vm1, %v1398_v61 }
 0x28a   : > { %v748_v0 = vpop.xlane.xlu1 %747 }
 0x28b   : > { %v1407_v1 = vmax.f32 %v1404_v63, %v748_v0 }
 0x28d   : > { %v752_v2 = vsub.f32 %v1404_v63, %v1407_v1  ;;  %839 = vst.msk [vmem:[#allocation2 + $0x38] sm:$0xff] %vm310_vm1, %v1407_v1  ;;  %764 = vperm.xlu0 %1153, %v1407_v1  }
 0x28f   : > { %v621_v4 = vpop.xlane.xlu0 %620 }
 0x290   : > { %v1417_v5 = vmax.f32 %v1414_v3, %v621_v4  ;;  %v409_v4 = vld [vmem:[#allocation3 + $0x8] sm:$0xff] }
 0x292   : > { %v627_v6 = vsub.f32 %v1414_v3, %v1417_v5  ;;  %714 = vst.msk [vmem:[#allocation2 + $0x20] sm:$0xff] %vm310_vm1, %v1417_v5  ;;  %635 = vperm.xlu2 %1152, %v1417_v5  }
 0x294   : > { %v629_v9 = vmul.f32 1.442695, %v627_v6  ;;  %v755_v6 = vmul.f32 1.442695, %v752_v2  ;;  %v776_v2 = vld [vmem:[#allocation3 + $0x38] sm:$0xff] }
 0x297   : > { %v624_v8 = vpop.xlane.xlu2 %623 }
 0x298   : > { %v1427_v11 = vmax.f32 %v1424_v7, %v624_v8 }
 0x29a   : > { %v628_v15 = vsub.f32 %v1424_v7, %v1427_v11  ;;  %715 = vst.msk [vmem:[#allocation2 + $0x28] sm:$0xff] %vm310_vm1, %v1427_v11  ;;  %640 = vperm.xlu1 %1151, %v1427_v11   ;;  %667 = vrot.lane.b32.xlu2 %v1342_v20, %s1228_s24 }
 0x2a2   : > { %759 = vperm.xlu1 %1151, %v1398_v61   ;;  %791 = vrot.lane.b32.xlu2 %v1342_v20, %s1231_s25  ;;  %v544_v25 = vpop.permute.xlu1 %543 }
 0x2a3   : > { %556 = vmatpush.bf16.msra.mxu3 %v544_v25 }
 0x2b7   : > { %418 = vadd.xlane.f32.xlu0 %v417_v19 }
 0x2cb   : > { %567 = vperm.xlu0 %1153, %v1442_v23  }
 0x2cc   : > { %415 = vadd.xlane.f32.xlu1 %v414_v24 }
 0x2d5   : > { %v517_v26 = vpop.permute.xlu2 %516 }
 0x2d6   : > { %v520_v20 = vsub.f32 %v1358_v39, %v517_v26 }
 0x2d8   : > { %v523_v27 = vmul.f32 1.442695, %v520_v20 }
 0x2da   : > { %1160 = vpow2.f32 %v523_v27 }
 0x2e0   : > { %v1161_v32 = vpop.eup %1160 }
 0x2e5   : > { %v512_v28 = vpop.permute.xlu0 %511 }
 0x2e6   : > { %v519_v29 = vsub.f32 %v1354_v37, %v512_v28  ;;  %v528_v28 = vld [vmem:[#allocation3 + $0x18] sm:$0xff] }
 0x2e8   : > { %v521_v30 = vmul.f32 1.442695, %v519_v29  ;;  %v527_v29 = vld [vmem:[#allocation3 + $0x10] sm:$0xff] }
 0x2ea   : > { %1162 = vpow2.f32 %v521_v30 }
 0x2eb   : > { %1164 = vpow2.f32 %v387_v43 }
 0x2ec   : > { %v636_v31 = vpop.permute.xlu2 %635  ;;  %1166 = vpow2.f32 %v507_v46 }
 0x2ed   : > { %v643_v48 = vsub.f32 %v1374_v47, %v636_v31  ;;  %1168 = vpow2.f32 %v389_v50  ;;  %v529_v31 = vmul.f32 %v1442_v23, %v527_v29 }
 0x2ef   : > { %v645_v51 = vmul.f32 1.442695, %v643_v48  ;;  %v631_v48 = vmul.f32 1.442695, %v628_v15 }
 0x2f0   : > { %v1163_v33 = vpop.eup %1162 }
 0x2f1   : > { %v525_v34 = vpack.c.bf16 %v1161_v32, %v1163_v33  ;;  %v1165_v53 = vpop.eup %1164  ;;  %1170 = vpow2.f32 %v645_v51 }
 0x2f2   : > { %v1167_v10 = vpop.eup %1166  ;;  %v410_v25 = vmul.f32 %v1165_v53, %v408_v22 }
 0x2f3   : > { %1104 = vmatmul.msk.bf16.vlgmr.msra.gmra.mxu3 %vm376_vm2, %v525_v34  ;;  %v532_v35 = vunpack.c.h.bf16 %v525_v34  ;;  %v531_v36 = vunpack.c.l.bf16 %v525_v34  ;;  %v1169_v57 = vpop.eup %1168  ;;  %v530_v30 = vmul.f32 %v1167_v10, %v528_v28 }
 0x2f4   : > { %v668_v39 = vpop.permute.xlu2 %667 }
 0x2f5   : > { %v536_v38 = vsel %vm376_vm2, %v532_v35, 0.0  ;;  %v533_v40 = vsel %vm376_vm2, %v531_v36, 0.0  ;;  %680 = vmatpush.bf16.msrb.mxu3 %v668_v39  ;;  %v448_v36 = vld [vmem:[#allocation4] sm:$0xff] }
 0x2f6   : > { %537 = vadd.xlane.f32.xlu1 %v536_v38  ;;  %534 = vadd.xlane.f32.xlu2 %v533_v40 }
 0x2f7   : > { %v1171_v16 = vpop.eup %1170 }
 0x2fc   : > { %v792_v37 = vpop.permute.xlu2 %791 }
 0x2fd   : > { %804 = vmatpush.bf16.msrb.mxu2 %v792_v37  ;;  %v449_v37 = vld [vmem:[#allocation4 + $0x8] sm:$0xff] }
 0x2ff   : > { %v765_v54 = vpop.permute.xlu0 %764 }
 0x300   : > { %v768_v13 = vsub.f32 %v1370_v45, %v765_v54 }
 0x302   : > { %v771_v47 = vmul.f32 1.442695, %v768_v13  ;;  %v652_v13 = vld [vmem:[#allocation3 + $0x28] sm:$0xff] }
 0x30c   : > { %v641_v52 = vpop.permute.xlu1 %640 }
 0x30d   : > { %v644_v56 = vsub.f32 %v1378_v49, %v641_v52 }
 0x30e   : > { %452 = vperm.xlu2 %1152, %v1165_v53  }
 0x30f   : > { %v647_v12 = vmul.f32 1.442695, %v644_v56  ;;  %572 = vperm.xlu1 %1151, %v1167_v10  }
 0x311   : > { %1172 = vpow2.f32 %v647_v12 }
 0x312   : > { %1174 = vpow2.f32 %v771_v47 }
 0x314   : > { %v760_v55 = vpop.permute.xlu1 %759 }
 0x315   : > { %v767_v14 = vsub.f32 %v1364_v42, %v760_v55  ;;  %v411_v42 = vmul.f32 %v1169_v57, %v409_v4 }
 0x316   : > { %457 = vperm.xlu2 %1152, %v1169_v57  }
 0x317   : > { %v1173_v17 = vpop.eup %1172  ;;  %v769_v58 = vmul.f32 1.442695, %v767_v14 }
 0x318   : > { %v1464_v49 = vpack.c.bf16 %v1173_v17, %v1171_v16  ;;  %v1175_v60 = vpop.eup %1174 }
 0x319   : > { %1176 = vpow2.f32 %v769_v58 }
 0x31a   : > { %1106 = vmatmul.msk.bf16.vlgmr.msrb.gmra.mxu3 %vm376_vm2, %v1464_v49  ;;  %v656_v24 = vunpack.c.h.bf16 %v1464_v49  ;;  %1178 = vpow2.f32 %v629_v9  ;;  %v655_v61 = vunpack.c.l.bf16 %v1464_v49 }
 0x31b   : > { %1180 = vpow2.f32 %v631_v48 }
 0x31c   : > { %v660_v27 = vsel %vm376_vm2, %v656_v24, 0.0  ;;  %1182 = vpow2.f32 %v755_v6  ;;  %v657_v12 = vsel %vm376_vm2, %v655_v61, 0.0 }
 0x31f   : > { %v1177_v0 = vpop.eup %1176 }
 0x320   : > { %v1468_v45 = vpack.c.bf16 %v1175_v60, %v1177_v0  ;;  %v1492_v51 = vpop.eup %1178 }
 0x321   : > { %v1181_v3 = vpop.eup %1180 }
 0x322   : > { %1108 = vmatmul.msk.bf16.vlgmr.msrb.gmra.mxu2 %vm376_vm2, %v1468_v45  ;;  %v780_v19 = vunpack.c.h.bf16 %v1468_v45  ;;  %v779_v11 = vunpack.c.l.bf16 %v1468_v45  ;;  %v1183_v63 = vpop.eup %1182  ;;  %v654_v47 = vmul.f32 %v1181_v3, %v652_v13 }
 0x323   : > { %v778_v54 = vmul.f32 %v1183_v63, %v776_v2 }
 0x324   : > { %v784_v21 = vsel %vm376_vm2, %v780_v19, 0.0  ;;  %v781_v1 = vsel %vm376_vm2, %v779_v11, 0.0 }
 0x32a   : > { %v419_v8 = vpop.xlane.xlu0 %418 }
 0x32b   : > { %v421_v18 = vadd.f32 %v419_v8, %v411_v42 }
 0x32d   : > { %424 = vst.msk [vmem:[#allocation3 + $0x8] sm:$0xff] %vm310_vm1, %v421_v18 }
 0x334   : > { %v846_v49 = vld [vmem:[#allocation3 + $0x8] sm:$0xff] }
 0x339   : > { %785 = vadd.xlane.f32.xlu1 %v784_v21 }
 0x33d   : > { %v568_v8 = vpop.permute.xlu0 %567 }
 0x33f   : > { %v416_v26 = vpop.xlane.xlu1 %415 }
 0x340   : > { %v420_v20 = vadd.f32 %v416_v26, %v410_v25 }
 0x341   : > { %661 = vadd.xlane.f32.xlu1 %v660_v27 }
 0x342   : > { %423 = vst.msk [vmem:[#allocation3] sm:$0xff] %vm310_vm1, %v420_v20 }
 0x349   : > { %v845_v57 = vld [vmem:[#allocation3] sm:$0xff] }
 0x369   : > { %v538_v32 = vpop.xlane.xlu1 %537  ;;  %v535_v33 = vpop.xlane.xlu2 %534 }
 0x36a   : > { %v540_v34 = vadd.f32 %v538_v32, %v530_v30  ;;  %v539_v35 = vadd.f32 %v535_v33, %v529_v31 }
 0x36c   : > { %542 = vst.msk [vmem:[#allocation3 + $0x18] sm:$0xff] %vm310_vm1, %v540_v34 }
 0x36d   : > { %541 = vst.msk [vmem:[#allocation3 + $0x10] sm:$0xff] %vm310_vm1, %v539_v35 }
 0x371   : > { %v453_v38 = vpop.permute.xlu2 %452 }
 0x372   : > { %v460_v40 = vmul.f32 %v453_v38, %v448_v36 }
 0x373   : > { %v866_v15 = vld [vmem:[#allocation3 + $0x18] sm:$0xff] }
 0x374   : > { %v462_v39 = vadd.f32 %v460_v40, %v1362_v41  ;;  %v865_v17 = vld [vmem:[#allocation3 + $0x10] sm:$0xff] }
 0x376   : > { %464 = vst.msk [vmem:[#allocation4] sm:$0xff] %vm353_vm0, %v462_v39  ;;  %v558_v23 = vpop.f32.mrf.mxu3 }
 0x377   : > { %579 = vrot.lane.b32.xlu2 %v558_v23, %s1232_s29  ;;  %v775_v23 = vld [vmem:[#allocation3 + $0x30] sm:$0xff] }
 0x379   : > { %v458_v43 = vpop.permute.xlu2 %457 }
 0x37a   : > { %v461_v46 = vmul.f32 %v458_v43, %v449_v37 }
 0x37c   : > { %v463_v50 = vadd.f32 %v461_v46, %v1368_v44  ;;  %v753_v44 = vmul.f32 1.442695, %v751_v62 }
 0x37d   : > { %v563_v42 = vld [vmem:[#allocation4] sm:$0xff] }
 0x37e   : > { %465 = vst.msk [vmem:[#allocation4 + $0x8] sm:$0xff] %vm353_vm0, %v463_v50  ;;  %v560_v41 = vpop.f32.mrf.mxu3  ;;  %1184 = vpow2.f32 %v753_v44  ;;  %v575_v18 = vmul.f32 %v568_v8, %v563_v42  ;;  %v651_v50 = vld [vmem:[#allocation3 + $0x20] sm:$0xff] }
 0x37f   : > { %581 = vrot.lane.b32.xlu0 %v560_v41, %s1232_s29  ;;  %691 = vperm.xlu2 %1152, %v1492_v51   ;;  %1186 = vrcp.f32 %v866_v15  ;;  %v653_v6 = vmul.f32 %v1492_v51, %v651_v50 }
 0x380   : > { %1188 = vrcp.f32 %v845_v57 }
 0x381   : > { %v573_v7 = vpop.permute.xlu1 %572  ;;  %1190 = vrcp.f32 %v865_v17 }
 0x382   : > { %1192 = vrcp.f32 %v846_v49 }
 0x384   : > { %v1504_v56 = vpop.eup %1184 }
 0x385   : > { %v1187_v62 = vpop.eup %1186  ;;  %v564_v24 = vld [vmem:[#allocation4 + $0x8] sm:$0xff]  ;;  %v777_v43 = vmul.f32 %v1504_v56, %v775_v23 }
 0x386   : > { %v1189_v58 = vpop.eup %1188  ;;  %v576_v25 = vmul.f32 %v573_v7, %v564_v24 }
 0x387   : > { %696 = vperm.xlu2 %1152, %v1181_v3   ;;  %v1191_v0 = vpop.eup %1190 }
 0x388   : > { %v1193_v45 = vpop.eup %1192 }
 0x39d   : > { %v682_v5 = vpop.f32.mrf.mxu3 }
 0x39e   : > { %703 = vrot.lane.b32.xlu2 %v682_v5, %s1233_s30 }
 0x3a5   : > { %v684_v52 = vpop.f32.mrf.mxu3  ;;  %v806_v53 = vpop.f32.mrf.mxu2 }
 0x3a6   : > { %705 = vrot.lane.b32.xlu2 %v684_v52, %s1233_s30  ;;  %827 = vrot.lane.b32.xlu1 %v806_v53, %s1234_s4 }
 0x3a9   : > { %782 = vadd.xlane.f32.xlu0 %v781_v1 }
 0x3ac   : > { %v786_v59 = vpop.xlane.xlu1 %785 }
 0x3ad   : > { %v788_v10 = vadd.f32 %v786_v59, %v778_v54  ;;  %v808_v14 = vpop.f32.mrf.mxu2 }
 0x3ae   : > { %815 = vperm.xlu2 %1152, %v1504_v56   ;;  %876 = vperm.xlu1 %1151, %v1187_v62  }
 0x3af   : > { %790 = vst.msk [vmem:[#allocation3 + $0x38] sm:$0xff] %vm310_vm1, %v788_v10 }
 0x3b1   : > { %658 = vadd.xlane.f32.xlu0 %v657_v12 }
 0x3b4   : > { %v662_v55 = vpop.xlane.xlu1 %661 }
 0x3b5   : > { %v664_v16 = vadd.f32 %v662_v55, %v654_v47 }
 0x3b6   : > { %829 = vrot.lane.b32.xlu2 %v808_v14, %s1234_s4  ;;  %v906_v2 = vld [vmem:[#allocation3 + $0x38] sm:$0xff] }
 0x3b7   : > { %666 = vst.msk [vmem:[#allocation3 + $0x28] sm:$0xff] %vm310_vm1, %v664_v16 }
 0x3be   : > { %851 = vperm.xlu2 %1152, %v1189_v58   ;;  %v886_v60 = vld [vmem:[#allocation3 + $0x28] sm:$0xff] }
 0x3bf   : > { %1194 = vrcp.f32 %v886_v60 }
 0x3c5   : > { %820 = vperm.xlu0 %1153, %v1183_v63   ;;  %v1195_v4 = vpop.eup %1194 }
 0x3c6   : > { %871 = vperm.xlu2 %1152, %v1191_v0  }
 0x3cd   : > { %856 = vperm.xlu0 %1153, %v1193_v45  }
 0x3ce   : > { %896 = vperm.xlu2 %1152, %v1195_v4  }
 0x3d1   : > { %v580_v19 = vpop.permute.xlu2 %579 }
 0x3d2   : > { %v585_v21 = vadd.f32 %v580_v19, %v575_v18 }
 0x3d4   : > { %588 = vst.msk [vmem:[#allocation4] sm:$0xff] %vm587_vm4, %v585_v21 }
 0x3d9   : > { %v692_v22 = vpop.permute.xlu2 %691 }
 0x3db   : > { %v687_v28 = vld [vmem:[#allocation4] sm:$0xff] }
 0x3dc   : > { %v699_v29 = vmul.f32 %v692_v22, %v687_v28 }
 0x3e1   : > { %v697_v26 = vpop.permute.xlu2 %696 }
 0x3f1   : > { %v582_v20 = vpop.permute.xlu0 %581 }
 0x3f2   : > { %v586_v27 = vadd.f32 %v582_v20, %v576_v25 }
 0x3f4   : > { %589 = vst.msk [vmem:[#allocation4 + $0x8] sm:$0xff] %vm587_vm4, %v586_v27 }
 0x3f8   : > { %v704_v30 = vpop.permute.xlu2 %703 }
 0x3f9   : > { %v709_v31 = vadd.f32 %v704_v30, %v699_v29 }
 0x3fb   : > { %712 = vst.msk [vmem:[#allocation4] sm:$0xff] %vm711_vm5, %v709_v31  ;;  %v688_v32 = vld [vmem:[#allocation4 + $0x8] sm:$0xff] }
 0x3fc   : > { %v700_v33 = vmul.f32 %v697_v26, %v688_v32 }
 0x400   : > { %v706_v34 = vpop.permute.xlu2 %705 }
 0x401   : > { %v710_v35 = vadd.f32 %v706_v34, %v700_v33 }
 0x402   : > { %v811_v38 = vld [vmem:[#allocation4] sm:$0xff] }
 0x403   : > { %713 = vst.msk [vmem:[#allocation4 + $0x8] sm:$0xff] %vm711_vm5, %v710_v35 }
 0x408   : > { %v816_v36 = vpop.permute.xlu2 %815 }
 0x409   : > { %v823_v40 = vmul.f32 %v816_v36, %v811_v38 }
 0x40a   : > { %v812_v56 = vld [vmem:[#allocation4 + $0x8] sm:$0xff] }
 0x410   : > { %v830_v9 = vpop.permute.xlu2 %829 }
 0x418   : > { %v828_v39 = vpop.permute.xlu1 %827  ;;  %v852_v3 = vpop.permute.xlu2 %851 }
 0x419   : > { %v833_v37 = vadd.f32 %v828_v39, %v823_v40 }
 0x41b   : > { %836 = vst.msk [vmem:[#allocation4] sm:$0xff] %vm835_vm6, %v833_v37 }
 0x41c   : > { %v783_v46 = vpop.xlane.xlu0 %782 }
 0x41d   : > { %v787_v48 = vadd.f32 %v783_v46, %v777_v43 }
 0x41f   : > { %789 = vst.msk [vmem:[#allocation3 + $0x30] sm:$0xff] %vm310_vm1, %v787_v48 }
 0x420   : > { %v872_v52 = vpop.permute.xlu2 %871  ;;  %v877_v47 = vpop.permute.xlu1 %876 }
 0x422   : > { %v843_v41 = vld [vmem:[#allocation4] sm:$0xff] }
 0x423   : > { %v859_v5 = vmul.f32 %v852_v3, %v843_v41 }
 0x424   : > { %v659_v44 = vpop.xlane.xlu0 %658 }
 0x425   : > { %861 = vst.msk [vmem:[#allocation4] sm:$0xff] %vm353_vm0, %v859_v5  ;;  %v663_v7 = vadd.f32 %v659_v44, %v653_v6 }
 0x426   : > { %v905_v11 = vld [vmem:[#allocation3 + $0x30] sm:$0xff] }
 0x427   : > { %665 = vst.msk [vmem:[#allocation3 + $0x20] sm:$0xff] %vm310_vm1, %v663_v7  ;;  %1196 = vrcp.f32 %v905_v11 }
 0x428   : > { %v897_v14 = vpop.permute.xlu2 %896 }
 0x42c   : > { %v863_v15 = vld [vmem:[#allocation4] sm:$0xff] }
 0x42d   : > { %v1197_v53 = vpop.eup %1196  ;;  %v879_v63 = vmul.f32 %v872_v52, %v863_v15 }
 0x42e   : > { %911 = vperm.xlu1 %1151, %v1197_v53   ;;  %v885_v1 = vld [vmem:[#allocation3 + $0x20] sm:$0xff] }
 0x42f   : > { %881 = vst.msk [vmem:[#allocation4] sm:$0xff] %vm587_vm4, %v879_v63  ;;  %1198 = vrcp.f32 %v885_v1 }
 0x430   : > { %1200 = vrcp.f32 %v906_v2 }
 0x435   : > { %v1199_v54 = vpop.eup %1198 }
 0x436   : > { %891 = vperm.xlu0 %1153, %v1199_v54   ;;  %v1201_v62 = vpop.eup %1200  ;;  %v883_v49 = vld [vmem:[#allocation4] sm:$0xff] }
 0x437   : > { %v821_v51 = vpop.permute.xlu0 %820 }
 0x438   : > { %v824_v59 = vmul.f32 %v821_v51, %v812_v56 }
 0x43a   : > { %v834_v61 = vadd.f32 %v830_v9, %v824_v59 }
 0x43c   : > { %837 = vst.msk [vmem:[#allocation4 + $0x8] sm:$0xff] %vm835_vm6, %v834_v61 }
 0x43e   : > { %916 = vperm.xlu0 %1153, %v1201_v62  }
 0x43f   : > { %v857_v10 = vpop.permute.xlu0 %856 }
 0x443   : > { %v844_v12 = vld [vmem:[#allocation4 + $0x8] sm:$0xff] }
 0x444   : > { %v860_v13 = vmul.f32 %v857_v10, %v844_v12 }
 0x446   : > { %862 = vst.msk [vmem:[#allocation4 + $0x8] sm:$0xff] %vm353_vm0, %v860_v13 }
 0x44d   : > { %v864_v55 = vld [vmem:[#allocation4 + $0x8] sm:$0xff] }
 0x44e   : > { %v880_v57 = vmul.f32 %v877_v47, %v864_v55 }
 0x450   : > { %882 = vst.msk [vmem:[#allocation4 + $0x8] sm:$0xff] %vm587_vm4, %v880_v57 }
 0x457   : > { %v884_v16 = vld [vmem:[#allocation4 + $0x8] sm:$0xff] }
 0x458   : > { %v900_v17 = vmul.f32 %v897_v14, %v884_v16 }
 0x45a   : > { %902 = vst.msk [vmem:[#allocation4 + $0x8] sm:$0xff] %vm711_vm5, %v900_v17 }
 0x461   : > { %v904_v45 = vld [vmem:[#allocation4 + $0x8] sm:$0xff] }
 0x4a0   : > { %v912_v42 = vpop.permute.xlu1 %911 }
 0x4a8   : > { %v892_v58 = vpop.permute.xlu0 %891 }
 0x4a9   : > { %v899_v60 = vmul.f32 %v892_v58, %v883_v49 }
 0x4ab   : > { %901 = vst.msk [vmem:[#allocation4] sm:$0xff] %vm711_vm5, %v899_v60 }
 0x4b0   : > { %v917_v0 = vpop.permute.xlu0 %916 }
 0x4b1   : > { %v920_v4 = vmul.f32 %v917_v0, %v904_v45 }
 0x4b2   : > { %v903_v8 = vld [vmem:[#allocation4] sm:$0xff] }
 0x4b3   : > { %v919_v18 = vmul.f32 %v912_v42, %v903_v8  ;;  %922 = vst.msk [vmem:[#allocation4 + $0x8] sm:$0xff] %vm835_vm6, %v920_v4 }
 0x4b5   : > { %921 = vst.msk [vmem:[#allocation4] sm:$0xff] %vm835_vm6, %v919_v18 }
 0x4ba   : > { %v924_v19 = vld [vmem:[#allocation4 + $0x8] sm:$0xff] }
 0x4bb   : > { %v926_v21 = vpack.c.bf16 %v924_v19, %v924_v19 }
 0x4bc   : > { %v923_v22 = vld [vmem:[#allocation4] sm:$0xff] }
 0x4bd   : > { %v925_v24 = vpack.c.bf16 %v923_v22, %v923_v22  ;;  %929 = vst.msk [vmem:[%s303_s7 + $0x4] sm:$0xf] %vm927_vm7, %v926_v21 }
 0x4bf   : > { %928 = vst.msk [vmem:[%s303_s7] sm:$0xf] %vm927_vm7, %v925_v24 }
 0x4c0 PF: > { %s13_s14 = sadd.s32 1, %s1224_s14   ;;  %s1546_s12 = smov %s1220_s13 }
 0x4c1   : > { %p10_p5 = scmp.ge.s32.totalorder %s13_s14, 4   ;;  %s1547_s13 = smov %s1549_s15 }
 0x4c3   :  { %12 = sbr.rel (!%p10_p5) target bundleno = 2 (0x2), region = 84 }

// kernel: mmdit_group_forward.9
= control target key start
LH: loop header
LB: loop body
LE: loop exit
PB: predicated region body
PF: predicated region fallthrough
CT: control target
= control target key end

     0   :  { %s1376_s17 = smov 0   ;;  %s1378_s18 = smov 0   ;;  %s1537_s0 = inlined_call_operand.vmem [shape: f32[2,16,32], index: 0, kind: input, shape index: {}]   ;;  %s1538_s1 = inlined_call_operand.vmem [shape: f32[2,2,1,32], index: 1, kind: input, shape index: {}]   ;;  %s1539_s2 = inlined_call_operand.vmem [shape: f32[2,2,1,32], index: 2, kind: input, shape index: {}]   ;;  %s1540_s3 = inlined_call_operand.vmem [shape: bf16[2,32,96], index: 3, kind: input, shape index: {}]   ;;  %s1541_s4 = inlined_call_operand.vmem [shape: f32[2,1,96], index: 4, kind: input, shape index: {}]   ;;  %s1542_s5 = inlined_call_operand.vmem [shape: f32[2,1,32], index: 5, kind: input, shape index: {}]   ;;  %s1543_s6 = inlined_call_operand.vmem [shape: f32[2,1,32], index: 6, kind: input, shape index: {}]   ;;  %s1544_s7 = inlined_call_operand.vmem [shape: f32[2,1,32], index: 7, kind: input, shape index: {}]   ;;  %s1545_s8 = inlined_call_operand.vmem [shape: f32[2,1,32], index: 8, kind: input, shape index: {}]   ;;  %s1546_s9 = inlined_call_operand.vmem [shape: bf16[2,16,32], index: 9, kind: output, shape index: {0}]   ;;  %s1547_s10 = inlined_call_operand.vmem [shape: bf16[2,16,32], index: 10, kind: output, shape index: {1}]   ;;  %s1548_s11 = inlined_call_operand.vmem [shape: bf16[2,16,32], index: 11, kind: output, shape index: {2}]  }
   0x1   :  { %1549 = sst [smem:[#allocation2_spill]] %s1537_s0  ;;  %s1380_s19 = smov 0  }
   0x2   :  { %s1382_s20 = smov 0   ;;  %s1384_s21 = smov 0  }
   0x3 LB: > { %s31_s22 = sadd.s32 1, %s1302_s19  ;;  %s34_s23 = sadd.s32 1, %s1306_s20  ;;  %s1310_s21 = sphi %s1384_s21, %s22_s21   ;;  %s1306_s20 = sphi %s1382_s20, %s1554_s20   ;;  %s1302_s19 = sphi %s1380_s19, %s1553_s19   ;;  %s1298_s18 = sphi %s1378_s18, %s1552_s18   ;;  %s1294_s17 = sphi %s1376_s17, %s1551_s17  }
   0x4   : > { %p32_p0 = scmp.ge.s32.totalorder %s31_s22, 2  ;;  %p1187_p1 = scmp.ge.s32.totalorder %s1310_s21, 1 }
   0x5   : > { %p507_p2 = scmp.lt.s32.totalorder %s1310_s21, 5 }
   0x6   : > { %s1556_s22 = smov (%p32_p0, %s31_s22), 0  ;;  %s1558_s23 = smov (!%p32_p0, %s34_s23), %s1306_s20 }
   0x7   : > { %p508_p3 = pnand %p1187_p1, %p507_p2  ;;  %p36_p4 = scmp.ge.s32.totalorder %s1558_s23, 2 }
   0x8   : > { %p619_p5 = scmp.lt.s32.totalorder (!%p508_p3), %s1294_s17, 1  ;;  %p621_p6 = scmp.lt.s32.totalorder (!%p508_p3), %s1298_s18, 1 }
   0x9   : > { %s1560_s23 = smov (%p36_p4, %s1558_s23), 0  ;;  %511 = sbr.rel (%p508_p3) target bundleno = 674 (0x2a2), region = 56 }
   0xa   : > { %s1550_s0 = sld [smem:[#allocation2_spill]] (!%p508_p3)  ;;  %p627_p7 = scmp.ge.s32.totalorder (!%p508_p3), %s1298_s18, 1 }
   0xe   : > { %s1562_s17 = smov (!%p619_p5, %s1294_s17), 1  ;;  %vm721_vm0 = vcmask 261120   ;;  %v1312_v4 = vmov 32.0   ;;  %vm883_vm5 = vcmask 257024  }
   0xf   : > { %s622_s24 = scalar_select %p621_p6, %s1298_s18, 1  ;;  %1264 = vrcp.f32 %v1312_v4 }
  0x10   : > { %s1188_s25 = sshll.u32 %s1562_s17, 1 }
  0x11   : > { %s1410_s26 = sadd.s32 %s1188_s25, %s622_s24 }
  0x12   : > { %s1189_s27 = sshll.u32 %s1410_s26, 3 }
  0x13   : > { %s626_s30 = scalar_lea.vmem %s1550_s0, %s1189_s27  ;;  %s1313_s0 = smov 32  }
  0x14   : > { %v718_v0 = vld [vmem:[%s626_s30] sm:$0xff]  ;;  %s628_s12 = scalar_select %p627_p7, 1, 0 }
  0x15   : > { %v722_v1 = vsel %vm721_vm0, %v718_v0, 0.0  ;;  %v733_v2 = vmul.f32 %v718_v0, %v718_v0  ;;  %v1265_v5 = vpop.eup %1264 }
  0x16   : > { %723 = vadd.xlane.f32.xlu0 %v722_v1  ;;  %p629_p8 = scmp.lt.s32.totalorder %s628_s12, 1  ;;  %v726_v6 = vmul.f32 32.0, %v1265_v5  ;;  %vm730_vm1 = vweird.f32 %v1265_v5 }
  0x17   : > { %v734_v3 = vsel %vm721_vm0, %v733_v2, 0.0 }
  0x18   : > { %s1564_s12 = smov (!%p629_p8, %s628_s12), 1  ;;  %v727_v7 = vsub.f32 1.0, %v726_v6 }
  0x19   : > { %s1190_s13 = sshll.u32 %s1564_s12, 1  ;;  %s683_s18 = scalar_lea.vmem %s1544_s7, %s1564_s12 }
  0x1a   : > { %s1422_s14 = sadd.s32 %s1190_s13, %s1562_s17  ;;  %s662_s30 = scalar_lea.vmem %s1541_s4, %s1564_s12  ;;  %v728_v8 = vmul.f32 %v1265_v5, %v727_v7  ;;  %v1259_v19 = vld [vmem:[%s683_s18] ss:$0 sm:$0xff] }
  0x1b   : > { %s635_s24 = scalar_lea.vmem %s1538_s1, %s1422_s14  ;;  %s1211_s17 = sshll.u32 %s1564_s12, 4  ;;  %v1260_v38 = vld [vmem:[%s662_s30] ss:$0 sm:$0xff] }
  0x1c   : > { %s655_s15 = scalar_lea.vmem %s1540_s3, %s1211_s17  ;;  %v729_v9 = vadd.f32 %v1265_v5, %v728_v8  ;;  %s646_s27 = scalar_lea.vmem %s1539_s2, %s1422_s14  ;;  %v1258_v34 = vld [vmem:[%s635_s24] ss:$0 sm:$0xff] }
  0x1d   : > { %v1213_v11 = vld [vmem:[%s655_s15 + $0x8] sm:$0xff]  ;;  %v1212_v13 = vld [vmem:[%s655_s15] sm:$0xff]  ;;  %s690_s13 = scalar_lea.vmem %s1545_s8, %s1564_s12  ;;  %s1314_s14 = smov 96  }
  0x1e   : > { %735 = vadd.xlane.f32.xlu0 %v734_v3  ;;  %v1440_v12 = vsel %vm730_vm1, %v1265_v5, %v729_v9  ;;  %793 = vmatpush.bf16.msra.mxu0 %v1213_v11  ;;  %v720_v25 = vld [vmem:[%s646_s27] sm:$0x1]  ;;  %s1315_s24 = smov 64   ;;  %s1476_s30 = sshll.u32 %s1410_s26, 2 }
  0x1f   : > { %v754_v27 = vadd.f32 1.0, %v720_v25  ;;  %v1261_v44 = vld [vmem:[%s690_s13] ss:$0 sm:$0xff]  ;;  %s716_s18 = scalar_lea.vmem %s1548_s11, %s1476_s30  ;;  %s669_s28 = scalar_lea.vmem %s1542_s5, %s1564_s12 }
  0x20   : > { %s676_s13 = scalar_lea.vmem %s1543_s6, %s1564_s12  ;;  %s700_s26 = scalar_lea.vmem %s1546_s9, %s1476_s30 }
  0x21   : > { %v756_v31 = vperm.slane %v754_v27, 0  ;;  %v1263_v27 = vld [vmem:[%s676_s13] ss:$0 sm:$0xff] }
  0x22   : > { %794 = vmatpush.bf16.msra.mxu0 %v1212_v13 }
  0x32   : > { %871 = vrot.lane.b32.xlu0 %v1259_v19, %s1313_s0 }
  0x89   : > { %v724_v10 = vpop.xlane.xlu0 %723 }
  0x8a   : > { %v732_v14 = vmul.f32 %v1440_v12, %v724_v10 }
  0x8c   : > { %v738_v16 = vmul.f32 %v732_v14, %v732_v14  ;;  %v741_v30 = vsub.f32 %v718_v0, %v732_v14 }
  0x91   : > { %v736_v15 = vpop.xlane.xlu0 %735 }
  0x92   : > { %v737_v17 = vmul.f32 %v736_v15, %v1440_v12 }
  0x94   : > { %v739_v18 = vsub.f32 %v737_v17, %v738_v16 }
  0x96   : > { %v740_v20 = vmax.f32 %v739_v18, 0.0 }
  0x98   : > { %v742_v21 = vadd.f32 1e-06, %v740_v20 }
  0x9a   : > { %1266 = vrsqrt.f32 %v742_v21  ;;  %vm749_vm3 = vweird.f32 %v742_v21 }
  0xa0   : > { %v1267_v22 = vpop.eup %1266 }
  0xa1   : > { %v744_v23 = vmul.f32 %v1267_v22, %v742_v21  ;;  %vm750_vm2 = vweird.f32 %v1267_v22 }
  0xa2   : > { %vm751_vm4 = vmor %vm749_vm3, %vm750_vm2 }
  0xa3   : > { %v745_v24 = vmul.f32 %v1267_v22, %v744_v23 }
  0xa4   : > { %v872_v46 = vpop.permute.xlu0 %871 }
  0xa5   : > { %v746_v26 = vmul.f32 0.5, %v745_v24  ;;  %v1262_v24 = vld [vmem:[%s669_s28] ss:$0 sm:$0xff] }
  0xa7   : > { %v747_v28 = vsub.f32 1.5, %v746_v26 }
  0xa9   : > { %v748_v29 = vmul.f32 %v1267_v22, %v747_v28 }
  0xab   : > { %v752_v32 = vsel %vm751_vm4, %v1267_v22, %v748_v29 }
  0xac   : > { %v753_v33 = vmul.f32 %v752_v32, %v741_v30 }
  0xae   : > { %v758_v35 = vmul.f32 %v756_v31, %v753_v33 }
  0xb0   : > { %v762_v36 = vadd.f32 %v1258_v34, %v758_v35 }
  0xb2   : > { %v763_v37 = vpack.c.bf16 %v762_v36, %v762_v36 }
  0xb4   : > { %1208 = vmatmul.msk.bf16.vlgmr.msra.gmra.mxu0 %vm721_vm0, %v763_v37 }
 0x131   : > { %v796_v39 = vpop.f32.mrf.mxu0 }
 0x132   : > { %v1464_v40 = vadd.f32 %v1260_v38, %v796_v39 }
 0x134   : > { %837 = vrot.lane.b32.xlu1 %v1464_v40, %s1314_s14  ;;  %v891_v41 = vpack.c.bf16 %v1464_v40, %v1464_v40  ;;  %v804_v43 = vmul.f32 %v1464_v40, %v1464_v40  ;;  %v800_v52 = vsel %vm721_vm0, %v1464_v40, 0.0 }
 0x136   : > { %893 = vrot.lane.b32.xlu0 %v891_v41, %s1315_s24  ;;  %v805_v45 = vsel %vm721_vm0, %v804_v43, 0.0 }
 0x139   : > { %v798_v42 = vpop.f32.mrf.mxu0 }
 0x13c   : > { %845 = vrot.lane.b32.xlu1 %v804_v43, %s1314_s14 }
 0x144   : > { %878 = vrot.lane.b32.xlu1 %v1261_v44, %s1313_s0 }
 0x16e   : > { %806 = vadd.xlane.f32.xlu1 %v805_v45 }
 0x1a6   : > { %v838_v47 = vpop.permute.xlu1 %837 }
 0x1a7   : > { %v840_v48 = vsel %vm721_vm0, %v838_v47, 0.0 }
 0x1a8   : > { %841 = vadd.xlane.f32.xlu2 %v840_v48  ;;  %v894_v49 = vpop.permute.xlu0 %893 }
 0x1a9   : > { %896 = vst.msk [vmem:[%s716_s18] sm:$0xf] %vm883_vm5, %v894_v49 }
 0x1ae   : > { %v846_v50 = vpop.permute.xlu1 %845 }
 0x1af   : > { %v848_v51 = vsel %vm721_vm0, %v846_v50, 0.0 }
 0x1b0   : > { %849 = vadd.xlane.f32.xlu2 %v848_v51 }
 0x1b6   : > { %v879_v55 = vpop.permute.xlu1 %878 }
 0x1b8   : > { %801 = vadd.xlane.f32.xlu2 %v800_v52 }
 0x1e1   : > { %v807_v62 = vpop.xlane.xlu1 %806 }
 0x1e2   : > { %v808_v1 = vmul.f32 %v807_v62, %v1440_v12 }
 0x21b   : > { %v842_v53 = vpop.xlane.xlu2 %841 }
 0x21c   : > { %v843_v54 = vmul.f32 %v842_v53, %v1440_v12 }
 0x21e   : > { %v852_v57 = vmul.f32 %v843_v54, %v843_v54  ;;  %v855_v14 = vsub.f32 %v1464_v40, %v843_v54 }
 0x223   : > { %v850_v56 = vpop.xlane.xlu2 %849 }
 0x224   : > { %v851_v58 = vmul.f32 %v850_v56, %v1440_v12 }
 0x226   : > { %v853_v59 = vsub.f32 %v851_v58, %v852_v57 }
 0x228   : > { %v854_v60 = vmax.f32 %v853_v59, 0.0 }
 0x22a   : > { %v856_v61 = vadd.f32 1e-06, %v854_v60 }
 0x22b   : > { %v802_v63 = vpop.xlane.xlu2 %801 }
 0x22c   : > { %1268 = vrsqrt.f32 %v856_v61  ;;  %v803_v0 = vmul.f32 %v802_v63, %v1440_v12  ;;  %vm863_vm7 = vweird.f32 %v856_v61 }
 0x22e   : > { %v809_v2 = vmul.f32 %v803_v0, %v803_v0  ;;  %v812_v25 = vsub.f32 %v1464_v40, %v803_v0 }
 0x230   : > { %v810_v3 = vsub.f32 %v808_v1, %v809_v2 }
 0x232   : > { %v1269_v4 = vpop.eup %1268  ;;  %v811_v5 = vmax.f32 %v810_v3, 0.0 }
 0x233   : > { %v858_v6 = vmul.f32 %v1269_v4, %v856_v61  ;;  %vm864_vm6 = vweird.f32 %v1269_v4 }
 0x234   : > { %v813_v7 = vadd.f32 1e-06, %v811_v5  ;;  %vm865_vm8 = vmor %vm863_vm7, %vm864_vm6 }
 0x235   : > { %v859_v8 = vmul.f32 %v1269_v4, %v858_v6 }
 0x236   : > { %1270 = vrsqrt.f32 %v813_v7  ;;  %vm820_vm10 = vweird.f32 %v813_v7 }
 0x237   : > { %v860_v9 = vmul.f32 0.5, %v859_v8 }
 0x239   : > { %v861_v10 = vsub.f32 1.5, %v860_v9 }
 0x23b   : > { %v862_v11 = vmul.f32 %v1269_v4, %v861_v10 }
 0x23c   : > { %v1271_v13 = vpop.eup %1270 }
 0x23d   : > { %v815_v15 = vmul.f32 %v1271_v13, %v813_v7  ;;  %v866_v12 = vsel %vm865_vm8, %v1269_v4, %v862_v11  ;;  %vm821_vm9 = vweird.f32 %v1271_v13 }
 0x23e   : > { %v867_v16 = vmul.f32 %v866_v12, %v855_v14  ;;  %vm822_vm11 = vmor %vm820_vm10, %vm821_vm9 }
 0x23f   : > { %v816_v17 = vmul.f32 %v1271_v13, %v815_v15 }
 0x240   : > { %v874_v18 = vmul.f32 %v872_v46, %v867_v16 }
 0x241   : > { %v817_v19 = vmul.f32 0.5, %v816_v17 }
 0x242   : > { %v881_v20 = vadd.f32 %v879_v55, %v874_v18 }
 0x243   : > { %v818_v21 = vsub.f32 1.5, %v817_v19 }
 0x244   : > { %v885_v22 = vpack.c.bf16 %v881_v20, %v881_v20 }
 0x245   : > { %v819_v23 = vmul.f32 %v1271_v13, %v818_v21 }
 0x246   : > { %887 = vrot.lane.b32.xlu2 %v885_v22, %s1314_s14  ;;  %s708_s14 = scalar_lea.vmem %s1547_s10, %s1476_s30 }
 0x247   : > { %v823_v26 = vsel %vm822_vm11, %v1271_v13, %v819_v23 }
 0x248   : > { %v824_v28 = vmul.f32 %v823_v26, %v812_v25 }
 0x24a   : > { %v829_v29 = vmul.f32 %v1262_v24, %v824_v28 }
 0x24c   : > { %v834_v30 = vadd.f32 %v1263_v27, %v829_v29 }
 0x24e   : > { %v835_v31 = vmul.f32 0.35355338, %v834_v30 }
 0x250   : > { %v882_v32 = vpack.c.bf16 %v835_v31, %v835_v31 }
 0x252   : > { %884 = vst.msk [vmem:[%s700_s26] sm:$0xf] %vm883_vm5, %v882_v32 }
 0x2a0   : > { %v888_v33 = vpop.permute.xlu2 %887 }
 0x2a1   : > { %890 = vst.msk [vmem:[%s708_s14] sm:$0xf] %vm883_vm5, %v888_v33 }
 0x2a2 PF: > { %s22_s21 = sadd.s32 1, %s1310_s21   ;;  %s1551_s17 = smov %s1302_s19 }
 0x2a3   : > { %p19_p9 = scmp.ge.s32.totalorder %s22_s21, 6   ;;  %s1552_s18 = smov %s1306_s20 }
 0x2a4   : > { %s1553_s19 = smov %s1556_s22  ;;  %s1554_s20 = smov %s1560_s23 }
 0x2a5   :  { %21 = sbr.rel (!%p19_p9) target bundleno = 3 (0x3), region = 134 }

// kernel: mmdit_group_forward.8
= control target key start
LH: loop header
LB: loop body
LE: loop exit
PB: predicated region body
PF: predicated region fallthrough
CT: control target
= control target key end

     0   :  { %s1621_s21 = smov 0   ;;  %s1623_s22 = smov 0   ;;  %s1772_s0 = inlined_call_operand.vmem [shape: bf16[2,16,32], index: 0, kind: input, shape index: {}]   ;;  %s1773_s1 = inlined_call_operand.vmem [shape: f32[2,16,32], index: 1, kind: input, shape index: {}, may-alias: {1,12}]   ;;  %s1774_s2 = inlined_call_operand.vmem [shape: f32[2,2,1,32], index: 2, kind: input, shape index: {}]   ;;  %s1775_s3 = inlined_call_operand.vmem [shape: f32[2,2,1,32], index: 3, kind: input, shape index: {}]   ;;  %s1776_s4 = inlined_call_operand.vmem [shape: f32[2,2,1,32], index: 4, kind: input, shape index: {}]   ;;  %s1777_s5 = inlined_call_operand.vmem [shape: f32[2,2,1,32], index: 5, kind: input, shape index: {}]   ;;  %s1778_s6 = inlined_call_operand.vmem [shape: bf16[2,32,32], index: 6, kind: input, shape index: {}]   ;;  %s1779_s7 = inlined_call_operand.vmem [shape: f32[2,1,32], index: 7, kind: input, shape index: {}]   ;;  %s1780_s8 = inlined_call_operand.vmem [shape: bf16[2,32,128], index: 8, kind: input, shape index: {}]   ;;  %s1781_s9 = inlined_call_operand.vmem [shape: f32[2,1,128], index: 9, kind: input, shape index: {}]   ;;  %s1782_s10 = inlined_call_operand.vmem [shape: bf16[2,128,32], index: 10, kind: input, shape index: {}]   ;;  %s1783_s11 = inlined_call_operand.vmem [shape: f32[2,1,32], index: 11, kind: input, shape index: {}]   ;;  %s1784_s12 = inlined_call_operand.vmem [shape: f32[2,16,32], index: 12, kind: output, shape index: {}, may-alias: {1,12}]  }
   0x1   :  { %1787 = sst [smem:[#allocation7_spill]] %s1778_s6  ;;  %s1625_s23 = smov 0  }
   0x2   :  { %s1627_s24 = smov 0   ;;  %s1629_s25 = smov 0  }
   0x3 LB: > { %1788 = sst [smem:[#allocation4_spill]] %s1548_s24  ;;  %s37_s26 = sadd.s32 1, %s1544_s23  ;;  %s1552_s25 = sphi %s1629_s25, %s22_s25   ;;  %s1548_s24 = sphi %s1627_s24, %s1795_s24   ;;  %s1544_s23 = sphi %s1625_s23, %s1797_s23   ;;  %s1540_s22 = sphi %s1623_s22, %s1793_s22   ;;  %s1536_s21 = sphi %s1621_s21, %s1796_s21  }
   0x4   : > { %s41_s27 = sadd.s32 1, %s1548_s24  ;;  %p39_p0 = scmp.ge.s32.totalorder %s37_s26, 2 }
   0x5   : > { %p1376_p1 = scmp.ge.s32.totalorder %s1552_s25, 1  ;;  %p610_p2 = scmp.lt.s32.totalorder %s1552_s25, 5 }
   0x6   : > { %s1799_s26 = smov (%p39_p0, %s37_s26), 0  ;;  %s1801_s27 = smov (!%p39_p0, %s41_s27), %s1548_s24 }
   0x7   : > { %1789 = sst [smem:[#allocation5_spill]] %s1799_s26  ;;  %p611_p3 = pnand %p1376_p1, %p610_p2 }
   0x8   : > { %p43_p4 = scmp.ge.s32.totalorder %s1801_s27, 2  ;;  %p764_p5 = scmp.ge.s32.totalorder (!%p611_p3), %s1540_s22, 1 }
   0x9   : > { %614 = sbr.rel (%p611_p3) target bundleno = 628 (0x274), region = 68  ;;  %p748_p6 = scmp.lt.s32.totalorder (!%p611_p3), %s1536_s21, 1 }
   0xa   : > { %s1803_s27 = smov (%p43_p4, %s1801_s27), 0  ;;  %p750_p7 = scmp.lt.s32.totalorder (!%p611_p3), %s1540_s22, 1 }
   0xb   : > { %1790 = sst [smem:[#allocation6_spill]] %s1803_s27 }
   0xc   : > { %s1791_s6 = sld [smem:[#allocation7_spill]] (!%p611_p3) }
   0xe   : > { %s765_s28 = scalar_select %p764_p5, 1, 0  ;;  %vm902_vm0 = vcmask 261120   ;;  %v1554_v14 = vmov 32.0   ;;  %vm969_vm5 = vcmask 257024   ;;  %v1555_v56 = vmov 0.0  }
   0xf   : > { %s1805_s21 = smov (!%p748_p6, %s1536_s21), 1  ;;  %s1807_s22 = smov (!%p750_p7, %s1540_s22), 1  ;;  %1508 = vrcp.f32 %v1554_v14  ;;  %971 = vst.msk [vmem:[#allocation3] sm:$0xff] %vm902_vm0, %v1555_v56 }
  0x10   : > { %p766_p8 = scmp.lt.s32.totalorder %s765_s28, 1  ;;  %s1377_s29 = sshll.u32 %s1805_s21, 1 }
  0x11   : > { %s1659_s16 = sadd.s32 %s1377_s29, %s1807_s22 }
  0x12   : > { %s1809_s28 = smov (!%p766_p8, %s765_s28), 1  ;;  %s1378_s18 = sshll.u32 %s1659_s16, 2 }
  0x13   : > { %s1785_s30 = sshll.u32 %s1809_s28, 4  ;;  %s1381_s17 = sshll.u32 %s1809_s28, 1 }
  0x14   : > { %s814_s15 = scalar_lea.vmem %s1791_s6, %s1785_s30  ;;  %s755_s27 = scalar_lea.vmem %s1772_s0, %s1378_s18 }
  0x15   : > { %v1449_v0 = vld [vmem:[%s814_s15 + $0x8] sm:$0xff]  ;;  %v1448_v1 = vld [vmem:[%s814_s15] sm:$0xff]  ;;  %s1666_s26 = sadd.s32 %s1381_s17, %s1805_s21  ;;  %s821_s19 = scalar_lea.vmem %s1779_s7, %s1809_s28  ;;  %v1509_v15 = vpop.eup %1508 }
  0x16   : > { %912 = vmatpush.bf16.msra.mxu0 %v1449_v0  ;;  %s783_s22 = scalar_lea.vmem %s1775_s3, %s1666_s26  ;;  %s805_s6 = scalar_lea.vmem %s1777_s5, %s1666_s26  ;;  %v880_v2 = vld [vmem:[%s755_s27] sm:$0xf]  ;;  %v929_v16 = vmul.f32 32.0, %v1509_v15  ;;  %vm933_vm1 = vweird.f32 %v1509_v15 }
  0x17   : > { %s772_s18 = scalar_lea.vmem %s1774_s2, %s1666_s26  ;;  %s1380_s20 = sshll.u32 %s1659_s16, 3  ;;  %v1504_v3 = vld [vmem:[%s821_s19] ss:$0 sm:$0xff] }
  0x18   : > { %s763_s14 = scalar_lea.vmem %s1773_s1, %s1380_s20  ;;  %v1505_v4 = vld [vmem:[%s772_s18] ss:$0 sm:$0xff]  ;;  %s843_s29 = scalar_lea.vmem %s1781_s9, %s1809_s28  ;;  %v930_v17 = vsub.f32 1.0, %v929_v16 }
  0x19   : > { %v1691_v7 = vld [vmem:[%s763_s14] sm:$0xff]  ;;  %s1792_s15 = sshll.u32 %s1809_s28, 4  ;;  %s1447_s19 = sshll.u32 %s1809_s28, 6 }
  0x1a   : > { %913 = vmatpush.bf16.msra.mxu0 %v1448_v1  ;;  %v931_v18 = vmul.f32 %v1509_v15, %v930_v17  ;;  %s833_s17 = scalar_lea.vmem %s1780_s8, %s1792_s15  ;;  %s1709_s14 = scalar_lea.vmem %s1782_s10, %s1447_s19  ;;  %v1502_v44 = vld [vmem:[%s783_s22] ss:$0 sm:$0xff] }
  0x1b   : > { %v1451_v26 = vld [vmem:[%s833_s17 + $0x8] sm:$0xff]  ;;  %v1450_v28 = vld [vmem:[%s833_s17] sm:$0xff]  ;;  %v1459_v31 = vld [vmem:[%s1709_s14 + $0x38] sm:$0xff]  ;;  %s794_s15 = scalar_lea.vmem %s1776_s4, %s1666_s26  ;;  %s864_s13 = scalar_lea.vmem %s1783_s11, %s1809_s28 }
  0x1c   : > { %v932_v19 = vadd.f32 %v1509_v15, %v931_v18  ;;  %1003 = vmatpush.bf16.msra.mxu1 %v1451_v26  ;;  %1085 = vmatpush.bf16.msra.mxu2 %v1459_v31  ;;  %v1458_v32 = vld [vmem:[%s1709_s14 + $0x30] sm:$0xff]  ;;  %v957_v35 = vld [vmem:[%s794_s15] sm:$0x1]  ;;  %v1457_v50 = vld [vmem:[%s1709_s14 + $0x28] sm:$0xff]  ;;  %s874_s21 = scalar_lea.vmem %s1784_s12, %s1380_s20 }
  0x1d   : > { %1401 = vmatmul.msk.bf16.vlgmr.msra.gmra.mxu0 %vm902_vm0, %v880_v2  ;;  %v958_v38 = vadd.f32 1.0, %v957_v35  ;;  %v1456_v51 = vld [vmem:[%s1709_s14 + $0x20] sm:$0xff]  ;;  %v1455_v52 = vld [vmem:[%s1709_s14 + $0x18] sm:$0xff]  ;;  %v1454_v53 = vld [vmem:[%s1709_s14 + $0x10] sm:$0xff] }
  0x1e   : > { %v934_v21 = vsel %vm933_vm1, %v1509_v15, %v932_v19  ;;  %v1453_v54 = vld [vmem:[%s1709_s14 + $0x8] sm:$0xff]  ;;  %v1452_v55 = vld [vmem:[%s1709_s14] sm:$0xff] }
  0x1f   : > { %v960_v41 = vperm.slane %v958_v38, 0  ;;  %v1506_v57 = vld [vmem:[%s843_s29] ss:$0 sm:$0xff] }
  0x20   : > { %1004 = vmatpush.bf16.msra.mxu1 %v1450_v28  ;;  %1086 = vmatpush.bf16.msra.mxu2 %v1458_v32 }
  0x24   : > { %1087 = vmatpush.bf16.msra.mxu2 %v1457_v50 }
  0x28   : > { %1088 = vmatpush.bf16.msra.mxu2 %v1456_v51 }
  0x2c   : > { %1089 = vmatpush.bf16.msra.mxu2 %v1455_v52 }
  0x30   : > { %1090 = vmatpush.bf16.msra.mxu2 %v1454_v53 }
  0x34   : > { %1091 = vmatpush.bf16.msra.mxu2 %v1453_v54 }
  0x38   : > { %1092 = vmatpush.bf16.msra.mxu2 %v1452_v55 }
  0x9a   : > { %v915_v5 = vpop.f32.mrf.mxu0 }
  0x9b   : > { %v916_v6 = vadd.f32 %v1504_v3, %v915_v5 }
  0x9d   : > { %v923_v8 = vmul.f32 %v1505_v4, %v916_v6 }
  0x9f   : > { %v924_v9 = vadd.f32 %v1691_v7, %v923_v8  ;;  %v1019_v8 = vld [vmem:[#allocation3] sm:$0xff] }
  0xa1   : > { %v925_v10 = vsel %vm902_vm0, %v924_v9, 0.0  ;;  %v936_v12 = vmul.f32 %v924_v9, %v924_v9 }
  0xa2   : > { %v917_v11 = vpop.f32.mrf.mxu0  ;;  %926 = vadd.xlane.f32.xlu0 %v925_v10 }
  0xa3   : > { %v937_v13 = vsel %vm902_vm0, %v936_v12, 0.0  ;;  %v1507_v11 = vld [vmem:[%s864_s13] ss:$0 sm:$0xff] }
  0xaa   : > { %938 = vadd.xlane.f32.xlu0 %v937_v13  ;;  %v1503_v13 = vld [vmem:[%s805_s6] ss:$0 sm:$0xff] }
 0x115   : > { %v927_v20 = vpop.xlane.xlu0 %926 }
 0x116   : > { %v935_v22 = vmul.f32 %v934_v21, %v927_v20 }
 0x118   : > { %v941_v24 = vmul.f32 %v935_v22, %v935_v22  ;;  %v944_v42 = vsub.f32 %v924_v9, %v935_v22 }
 0x11d   : > { %v939_v23 = vpop.xlane.xlu0 %938 }
 0x11e   : > { %v940_v25 = vmul.f32 %v939_v23, %v934_v21 }
 0x120   : > { %v942_v27 = vsub.f32 %v940_v25, %v941_v24 }
 0x122   : > { %v943_v29 = vmax.f32 %v942_v27, 0.0 }
 0x124   : > { %v945_v30 = vadd.f32 1e-06, %v943_v29 }
 0x126   : > { %1510 = vrsqrt.f32 %v945_v30  ;;  %vm952_vm3 = vweird.f32 %v945_v30 }
 0x12c   : > { %v1511_v33 = vpop.eup %1510 }
 0x12d   : > { %v947_v34 = vmul.f32 %v1511_v33, %v945_v30  ;;  %vm953_vm2 = vweird.f32 %v1511_v33 }
 0x12e   : > { %vm954_vm4 = vmor %vm952_vm3, %vm953_vm2 }
 0x12f   : > { %v948_v36 = vmul.f32 %v1511_v33, %v947_v34 }
 0x131   : > { %v949_v37 = vmul.f32 0.5, %v948_v36 }
 0x133   : > { %v950_v39 = vsub.f32 1.5, %v949_v37 }
 0x135   : > { %v951_v40 = vmul.f32 %v1511_v33, %v950_v39 }
 0x137   : > { %v955_v43 = vsel %vm954_vm4, %v1511_v33, %v951_v40 }
 0x138   : > { %v956_v45 = vmul.f32 %v955_v43, %v944_v42 }
 0x13a   : > { %v962_v46 = vmul.f32 %v960_v41, %v956_v45 }
 0x13c   : > { %v967_v47 = vadd.f32 %v1502_v44, %v962_v46 }
 0x13e   : > { %v968_v48 = vpack.c.bf16 %v967_v47, %v967_v47 }
 0x140   : > { %970 = vst.msk [vmem:[#allocation2] sm:$0xf] %vm969_vm5, %v968_v48 }
 0x147   : > { %v972_v49 = vld [vmem:[#allocation2] sm:$0xf] }
 0x148   : > { %1410 = vmatmul.msk.bf16.vlgmr.msra.gmra.mxu1 %vm902_vm0, %v972_v49 }
 0x1c5   : > { %v1006_v58 = vpop.f32.mrf.mxu1 }
 0x1c6   : > { %v1007_v59 = vadd.f32 %v1506_v57, %v1006_v58 }
 0x1c8   : > { %v1011_v60 = vmul.f32 0.044715, %v1007_v59  ;;  %v1010_v3 = vmul.f32 0.5, %v1007_v59 }
 0x1ca   : > { %v1012_v61 = vmul.f32 %v1011_v60, %v1007_v59 }
 0x1cc   : > { %v1013_v62 = vmul.f32 %v1012_v61, %v1007_v59 }
 0x1cd   : > { %v1008_v63 = vpop.f32.mrf.mxu1 }
 0x1ce   : > { %v1014_v0 = vadd.f32 %v1013_v62, %v1007_v59 }
 0x1d0   : > { %v1015_v1 = vmul.f32 0.7978846, %v1014_v0 }
 0x1d2   : > { %1512 = vtanh.f32 %v1015_v1 }
 0x1d8   : > { %v1513_v2 = vpop.eup %1512 }
 0x1d9   : > { %v1017_v4 = vadd.f32 1.0, %v1513_v2 }
 0x1db   : > { %v1018_v5 = vmul.f32 %v1017_v4, %v1010_v3 }
 0x1dd   : > { %v1020_v6 = vpack.c.bf16 %v1018_v5, %v1018_v5 }
 0x1df   : > { %1093 = vmatmul.bf16.vlgmr.msra.gmra.mxu2 %v1020_v6 }
 0x262   : > { %v1094_v9 = vpop.f32.mrf.mxu2 }
 0x263   : > { %v1098_v10 = vadd.f32 %v1094_v9, %v1019_v8 }
 0x265   : > { %1099 = vst.msk [vmem:[#allocation3] sm:$0xff] %vm902_vm0, %v1098_v10 }
 0x26a   : > { %v1096_v12 = vpop.f32.mrf.mxu2 }
 0x26c   : > { %v1103_v14 = vld [vmem:[#allocation3] sm:$0xff] }
 0x26d   : > { %v1108_v15 = vadd.f32 %v1507_v11, %v1103_v14 }
 0x26f   : > { %v1114_v16 = vmul.f32 %v1503_v13, %v1108_v15 }
 0x271   : > { %v1115_v17 = vadd.f32 %v1114_v16, %v1691_v7 }
 0x273   : > { %1116 = vst.msk [vmem:[%s874_s21] sm:$0xff] %vm902_vm0, %v1115_v17 }
 0x274 PF: > { %s22_s25 = sadd.s32 1, %s1552_s25   ;;  %s1793_s22 = sld [smem:[#allocation4_spill]] }
 0x275   : > { %p19_p9 = scmp.ge.s32.totalorder %s22_s25, 6   ;;  %s1794_s26 = sld [smem:[#allocation5_spill]] }
 0x276   : > { %s1795_s24 = sld [smem:[#allocation6_spill]]  ;;  %s1796_s21 = smov %s1544_s23 }
 0x277   :  { %21 = sbr.rel (!%p19_p9) target bundleno = 3 (0x3), region = 139 }
 0x27b   : > { %s1797_s23 = smov %s1794_s26 }

</bundles_post_ra>
